<compile_context>
chip_gen: v7x
topology: tpu7x:2x2x1
jax: 0.10.0
libtpu: 0.0.40
codegen_flags: <defaults>
</compile_context>

<pallas_src>
import jax
import jax.numpy as jnp
from jax import lax
from jax.experimental import pallas as pl
from jax.experimental.pallas import tpu as pltpu


def res_se_block_kernel(
    xpad_ref,   # [1, H+2, (W+2)*Cin]   zero-padded input rows (matmul dtype)
    xres_ref,   # [1, H,   W*Cin]       residual input, f32, lane-dense
    w1b_ref,    # [3, (W+2)*Cin, (W+2)*Cout]  banded conv1 weights (matmul dtype)
    s1_ref,     # [1, (W+2)*Cout]       folded bn1 scale, tiled, halo = 0
    b1_ref,     # [1, (W+2)*Cout]       folded bn1 bias,  tiled, halo = 0
    w2b_ref,    # [3, (W+2)*Cout, W*Cout]     banded conv2 weights (matmul dtype)
    s2_ref,     # [1, W*Cout]           folded bn2 scale, tiled
    b2_ref,     # [1, W*Cout]           folded bn2 bias,  tiled
    pool_ref,   # [W*Cout, Cout]        tiled identity / (H*W)  (avg-pool matmul)
    fc1_ref,    # [Cout, hid_pad]       SE fc1 (transposed, hidden zero-padded)
    fc2t_ref,   # [hid_pad, W*Cout]     SE fc2 (transposed, tiled along W)
    out_ref,    # [1, H, W*Cout]        f32
):
    H = out_ref.shape[1]
    mm_dtype = xpad_ref.dtype

    # Hoisted, lane-dense folded-BN broadcasts.
    s1 = s1_ref[0]
    b1 = b1_ref[0]
    s2 = s2_ref[0]
    b2 = b2_ref[0]

    # ---- conv1: 3 banded matmuls, K=(W+2)*Cin; output is already in the
    #      padded (W+2)*Cout column layout conv2 consumes (halo columns = 0). ----
    xp = xpad_ref[0]                                        # [(H+2), (W+2)*Cin]
    acc1 = jnp.dot(xp[0:H], w1b_ref[0], preferred_element_type=jnp.float32)
    for kh in (1, 2):
        acc1 = acc1 + jnp.dot(xp[kh:kh + H], w1b_ref[kh],
                              preferred_element_type=jnp.float32)

    # ---- bn1 (folded; zero scale/bias keeps halo columns exactly 0) + relu ----
    y1 = jnp.maximum(acc1 * s1 + b1, 0.0)                   # [H, (W+2)*Cout] f32

    # ---- conv2: 3 banded matmuls.  H-halo handled by concatenating one zero
    #      row -- no padded scratch buffer, no zero-fill. ----
    zrow = jnp.zeros((1, y1.shape[1]), jnp.float32)
    slab_top = jnp.concatenate([zrow, y1[:H - 1]], axis=0)  # tap kh = 0
    slab_bot = jnp.concatenate([y1[1:], zrow], axis=0)      # tap kh = 2
    acc2 = jnp.dot(slab_top.astype(mm_dtype), w2b_ref[0],
                   preferred_element_type=jnp.float32)
    acc2 = acc2 + jnp.dot(y1.astype(mm_dtype), w2b_ref[1],
                          preferred_element_type=jnp.float32)
    acc2 = acc2 + jnp.dot(slab_bot.astype(mm_dtype), w2b_ref[2],
                          preferred_element_type=jnp.float32)

    # ---- bn2 (folded), lane-dense ----
    out_t = acc2 * s2 + b2                                  # [H, W*Cout] f32

    # ---- SE: global average pool (lane-reducing matmul + cross-row sum),
    #      fc1 -> relu -> fc2(tiled) -> sigmoid => lane-dense gate. ----
    pooled = jnp.sum(
        jnp.dot(out_t, pool_ref[...], preferred_element_type=jnp.float32),
        axis=0, keepdims=True)                              # [1, Cout] (== mean)
    h = jnp.maximum(
        jnp.dot(pooled, fc1_ref[...], preferred_element_type=jnp.float32), 0.0)
    gate = jax.nn.sigmoid(
        jnp.dot(h, fc2t_ref[...], preferred_element_type=jnp.float32))  # [1, W*Cout]

    # ---- channel re-weighting + residual + final relu (all lane-dense) ----
    out = gate * out_t + xres_ref[0]
    out_ref[0] = jnp.maximum(out, 0.0).astype(out_ref.dtype)


def _banded_conv_weights(w, W, pad_output_halo):
    """w: [3, 3, Cin, Cout] HWIO.  Returns [3, (W+2)*Cin, ncols*Cout] block-banded
    matrices so that out[h] = sum_kh x_pad_row[h+kh] @ Wb[kh] is the 3x3 'SAME'
    conv on rows flattened as (width, channel) -> lanes.  With pad_output_halo,
    the output has (W+2) column blocks with all-zero halo blocks, i.e. it is
    already in the padded layout the next conv consumes."""
    Cin, Cout = w.shape[2], w.shape[3]
    Wp = W + 2
    rw = jnp.arange(Wp)                                  # padded input col block
    if pad_output_halo:
        cw = jnp.arange(Wp)                              # padded output col block
        kw = rw[:, None] - cw[None, :] + 1
        valid = (kw >= 0) & (kw <= 2) & (cw[None, :] >= 1) & (cw[None, :] <= W)
        ncols = Wp
    else:
        cw = jnp.arange(W)
        kw = rw[:, None] - cw[None, :]
        valid = (kw >= 0) & (kw <= 2)
        ncols = W
    gathered = w[:, jnp.clip(kw, 0, 2)]                  # [3, Wp, ncols, Cin, Cout]
    banded = gathered * valid[None, :, :, None, None].astype(w.dtype)
    banded = banded.transpose(0, 1, 3, 2, 4)             # [3, Wp, Cin, ncols, Cout]
    return banded.reshape(3, Wp * Cin, ncols * Cout)


def prepare_kernel_params(params, H, W, matmul_dtype):
    w1, w2 = params["w1"], params["w2"]
    Cout = w1.shape[-1]
    Wp = W + 2

    w1b = _banded_conv_weights(w1, W, pad_output_halo=True).astype(matmul_dtype)
    w2b = _banded_conv_weights(w2, W, pad_output_halo=False).astype(matmul_dtype)

    # Folded (eval-mode) BN scale/bias, pre-tiled to lane-dense rows.  conv1's
    # halo column blocks get zero scale/bias so the padded columns stay 0.
    zc = jnp.zeros((Cout,), jnp.float32)
    s1t = jnp.concatenate([zc, jnp.tile(params["s1"], W), zc]).reshape(1, Wp * Cout)
    b1t = jnp.concatenate([zc, jnp.tile(params["b1"], W), zc]).reshape(1, Wp * Cout)
    s2t = jnp.tile(params["s2"], W).reshape(1, W * Cout)
    b2t = jnp.tile(params["b2"], W).reshape(1, W * Cout)

    # Global average pool as a matmul: tiled identity scaled by 1/(H*W).
    pool = jnp.tile(jnp.eye(Cout, dtype=jnp.float32), (W, 1)) / float(H * W)

    # SE FC weights: pad the tiny hidden dim to 128 (exact: padded rows/cols are
    # zero) and tile fc2 along W so the sigmoid gate is produced lane-dense.
    fc1_t, fc2_t = params["fc1_t"], params["fc2_t"]
    hid = fc1_t.shape[1]
    hid_pad = ((hid + 127) // 128) * 128
    fc1_p = jnp.zeros((Cout, hid_pad), jnp.float32).at[:, :hid].set(fc1_t)
    fc2_tiled = jnp.zeros((hid_pad, W * Cout), jnp.float32).at[:hid, :].set(
        jnp.tile(fc2_t, (1, W)))

    return dict(w1b=w1b, s1t=s1t, b1t=b1t, w2b=w2b, s2t=s2t, b2t=b2t,
                pool=pool, fc1_p=fc1_p, fc2_tiled=fc2_tiled)


def res_se_basic_block(x_nhwc, params, *, matmul_dtype=jnp.bfloat16):
    """Forward pass of Res_SE_BasicBlock. x_nhwc: [N, H, W, C] float32.
    stride=1, no downsample (in_channels == out_channels), eval-mode BN."""
    N, H, W, Cin = x_nhwc.shape
    Cout = params["w1"].shape[-1]
    assert Cin == Cout, "stride=1 / no-downsample block requires Cin == Cout"
    Wp = W + 2

    kp = prepare_kernel_params(params, H, W, matmul_dtype)
    hid_pad = kp["fc1_p"].shape[1]

    # Lane-dense, zero-padded input rows: [N, H+2, (W+2)*Cin] (wrapper reshape
    # is free layout plumbing).  Residual stays f32.
    x_pad = jnp.pad(x_nhwc, ((0, 0), (1, 1), (1, 1), (0, 0)))
    x_pad = x_pad.reshape(N, H + 2, Wp * Cin).astype(matmul_dtype)
    x_res = x_nhwc.reshape(N, H, W * Cin)

    K1 = Wp * Cin          # conv1 contraction width
    N1 = Wp * Cout         # conv1 output width (padded layout)
    N2 = W * Cout          # conv2 / block output width

    out_flat = pl.pallas_call(
        res_se_block_kernel,
        out_shape=jax.ShapeDtypeStruct((N, H, N2), jnp.float32),
        grid=(N,),
        in_specs=[
            pl.BlockSpec((1, H + 2, K1), lambda n: (n, 0, 0)),
            pl.BlockSpec((1, H, W * Cin), lambda n: (n, 0, 0)),
            pl.BlockSpec((3, K1, N1), lambda n: (0, 0, 0)),
            pl.BlockSpec((1, N1), lambda n: (0, 0)),
            pl.BlockSpec((1, N1), lambda n: (0, 0)),
            pl.BlockSpec((3, N1, N2), lambda n: (0, 0, 0)),
            pl.BlockSpec((1, N2), lambda n: (0, 0)),
            pl.BlockSpec((1, N2), lambda n: (0, 0)),
            pl.BlockSpec((N2, Cout), lambda n: (0, 0)),
            pl.BlockSpec((Cout, hid_pad), lambda n: (0, 0)),
            pl.BlockSpec((hid_pad, N2), lambda n: (0, 0)),
        ],
        out_specs=pl.BlockSpec((1, H, N2), lambda n: (n, 0, 0)),
        # One image per grid step -> megacore-parallel across the 2 TCs on v7x.
        # Working set is ~8 MiB (bf16 weights), so the default scoped VMEM limit
        # is plenty on v5e/v6e/v7x -- no vmem_limit_bytes override.
        compiler_params=pltpu.CompilerParams(
            dimension_semantics=("parallel",)),
    )(x_pad, x_res, kp["w1b"], kp["s1t"], kp["b1t"], kp["w2b"], kp["s2t"],
      kp["b2t"], kp["pool"], kp["fc1_p"], kp["fc2_tiled"])

    return out_flat.reshape(N, H, W, Cout)


def make_params(key, in_channels, out_channels, reduction=16, eps=1e-5):
    """Deterministic synthetic parameters (HWIO convs, folded eval-mode BN,
    transposed SE FC weights) matching the PyTorch module's shapes."""
    hidden = out_channels // reduction
    ks = jax.random.split(key, 10)
    w1 = 0.1 * jax.random.normal(ks[0], (3, 3, in_channels, out_channels), jnp.float32)
    w2 = 0.1 * jax.random.normal(ks[1], (3, 3, out_channels, out_channels), jnp.float32)
    g1 = 1.0 + 0.1 * jax.random.normal(ks[2], (out_channels,), jnp.float32)
    be1 = 0.1 * jax.random.normal(ks[3], (out_channels,), jnp.float32)
    m1 = 0.1 * jax.random.normal(ks[4], (out_channels,), jnp.float32)
    v1 = jnp.abs(jax.random.normal(ks[5], (out_channels,), jnp.float32)) + 0.5
    g2 = 1.0 + 0.1 * jax.random.normal(ks[6], (out_channels,), jnp.float32)
    be2 = 0.1 * jax.random.normal(ks[7], (out_channels,), jnp.float32)
    m2 = 0.1 * jax.random.normal(ks[8], (out_channels,), jnp.float32)
    v2 = jnp.abs(jax.random.normal(ks[9], (out_channels,), jnp.float32)) + 0.5
    k_fc1, k_fc2 = jax.random.split(jax.random.fold_in(key, 123))
    fc1_w = 0.2 * jax.random.normal(k_fc1, (hidden, out_channels), jnp.float32)
    fc2_w = 0.2 * jax.random.normal(k_fc2, (out_channels, hidden), jnp.float32)
    # Fold BN (inference semantics) into per-channel scale/bias.
    s1 = g1 / jnp.sqrt(v1 + eps)
    b1 = be1 - m1 * s1
    s2 = g2 / jnp.sqrt(v2 + eps)
    b2 = be2 - m2 * s2
    return {"w1": w1, "w2": w2, "s1": s1, "b1": b1, "s2": s2, "b2": b2,
            "fc1_t": fc1_w.T, "fc2_t": fc2_w.T}


def ref_forward(x_nhwc, params, matmul_dtype=jnp.float32):
    """Pure-XLA reference of the same forward pass.  `matmul_dtype` rounds the
    conv inputs/weights exactly like the kernel's MXU path (bf16 operands,
    f32 accumulation); pass jnp.float32 for a full-precision reference."""
    def rnd(a):
        return a.astype(matmul_dtype).astype(jnp.float32)

    dn = lax.conv_dimension_numbers(x_nhwc.shape, params["w1"].shape,
                                    ("NHWC", "HWIO", "NHWC"))
    y = lax.conv_general_dilated(rnd(x_nhwc), rnd(params["w1"]), (1, 1), "SAME",
                                 dimension_numbers=dn)
    y = jnp.maximum(y * params["s1"] + params["b1"], 0.0)
    y = lax.conv_general_dilated(rnd(y), rnd(params["w2"]), (1, 1), "SAME",
                                 dimension_numbers=dn)
    out_t = y * params["s2"] + params["b2"]
    pooled = jnp.mean(out_t, axis=(1, 2))
    h = jnp.maximum(pooled @ params["fc1_t"], 0.0)
    g = jax.nn.sigmoid(h @ params["fc2_t"])
    out = g[:, None, None, :] * out_t + x_nhwc
    return jnp.maximum(out, 0.0)


if __name__ == "__main__":
    # Shapes consistent with the module: N=2, C=32 (reduction=16 -> hidden=2),
    # 16x16 spatial, stride=1, no downsample (in_channels == out_channels).
    N, H, W, C = 2, 16, 16, 32
    key = jax.random.PRNGKey(0)
    kx, kparam = jax.random.split(key)
    x_nchw = jax.random.normal(kx, (N, C, H, W), jnp.float32)   # PyTorch-style input
    x_nhwc = jnp.transpose(x_nchw, (0, 2, 3, 1))                # kernel layout

    params = make_params(kparam, in_channels=C, out_channels=C, reduction=16)

    mm_dtype = jnp.bfloat16   # production MXU path (bf16 operands, f32 accumulation)
    out = res_se_basic_block(x_nhwc, params, matmul_dtype=mm_dtype)
    out = jax.block_until_ready(out)

    ref = jax.block_until_ready(ref_forward(x_nhwc, params, matmul_dtype=mm_dtype))
    assert out.shape == (N, H, W, C)
    diff = jnp.abs(out - ref)
    max_err = float(jnp.max(diff))
    mean_err = float(jnp.mean(diff))
    # Tolerance accounts for bf16 rounding-boundary flips of conv2's input
    # between the kernel and the XLA reference (both use f32 accumulation).
    assert max_err < 3e-2, max_err
    assert mean_err < 1e-3, mean_err
    print("KERNEL_OK")
</pallas_src>

<mosaic_0001>
module attributes {stable_mosaic.version = 11 : i64} {
  func.func @res_se_block_kernel(%arg0: i32, %arg1: memref<1x18x576xbf16, #tpu.memory_space<vmem>>, %arg2: memref<1x16x512xf32, #tpu.memory_space<vmem>>, %arg3: memref<3x576x576xbf16, #tpu.memory_space<vmem>>, %arg4: memref<1x576xf32, #tpu.memory_space<vmem>>, %arg5: memref<1x576xf32, #tpu.memory_space<vmem>>, %arg6: memref<3x576x512xbf16, #tpu.memory_space<vmem>>, %arg7: memref<1x512xf32, #tpu.memory_space<vmem>>, %arg8: memref<1x512xf32, #tpu.memory_space<vmem>>, %arg9: memref<512x32xf32, #tpu.memory_space<vmem>>, %arg10: memref<32x128xf32, #tpu.memory_space<vmem>>, %arg11: memref<128x512xf32, #tpu.memory_space<vmem>>, %arg12: memref<1x16x512xf32, #tpu.memory_space<vmem>>) attributes {dimension_semantics = [#tpu.dimension_semantics<parallel>], iteration_bounds = array<i64: 2>, scalar_prefetch = 0 : i64, scratch_operands = 0 : i64, tpu.core_type = #tpu.core_type<tc>, window_params = [{transform_indices = @transform_0, window_bounds = array<i64: 1, 18, 576>}, {transform_indices = @transform_1, window_bounds = array<i64: 1, 16, 512>}, {pipeline_mode = #tpu.pipeline_mode<synchronous>, transform_indices = @transform_2, window_bounds = array<i64: 3, 576, 576>}, {pipeline_mode = #tpu.pipeline_mode<synchronous>, transform_indices = @transform_3, window_bounds = array<i64: 1, 576>}, {pipeline_mode = #tpu.pipeline_mode<synchronous>, transform_indices = @transform_4, window_bounds = array<i64: 1, 576>}, {pipeline_mode = #tpu.pipeline_mode<synchronous>, transform_indices = @transform_5, window_bounds = array<i64: 3, 576, 512>}, {pipeline_mode = #tpu.pipeline_mode<synchronous>, transform_indices = @transform_6, window_bounds = array<i64: 1, 512>}, {pipeline_mode = #tpu.pipeline_mode<synchronous>, transform_indices = @transform_7, window_bounds = array<i64: 1, 512>}, {pipeline_mode = #tpu.pipeline_mode<synchronous>, transform_indices = @transform_8, window_bounds = array<i64: 512, 32>}, {pipeline_mode = #tpu.pipeline_mode<synchronous>, transform_indices = @transform_9, window_bounds = array<i64: 32, 128>}, {pipeline_mode = #tpu.pipeline_mode<synchronous>, transform_indices = @transform_10, window_bounds = array<i64: 128, 512>}, {transform_indices = @transform_11, window_bounds = array<i64: 1, 16, 512>}]} {
    %c0 = arith.constant 0 : index
    %c0_0 = arith.constant 0 : index
    %0 = vector.load %arg4[%c0, %c0_0] : memref<1x576xf32, #tpu.memory_space<vmem>>, vector<1x576xf32>
    %1 = vector.shape_cast %0 : vector<1x576xf32> to vector<576xf32>
    %c0_1 = arith.constant 0 : index
    %c0_2 = arith.constant 0 : index
    %2 = vector.load %arg5[%c0_1, %c0_2] : memref<1x576xf32, #tpu.memory_space<vmem>>, vector<1x576xf32>
    %3 = vector.shape_cast %2 : vector<1x576xf32> to vector<576xf32>
    %c0_3 = arith.constant 0 : index
    %c0_4 = arith.constant 0 : index
    %4 = vector.load %arg7[%c0_3, %c0_4] : memref<1x512xf32, #tpu.memory_space<vmem>>, vector<1x512xf32>
    %5 = vector.shape_cast %4 : vector<1x512xf32> to vector<512xf32>
    %c0_5 = arith.constant 0 : index
    %c0_6 = arith.constant 0 : index
    %6 = vector.load %arg8[%c0_5, %c0_6] : memref<1x512xf32, #tpu.memory_space<vmem>>, vector<1x512xf32>
    %7 = vector.shape_cast %6 : vector<1x512xf32> to vector<512xf32>
    %c0_7 = arith.constant 0 : index
    %c0_8 = arith.constant 0 : index
    %c0_9 = arith.constant 0 : index
    %8 = vector.load %arg1[%c0_7, %c0_8, %c0_9] : memref<1x18x576xbf16, #tpu.memory_space<vmem>>, vector<1x18x576xbf16>
    %9 = vector.shape_cast %8 : vector<1x18x576xbf16> to vector<18x576xbf16>
    %10 = vector.extract_strided_slice %9 {offsets = [0, 0], sizes = [16, 576], strides = [1, 1]} : vector<18x576xbf16> to vector<16x576xbf16>
    %c0_10 = arith.constant 0 : index
    %c0_11 = arith.constant 0 : index
    %c0_12 = arith.constant 0 : index
    %11 = vector.load %arg3[%c0_10, %c0_11, %c0_12] : memref<3x576x576xbf16, #tpu.memory_space<vmem>>, vector<1x576x576xbf16>
    %12 = vector.shape_cast %11 : vector<1x576x576xbf16> to vector<576x576xbf16>
    %cst = arith.constant dense<0.000000e+00> : vector<16x576xf32>
    %13 = tpu.matmul %10, %12, %cst {dimension_numbers = #tpu.dot_dimension_numbers<[1], [0], [0], [1], [0, 0, 1, 1], [], []>} : vector<16x576xbf16>, vector<576x576xbf16>, vector<16x576xf32> -> vector<16x576xf32>
    %14 = vector.extract_strided_slice %9 {offsets = [1, 0], sizes = [16, 576], strides = [1, 1]} : vector<18x576xbf16> to vector<16x576xbf16>
    %c1 = arith.constant 1 : index
    %c0_13 = arith.constant 0 : index
    %c0_14 = arith.constant 0 : index
    %15 = vector.load %arg3[%c1, %c0_13, %c0_14] : memref<3x576x576xbf16, #tpu.memory_space<vmem>>, vector<1x576x576xbf16>
    %16 = vector.shape_cast %15 : vector<1x576x576xbf16> to vector<576x576xbf16>
    %cst_15 = arith.constant dense<0.000000e+00> : vector<16x576xf32>
    %17 = tpu.matmul %14, %16, %cst_15 {dimension_numbers = #tpu.dot_dimension_numbers<[1], [0], [0], [1], [0, 0, 1, 1], [], []>} : vector<16x576xbf16>, vector<576x576xbf16>, vector<16x576xf32> -> vector<16x576xf32>
    %18 = arith.addf %13, %17 : vector<16x576xf32>
    %19 = vector.extract_strided_slice %9 {offsets = [2, 0], sizes = [16, 576], strides = [1, 1]} : vector<18x576xbf16> to vector<16x576xbf16>
    %c2 = arith.constant 2 : index
    %c0_16 = arith.constant 0 : index
    %c0_17 = arith.constant 0 : index
    %20 = vector.load %arg3[%c2, %c0_16, %c0_17] : memref<3x576x576xbf16, #tpu.memory_space<vmem>>, vector<1x576x576xbf16>
    %21 = vector.shape_cast %20 : vector<1x576x576xbf16> to vector<576x576xbf16>
    %cst_18 = arith.constant dense<0.000000e+00> : vector<16x576xf32>
    %22 = tpu.matmul %19, %21, %cst_18 {dimension_numbers = #tpu.dot_dimension_numbers<[1], [0], [0], [1], [0, 0, 1, 1], [], []>} : vector<16x576xbf16>, vector<576x576xbf16>, vector<16x576xf32> -> vector<16x576xf32>
    %23 = arith.addf %18, %22 : vector<16x576xf32>
    %24 = vector.shape_cast %1 : vector<576xf32> to vector<1x576xf32>
    %25 = vector.broadcast %24 : vector<1x576xf32> to vector<16x576xf32>
    %26 = arith.mulf %23, %25 : vector<16x576xf32>
    %27 = vector.shape_cast %3 : vector<576xf32> to vector<1x576xf32>
    %28 = vector.broadcast %27 : vector<1x576xf32> to vector<16x576xf32>
    %29 = arith.addf %26, %28 : vector<16x576xf32>
    %cst_19 = arith.constant 0.000000e+00 : f32
    %30 = vector.broadcast %cst_19 : f32 to vector<16x576xf32>
    %31 = arith.maximumf %29, %30 : vector<16x576xf32>
    %cst_20 = arith.constant 0.000000e+00 : f32
    %32 = vector.broadcast %cst_20 : f32 to vector<1x576xf32>
    %33 = vector.extract_strided_slice %31 {offsets = [0, 0], sizes = [15, 576], strides = [1, 1]} : vector<16x576xf32> to vector<15x576xf32>
    %34 = tpu.concatenate %32, %33 in 0 : vector<1x576xf32>, vector<15x576xf32> -> vector<16x576xf32>
    %35 = vector.extract_strided_slice %31 {offsets = [1, 0], sizes = [15, 576], strides = [1, 1]} : vector<16x576xf32> to vector<15x576xf32>
    %36 = tpu.concatenate %35, %32 in 0 : vector<15x576xf32>, vector<1x576xf32> -> vector<16x576xf32>
    %37 = arith.truncf %34 : vector<16x576xf32> to vector<16x576xbf16>
    %c0_21 = arith.constant 0 : index
    %c0_22 = arith.constant 0 : index
    %c0_23 = arith.constant 0 : index
    %38 = vector.load %arg6[%c0_21, %c0_22, %c0_23] : memref<3x576x512xbf16, #tpu.memory_space<vmem>>, vector<1x576x512xbf16>
    %39 = vector.shape_cast %38 : vector<1x576x512xbf16> to vector<576x512xbf16>
    %cst_24 = arith.constant dense<0.000000e+00> : vector<16x512xf32>
    %40 = tpu.matmul %37, %39, %cst_24 {dimension_numbers = #tpu.dot_dimension_numbers<[1], [0], [0], [1], [0, 0, 1, 1], [], []>} : vector<16x576xbf16>, vector<576x512xbf16>, vector<16x512xf32> -> vector<16x512xf32>
    %41 = arith.truncf %31 : vector<16x576xf32> to vector<16x576xbf16>
    %c1_25 = arith.constant 1 : index
    %c0_26 = arith.constant 0 : index
    %c0_27 = arith.constant 0 : index
    %42 = vector.load %arg6[%c1_25, %c0_26, %c0_27] : memref<3x576x512xbf16, #tpu.memory_space<vmem>>, vector<1x576x512xbf16>
    %43 = vector.shape_cast %42 : vector<1x576x512xbf16> to vector<576x512xbf16>
    %cst_28 = arith.constant dense<0.000000e+00> : vector<16x512xf32>
    %44 = tpu.matmul %41, %43, %cst_28 {dimension_numbers = #tpu.dot_dimension_numbers<[1], [0], [0], [1], [0, 0, 1, 1], [], []>} : vector<16x576xbf16>, vector<576x512xbf16>, vector<16x512xf32> -> vector<16x512xf32>
    %45 = arith.addf %40, %44 : vector<16x512xf32>
    %46 = arith.truncf %36 : vector<16x576xf32> to vector<16x576xbf16>
    %c2_29 = arith.constant 2 : index
    %c0_30 = arith.constant 0 : index
    %c0_31 = arith.constant 0 : index
    %47 = vector.load %arg6[%c2_29, %c0_30, %c0_31] : memref<3x576x512xbf16, #tpu.memory_space<vmem>>, vector<1x576x512xbf16>
    %48 = vector.shape_cast %47 : vector<1x576x512xbf16> to vector<576x512xbf16>
    %cst_32 = arith.constant dense<0.000000e+00> : vector<16x512xf32>
    %49 = tpu.matmul %46, %48, %cst_32 {dimension_numbers = #tpu.dot_dimension_numbers<[1], [0], [0], [1], [0, 0, 1, 1], [], []>} : vector<16x576xbf16>, vector<576x512xbf16>, vector<16x512xf32> -> vector<16x512xf32>
    %50 = arith.addf %45, %49 : vector<16x512xf32>
    %51 = vector.shape_cast %5 : vector<512xf32> to vector<1x512xf32>
    %52 = vector.broadcast %51 : vector<1x512xf32> to vector<16x512xf32>
    %53 = arith.mulf %50, %52 : vector<16x512xf32>
    %54 = vector.shape_cast %7 : vector<512xf32> to vector<1x512xf32>
    %55 = vector.broadcast %54 : vector<1x512xf32> to vector<16x512xf32>
    %56 = arith.addf %53, %55 : vector<16x512xf32>
    %c0_33 = arith.constant 0 : index
    %c0_34 = arith.constant 0 : index
    %57 = vector.load %arg9[%c0_33, %c0_34] : memref<512x32xf32, #tpu.memory_space<vmem>>, vector<512x32xf32>
    %cst_35 = arith.constant dense<0.000000e+00> : vector<16x32xf32>
    %58 = tpu.matmul %56, %57, %cst_35 {dimension_numbers = #tpu.dot_dimension_numbers<[1], [0], [0], [1], [0, 0, 1, 1], [], []>} : vector<16x512xf32>, vector<512x32xf32>, vector<16x32xf32> -> vector<16x32xf32>
    %cst_36 = arith.constant dense<0.000000e+00> : vector<32xf32>
    %59 = vector.multi_reduction <add>, %58, %cst_36 [0] : vector<16x32xf32> to vector<32xf32>
    %60 = vector.shape_cast %59 : vector<32xf32> to vector<1x32xf32>
    %c0_37 = arith.constant 0 : index
    %c0_38 = arith.constant 0 : index
    %61 = vector.load %arg10[%c0_37, %c0_38] : memref<32x128xf32, #tpu.memory_space<vmem>>, vector<32x128xf32>
    %cst_39 = arith.constant dense<0.000000e+00> : vector<1x128xf32>
    %62 = tpu.matmul %60, %61, %cst_39 {dimension_numbers = #tpu.dot_dimension_numbers<[1], [0], [0], [1], [0, 0, 1, 1], [], []>} : vector<1x32xf32>, vector<32x128xf32>, vector<1x128xf32> -> vector<1x128xf32>
    %cst_40 = arith.constant 0.000000e+00 : f32
    %63 = vector.broadcast %cst_40 : f32 to vector<1x128xf32>
    %64 = arith.maximumf %62, %63 : vector<1x128xf32>
    %c0_41 = arith.constant 0 : index
    %c0_42 = arith.constant 0 : index
    %65 = vector.load %arg11[%c0_41, %c0_42] : memref<128x512xf32, #tpu.memory_space<vmem>>, vector<128x512xf32>
    %cst_43 = arith.constant dense<0.000000e+00> : vector<1x512xf32>
    %66 = tpu.matmul %64, %65, %cst_43 {dimension_numbers = #tpu.dot_dimension_numbers<[1], [0], [0], [1], [0, 0, 1, 1], [], []>} : vector<1x128xf32>, vector<128x512xf32>, vector<1x512xf32> -> vector<1x512xf32>
    %67 = arith.negf %66 : vector<1x512xf32>
    %68 = math.exp %67 : vector<1x512xf32>
    %cst_44 = arith.constant 1.000000e+00 : f32
    %69 = vector.broadcast %cst_44 : f32 to vector<1x512xf32>
    %70 = arith.addf %69, %68 : vector<1x512xf32>
    %71 = arith.divf %69, %70 : vector<1x512xf32>
    %72 = vector.broadcast %71 : vector<1x512xf32> to vector<16x512xf32>
    %73 = arith.mulf %72, %56 : vector<16x512xf32>
    %c0_45 = arith.constant 0 : index
    %c0_46 = arith.constant 0 : index
    %c0_47 = arith.constant 0 : index
    %74 = vector.load %arg2[%c0_45, %c0_46, %c0_47] : memref<1x16x512xf32, #tpu.memory_space<vmem>>, vector<1x16x512xf32>
    %75 = vector.shape_cast %74 : vector<1x16x512xf32> to vector<16x512xf32>
    %76 = arith.addf %73, %75 : vector<16x512xf32>
    %cst_48 = arith.constant 0.000000e+00 : f32
    %77 = vector.broadcast %cst_48 : f32 to vector<16x512xf32>
    %78 = arith.maximumf %76, %77 : vector<16x512xf32>
    %c0_49 = arith.constant 0 : index
    %c0_50 = arith.constant 0 : index
    %c0_51 = arith.constant 0 : index
    %79 = vector.load %arg12[%c0_49, %c0_50, %c0_51] : memref<1x16x512xf32, #tpu.memory_space<vmem>>, vector<1x16x512xf32>
    %80 = vector.shape_cast %79 : vector<1x16x512xf32> to vector<16x512xf32>
    %81 = vector.shape_cast %78 : vector<16x512xf32> to vector<1x16x512xf32>
    tpu.vector_store %arg12[%c0_49, %c0_50, %c0_51], %81 {strides = array<i32>} : memref<1x16x512xf32, #tpu.memory_space<vmem>>, vector<1x16x512xf32>,
    return
  }
  func.func @transform_0(%arg0: i32) -> (i32, i32, i32) {
    %c0_i32 = arith.constant 0 : i32
    %c0_i32_0 = arith.constant 0 : i32
    %c0_i32_1 = arith.constant 0 : i32
    return %arg0, %c0_i32, %c0_i32_0 : i32, i32, i32
  }
  func.func @transform_1(%arg0: i32) -> (i32, i32, i32) {
    %c0_i32 = arith.constant 0 : i32
    %c0_i32_0 = arith.constant 0 : i32
    %c0_i32_1 = arith.constant 0 : i32
    return %arg0, %c0_i32, %c0_i32_0 : i32, i32, i32
  }
  func.func @transform_2(%arg0: i32) -> (i32, i32, i32) {
    %c0_i32 = arith.constant 0 : i32
    %c0_i32_0 = arith.constant 0 : i32
    %c0_i32_1 = arith.constant 0 : i32
    %c0_i32_2 = arith.constant 0 : i32
    return %c0_i32, %c0_i32_0, %c0_i32_1 : i32, i32, i32
  }
  func.func @transform_3(%arg0: i32) -> (i32, i32) {
    %c0_i32 = arith.constant 0 : i32
    %c0_i32_0 = arith.constant 0 : i32
    %c0_i32_1 = arith.constant 0 : i32
    return %c0_i32, %c0_i32_0 : i32, i32
  }
  func.func @transform_4(%arg0: i32) -> (i32, i32) {
    %c0_i32 = arith.constant 0 : i32
    %c0_i32_0 = arith.constant 0 : i32
    %c0_i32_1 = arith.constant 0 : i32
    return %c0_i32, %c0_i32_0 : i32, i32
  }
  func.func @transform_5(%arg0: i32) -> (i32, i32, i32) {
    %c0_i32 = arith.constant 0 : i32
    %c0_i32_0 = arith.constant 0 : i32
    %c0_i32_1 = arith.constant 0 : i32
    %c0_i32_2 = arith.constant 0 : i32
    return %c0_i32, %c0_i32_0, %c0_i32_1 : i32, i32, i32
  }
  func.func @transform_6(%arg0: i32) -> (i32, i32) {
    %c0_i32 = arith.constant 0 : i32
    %c0_i32_0 = arith.constant 0 : i32
    %c0_i32_1 = arith.constant 0 : i32
    return %c0_i32, %c0_i32_0 : i32, i32
  }
  func.func @transform_7(%arg0: i32) -> (i32, i32) {
    %c0_i32 = arith.constant 0 : i32
    %c0_i32_0 = arith.constant 0 : i32
    %c0_i32_1 = arith.constant 0 : i32
    return %c0_i32, %c0_i32_0 : i32, i32
  }
  func.func @transform_8(%arg0: i32) -> (i32, i32) {
    %c0_i32 = arith.constant 0 : i32
    %c0_i32_0 = arith.constant 0 : i32
    %c0_i32_1 = arith.constant 0 : i32
    return %c0_i32, %c0_i32_0 : i32, i32
  }
  func.func @transform_9(%arg0: i32) -> (i32, i32) {
    %c0_i32 = arith.constant 0 : i32
    %c0_i32_0 = arith.constant 0 : i32
    %c0_i32_1 = arith.constant 0 : i32
    return %c0_i32, %c0_i32_0 : i32, i32
  }
  func.func @transform_10(%arg0: i32) -> (i32, i32) {
    %c0_i32 = arith.constant 0 : i32
    %c0_i32_0 = arith.constant 0 : i32
    %c0_i32_1 = arith.constant 0 : i32
    return %c0_i32, %c0_i32_0 : i32, i32
  }
  func.func @transform_11(%arg0: i32) -> (i32, i32, i32) {
    %c0_i32 = arith.constant 0 : i32
    %c0_i32_0 = arith.constant 0 : i32
    %c0_i32_1 = arith.constant 0 : i32
    return %arg0, %c0_i32, %c0_i32_0 : i32, i32, i32
  }
}

</mosaic_0001>

<bundles_post_ra>
// kernel: tpu_custom_call.1
= control target key start
LH: loop header
LB: loop body
LE: loop exit
PB: predicated region body
PF: predicated region fallthrough
CT: control target
= control target key end

     0   :  { %s14330_s0 = inlined_call_operand.vmem [shape: bf16[2,18,576], index: 0, kind: input, shape index: {}]   ;;  %s14331_s1 = inlined_call_operand.hbm [shape: f32[2,16,512], index: 1, kind: input, shape index: {}]   ;;  %s14332_s2 = inlined_call_operand.hbm [shape: bf16[3,576,576], index: 2, kind: input, shape index: {}]   ;;  %s14333_s3 = inlined_call_operand.hbm [shape: f32[1,576], index: 3, kind: input, shape index: {}]   ;;  %s14334_s4 = inlined_call_operand.hbm [shape: f32[1,576], index: 4, kind: input, shape index: {}]   ;;  %s14335_s5 = inlined_call_operand.hbm [shape: bf16[3,576,512], index: 5, kind: input, shape index: {}]   ;;  %s14336_s6 = inlined_call_operand.hbm [shape: f32[1,512], index: 6, kind: input, shape index: {}]   ;;  %s14337_s7 = inlined_call_operand.hbm [shape: f32[1,512], index: 7, kind: input, shape index: {}]   ;;  %s14338_s8 = inlined_call_operand.vmem [shape: f32[512,32], index: 8, kind: input, shape index: {}]   ;;  %s14339_s9 = inlined_call_operand.hbm [shape: f32[32,128], index: 9, kind: input, shape index: {}]   ;;  %s14340_s10 = inlined_call_operand.hbm [shape: f32[128,512], index: 10, kind: input, shape index: {}]   ;;  %s14341_s11 = inlined_call_operand.hbm [shape: f32[2,16,512], index: 11, kind: output, shape index: {}]  }
   0x1   :  { %14350 = sst [smem:[#allocation24_spill]] %s14330_s0 }
   0x2   :  { %14351 = sst [smem:[#allocation25_spill]] %s14338_s8 }
   0x3   :  { %14352 = sst [smem:[#allocation26_spill]] %s14341_s11 }
   0x4   :  { %16 = vsyncpa [#allocation3], 0 }
   0x5   :  { %18 = vsyncpa [#allocation3 + $0x1], 0 }
   0x6   :  { %19 = vsyncpa [#allocation6], 0 }
   0x7   :  { %20 = vsyncpa [#allocation9], 0 }
   0x8   :  { %21 = vsyncpa [#allocation12], 0 }
   0x9   :  { %22 = vsyncpa [#allocation15], 0 }
   0xa   :  { %23 = vsyncpa [#allocation4], 0 }
   0xb   :  { %25 = vsyncpa [#allocation4 + $0x1], 0  ;;  %s13318_s17 = smov 0   ;;  %s13320_s18 = smov 0  }
   0xc   :  { %s13322_s19 = smov 0   ;;  %s13324_s20 = smov 0  }
   0xd LB: > { %s13233_s21 = smov [#allocation5]   ;;  %s13339_s23 = sadd.s32 4294967295, %s13231_s20   ;;  %s13231_s20 = sphi %s13324_s20, %s14387_s20   ;;  %s13227_s19 = sphi %s13322_s19, %s14386_s19   ;;  %s13223_s18 = sphi %s13320_s18, %s14385_s18   ;;  %s13219_s17 = sphi %s13318_s17, %s14384_s17  }
   0xe   : > { %s315_s22 = sshll.u32 %s13233_s21, 4  ;;  %p9666_p0 = scmp.ge.s32.totalorder %s13231_s20, 1  ;;  %s13344_s22 = int_to_ptr.vmem [resolvable:$true] %s315_s22 }
   0xf   : > { %p14344_p1 = scmp.eq.s32.totalorder %s13339_s23, 0  ;;  %p303_p2 = scmp.lt.s32.totalorder %s13231_s20, 3 }
  0x10   : > { %s13234_s25 = smov [#allocation8]   ;;  %s13235_s28 = smov [#allocation11]  }
  0x11   : > { %p13346_p3 = pnand %p9666_p0, %p303_p2  ;;  %s340_s26 = sshll.u32 %s13234_s25, 4  ;;  %s13359_s26 = int_to_ptr.vmem [resolvable:$true] %s340_s26 }
  0x12   : > { %s364_s29 = sshll.u32 %s13235_s28, 4  ;;  %s12895_s13 = scalar_lea.hbm %s14332_s2, 69120  ;;  %s13361_s29 = int_to_ptr.vmem [resolvable:$true] %s364_s29 }
  0x13   : > { %s14353_s24 = scalar_select %p13346_p3, 1, 0 }
  0x14   : > { %p11346_p5 = pneg %p13346_p3  ;;  %p12896_p7 = scmp.ne.s32.totalorder %s14332_s2, %s12895_s13 }
  0x15   : > { %p12902_p11 = scmp.lt.u32.totalorder %s12895_s13, %s14332_s2 }
  0x16   : > { %p13355_p6 = pnand %p11346_p5, %p14344_p1 }
  0x18   : > { %p13371_p8 = pneg %p13355_p6 }
  0x1a   : > { %p12898_p9 = pnand %p13371_p8, %p12896_p7 }
  0x1c   : > { %p12899_p10 = pneg %p12898_p9 }
  0x1e   : > { %p12904_p12 = pnand %p12902_p11, %p12899_p10 }
  0x20   : > { %12907 = shalt.err (!%p12904_p12)
}
  0x21   : > { %s12908_s28 = scalar_lea.vmem %s13344_s22, 69120  ;;  %p12916_p5 = scmp.lt.s32.totalorder %s13344_s22, %s13344_s22 }
  0x22   : > { %p12909_p13 = scmp.ne.s32.totalorder %s13344_s22, %s12908_s28  ;;  %p12917_p4 = scmp.lt.s32.totalorder %s12908_s28, %s12908_s28 }
  0x24   : > { %p12911_p0 = pnand %p12909_p13, %p13371_p8  ;;  %p12918_p7 = por %p12917_p4, %p12916_p5 }
  0x26   : > { %p12912_p2 = pneg %p12911_p0 }
  0x28   : > { %p12919_p9 = pnand %p12918_p7, %p12912_p2 }
  0x2a   : > { %12922 = shalt.err (!%p12919_p9)
}
  0x2b   : > { %s13236_s30 = smov 320   ;;  %s13237_s12 = smov 20  }
  0x2c   : > { %11349 = dma.hbm_to_vmem [thread:$0]  (!%p13355_p6), %s14332_s2, 69120, %s13344_s22, [#allocation6], %s13236_s30, %s13236_s30, %s13237_s12  }
  0x2d   : > { %s12923_s25 = scalar_lea.hbm %s14334_s4, 80 }
  0x2e   : > { %p12924_p4 = scmp.ne.s32.totalorder %s14334_s4, %s12923_s25  ;;  %p12930_p12 = scmp.lt.u32.totalorder %s12923_s25, %s14334_s4 }
  0x30   : > { %p12926_p10 = pnand %p12924_p4, %p13371_p8 }
  0x32   : > { %p12927_p11 = pneg %p12926_p10 }
  0x34   : > { %p12932_p13 = pnand %p12930_p12, %p12927_p11 }
  0x36   : > { %12935 = shalt.err (!%p12932_p13)
}
  0x37   : > { %s12936_s22 = scalar_lea.vmem %s13359_s26, 80  ;;  %s12943_s8 = scalar_lea.vmem %s13359_s26, 96 }
  0x38   : > { %p12937_p0 = scmp.ne.s32.totalorder %s13359_s26, %s12936_s22  ;;  %p12944_p7 = scmp.lt.s32.totalorder %s13359_s26, %s13359_s26 }
  0x39   : > { %p12945_p9 = scmp.lt.s32.totalorder %s12943_s8, %s12936_s22 }
  0x3a   : > { %p12939_p2 = pnand %p12937_p0, %p13371_p8 }
  0x3b   : > { %p12946_p4 = por %p12945_p9, %p12944_p7 }
  0x3c   : > { %p12940_p5 = pneg %p12939_p2 }
  0x3e   : > { %p12947_p10 = pnand %p12946_p4, %p12940_p5 }
  0x40   : > { %12950 = shalt.err (!%p12947_p10)
}
  0x41   : > { %11355 = dma.hbm_to_vmem [thread:$0]  (!%p13355_p6), %s14334_s4, 80, %s13359_s26, [#allocation9]  }
  0x42   : > { %s12951_s13 = scalar_lea.hbm %s14336_s6, 64 }
  0x43   : > { %p12952_p11 = scmp.ne.s32.totalorder %s14336_s6, %s12951_s13  ;;  %p12958_p0 = scmp.lt.u32.totalorder %s12951_s13, %s14336_s6 }
  0x45   : > { %p12954_p12 = pnand %p12952_p11, %p13371_p8 }
  0x47   : > { %p12955_p13 = pneg %p12954_p12 }
  0x49   : > { %p12960_p2 = pnand %p12958_p0, %p12955_p13 }
  0x4b   : > { %12963 = shalt.err (!%p12960_p2)
}
  0x4c   : > { %s12964_s26 = scalar_lea.vmem %s13361_s29, 64  ;;  %p12972_p4 = scmp.lt.s32.totalorder %s13361_s29, %s13361_s29 }
  0x4d   : > { %p12965_p5 = scmp.ne.s32.totalorder %s13361_s29, %s12964_s26  ;;  %p12973_p10 = scmp.lt.s32.totalorder %s12964_s26, %s12964_s26 }
  0x4f   : > { %p12967_p7 = pnand %p12965_p5, %p13371_p8  ;;  %p12974_p11 = por %p12973_p10, %p12972_p4 }
  0x51   : > { %p12968_p9 = pneg %p12967_p7 }
  0x53   : > { %p12975_p12 = pnand %p12974_p11, %p12968_p9 }
  0x55   : > { %12978 = shalt.err (!%p12975_p12)
}
  0x56   : > { %11361 = dma.hbm_to_vmem [thread:$0]  (!%p13355_p6), %s14336_s6, 64, %s13361_s29, [#allocation12]  }
  0x57   : > { %s13238_s8 = smov [#allocation14]   ;;  %s12979_s12 = scalar_lea.hbm %s14339_s9, 512 }
  0x58   : > { %s388_s0 = sshll.u32 %s13238_s8, 4  ;;  %p12980_p13 = scmp.ne.s32.totalorder %s14339_s9, %s12979_s12  ;;  %s389_s0 = int_to_ptr.vmem [resolvable:$true] %s388_s0 }
  0x59   : > { %p12986_p5 = scmp.lt.u32.totalorder %s12979_s12, %s14339_s9 }
  0x5a   : > { %p12982_p0 = pnand %p12980_p13, %p13371_p8 }
  0x5c   : > { %p12983_p2 = pneg %p12982_p0 }
  0x5e   : > { %p12988_p7 = pnand %p12986_p5, %p12983_p2 }
  0x60   : > { %12991 = shalt.err (!%p12988_p7)
}
  0x61   : > { %s12992_s29 = scalar_lea.vmem %s389_s0, 512  ;;  %p13000_p11 = scmp.lt.s32.totalorder %s389_s0, %s389_s0 }
  0x62   : > { %p12993_p9 = scmp.ne.s32.totalorder %s389_s0, %s12992_s29  ;;  %p13001_p12 = scmp.lt.s32.totalorder %s12992_s29, %s12992_s29 }
  0x64   : > { %p12995_p4 = pnand %p12993_p9, %p13371_p8  ;;  %p13002_p1 = por %p13001_p12, %p13000_p11 }
  0x66   : > { %p12996_p10 = pneg %p12995_p4 }
  0x68   : > { %p13003_p3 = pnand %p13002_p1, %p12996_p10 }
  0x6a   : > { %13006 = shalt.err (!%p13003_p3)
}
  0x6b   : > { %s13239_s25 = smov 128   ;;  %s13240_s26 = smov 8  }
  0x6c   : > { %11367 = dma.hbm_to_vmem [thread:$0]  (!%p13355_p6), %s14339_s9, 512, %s389_s0, [#allocation15], %s13239_s25, %s13239_s25, %s13240_s26  }
  0x6d   : > { %s13241_s8 = smov [#allocation7]   ;;  %s13242_s30 = smov [#allocation10]  }
  0x6e   : > { %s329_s11 = sshll.u32 %s13241_s8, 4  ;;  %s350_s12 = sshll.u32 %s13242_s30, 4  ;;  %s330_s11 = int_to_ptr.vmem [resolvable:$true] %s329_s11  ;;  %s13457_s12 = int_to_ptr.vmem [resolvable:$true] %s350_s12 }
  0x6f   : > { %s13007_s15 = scalar_lea.hbm %s14333_s3, 80 }
  0x70   : > { %p13008_p1 = scmp.ne.s32.totalorder %s14333_s3, %s13007_s15  ;;  %p13014_p0 = scmp.lt.u32.totalorder %s13007_s15, %s14333_s3 }
  0x72   : > { %p13010_p3 = pnand %p13008_p1, %p13371_p8 }
  0x74   : > { %p13011_p13 = pneg %p13010_p3 }
  0x76   : > { %p13016_p2 = pnand %p13014_p0, %p13011_p13 }
  0x78   : > { %13019 = shalt.err (!%p13016_p2)
}
  0x79   : > { %s13020_s25 = scalar_lea.vmem %s330_s11, 80  ;;  %s13027_s26 = scalar_lea.vmem %s330_s11, 96 }
  0x7a   : > { %p13021_p5 = scmp.ne.s32.totalorder %s330_s11, %s13020_s25  ;;  %p13028_p4 = scmp.lt.s32.totalorder %s330_s11, %s330_s11 }
  0x7b   : > { %p13029_p10 = scmp.lt.s32.totalorder %s13027_s26, %s13020_s25 }
  0x7c   : > { %p13023_p7 = pnand %p13021_p5, %p13371_p8 }
  0x7d   : > { %p13030_p11 = por %p13029_p10, %p13028_p4 }
  0x7e   : > { %p13024_p9 = pneg %p13023_p7 }
  0x80   : > { %p13031_p12 = pnand %p13030_p11, %p13024_p9 }
  0x82   : > { %13034 = shalt.err (!%p13031_p12)
}
  0x83   : > { %11352 = dma.hbm_to_vmem [thread:$0]  (!%p13355_p6), %s14333_s3, 80, %s330_s11, [#allocation6]  }
  0x84   : > { %s13035_s14 = scalar_lea.hbm %s14335_s5, 55296 }
  0x85   : > { %p13036_p1 = scmp.ne.s32.totalorder %s14335_s5, %s13035_s14  ;;  %p13042_p0 = scmp.lt.u32.totalorder %s13035_s14, %s14335_s5 }
  0x87   : > { %p13038_p3 = pnand %p13036_p1, %p13371_p8 }
  0x89   : > { %p13039_p13 = pneg %p13038_p3 }
  0x8b   : > { %p13044_p2 = pnand %p13042_p0, %p13039_p13 }
  0x8d   : > { %13047 = shalt.err (!%p13044_p2)
}
  0x8e   : > { %s13048_s11 = scalar_lea.vmem %s13457_s12, 55296  ;;  %p13056_p4 = scmp.lt.s32.totalorder %s13457_s12, %s13457_s12 }
  0x8f   : > { %p13049_p5 = scmp.ne.s32.totalorder %s13457_s12, %s13048_s11  ;;  %p13057_p10 = scmp.lt.s32.totalorder %s13048_s11, %s13048_s11 }
  0x91   : > { %p13051_p7 = pnand %p13049_p5, %p13371_p8  ;;  %p13058_p11 = por %p13057_p10, %p13056_p4 }
  0x93   : > { %p13052_p9 = pneg %p13051_p7 }
  0x95   : > { %p13059_p12 = pnand %p13058_p11, %p13052_p9 }
  0x97   : > { %13062 = shalt.err (!%p13059_p12)
}
  0x98   : > { %s13243_s0 = smov 256   ;;  %s13244_s25 = smov 16  }
  0x99   : > { %11358 = dma.hbm_to_vmem [thread:$0]  (!%p13355_p6), %s14335_s5, 55296, %s13457_s12, [#allocation9], %s13243_s0, %s13243_s0, %s13244_s25  }
  0x9a   : > { %s13245_s8 = smov [#allocation13]   ;;  %s13246_s13 = smov [#allocation16]  }
  0x9b   : > { %s375_s30 = sshll.u32 %s13245_s8, 4  ;;  %s401_s14 = sshll.u32 %s13246_s13, 4  ;;  %s376_s30 = int_to_ptr.vmem [resolvable:$true] %s375_s30  ;;  %s13500_s14 = int_to_ptr.vmem [resolvable:$true] %s401_s14 }
  0x9c   : > { %s13063_s29 = scalar_lea.hbm %s14337_s7, 64 }
  0x9d   : > { %p13064_p1 = scmp.ne.s32.totalorder %s14337_s7, %s13063_s29  ;;  %p13070_p0 = scmp.lt.u32.totalorder %s13063_s29, %s14337_s7 }
  0x9f   : > { %p13066_p3 = pnand %p13064_p1, %p13371_p8 }
  0xa1   : > { %p13067_p13 = pneg %p13066_p3 }
  0xa3   : > { %p13072_p2 = pnand %p13070_p0, %p13067_p13 }
  0xa5   : > { %13075 = shalt.err (!%p13072_p2)
}
  0xa6   : > { %s13076_s0 = scalar_lea.vmem %s376_s30, 64  ;;  %p13084_p4 = scmp.lt.s32.totalorder %s376_s30, %s376_s30 }
  0xa7   : > { %p13077_p5 = scmp.ne.s32.totalorder %s376_s30, %s13076_s0  ;;  %p13085_p10 = scmp.lt.s32.totalorder %s13076_s0, %s13076_s0 }
  0xa9   : > { %p13079_p7 = pnand %p13077_p5, %p13371_p8  ;;  %p13086_p11 = por %p13085_p10, %p13084_p4 }
  0xab   : > { %p13080_p9 = pneg %p13079_p7 }
  0xad   : > { %p13087_p12 = pnand %p13086_p11, %p13080_p9 }
  0xaf   : > { %13090 = shalt.err (!%p13087_p12)
}
  0xb0   : > { %11364 = dma.hbm_to_vmem [thread:$0]  (!%p13355_p6), %s14337_s7, 64, %s376_s30, [#allocation12]  }
  0xb1   : > { %s13091_s15 = scalar_lea.hbm %s14340_s10, 8192 }
  0xb2   : > { %p13092_p1 = scmp.ne.s32.totalorder %s14340_s10, %s13091_s15  ;;  %p13098_p0 = scmp.lt.u32.totalorder %s13091_s15, %s14340_s10 }
  0xb4   : > { %p13094_p3 = pnand %p13092_p1, %p13371_p8 }
  0xb6   : > { %p13095_p13 = pneg %p13094_p3 }
  0xb8   : > { %p13100_p2 = pnand %p13098_p0, %p13095_p13 }
  0xba   : > { %13103 = shalt.err (!%p13100_p2)
}
  0xbb   : > { %s13104_s30 = scalar_lea.vmem %s13500_s14, 8192  ;;  %p13112_p4 = scmp.lt.s32.totalorder %s13500_s14, %s13500_s14 }
  0xbc   : > { %p13105_p5 = scmp.ne.s32.totalorder %s13500_s14, %s13104_s30  ;;  %p13113_p10 = scmp.lt.s32.totalorder %s13104_s30, %s13104_s30 }
  0xbe   : > { %p13107_p7 = pnand %p13105_p5, %p13371_p8  ;;  %p13114_p11 = por %p13113_p10, %p13112_p4 }
  0xc0   : > { %p13108_p9 = pneg %p13107_p7 }
  0xc2   : > { %p13115_p12 = pnand %p13114_p11, %p13108_p9 }
  0xc4   : > { %13118 = shalt.err (!%p13115_p12)
}
  0xc5   : > { %s14346_s26 = smov 512   ;;  %s14347_s16 = smov 32  }
  0xc6   : > { %11370 = dma.hbm_to_vmem [thread:$0]  (!%p13355_p6), %s14340_s10, 8192, %s13500_s14, [#allocation15], %s14346_s26, %s14346_s26, %s14347_s16  }
  0xc7   : > { %s9665_s25 = sadd.s32 4294967294, %s13231_s20   ;;  %s13548_s22 = sadd.s32 1, %s13231_s20  }
  0xc8   : > { %s61_s8 = ssub.s32 %s13231_s20, %s13548_s22  ;;  %s64_s13 = sadd.s32 1, %s13227_s19 }
  0xc9   : > { %p62_p8 = scmp.eq.s32.totalorder %s61_s8, 0  ;;  %p71_p1 = scmp.ne.s32.totalorder %s13227_s19, %s13223_s18 }
  0xca   : > { %p72_p3 = scmp.eq.s32.totalorder %s13231_s20, 0  ;;  %p77_p13 = scmp.ne.s32.totalorder %s13223_s18, %s13219_s17 }
  0xcb   : > { %s13559_s27 = scalar_select %p62_p8, %s13227_s19, %s64_s13  }
  0xcc   : > { %p13561_p0 = por %p72_p3, %p71_p1  ;;  %p14357_p2 = scmp.eq.s32.totalorder %s13339_s23, 0 }
  0xcd   : > { %p290_p5 = scmp.eq.s32.totalorder %s13339_s23, 1  ;;  %p296_p7 = scmp.eq.s32.totalorder %s9665_s25, 1 }
  0xce   : > { %p13567_p6 = por %p14357_p2, %p77_p13  ;;  %p11387_p9 = scmp.lt.s32.totalorder %s13231_s20, 2 }
  0xcf   : > { %s423_s21 = sand.u32 1, %s13227_s19   ;;  %p13574_p4 = por %p290_p5, %p71_p1 }
  0xd0   : > { %p13578_p10 = por %p296_p7, %p77_p13  ;;  %s9676_s11 = sshll.u32 %s423_s21, 6 }
  0xd1   : > { %s14359_s29 = scalar_select %p13574_p4, 1, 0 }
  0xd2   : > { %s14360_s28 = scalar_select %p13578_p10, 1, 0 }
  0xd3   : > { %s10754_s30 = sshll.u32 %s13231_s20, 10  ;;  %s427_s25 = scalar_lea.vmem [#allocation2], %s9676_s11 }
  0xd4   : > { %s13586_s8 = scalar_lea.hbm %s14331_s1, %s10754_s30  ;;  %s434_s13 = sshll.u32 %s427_s25, 4  ;;  %s13588_s13 = int_to_ptr.vmem [resolvable:$true] %s434_s13 }
  0xd5   : > { %p13592_p11 = pnand %p11387_p9, %p13561_p0  ;;  %s13596_s16 = scalar_lea.sflag [#allocation3], %s423_s21 }
  0xd6   : > { %s13119_s12 = scalar_lea.hbm %s13586_s8, 1024  ;;  %s13124_s15 = scalar_lea.hbm %s14331_s1, 2048 }
  0xd7   : > { %p13120_p12 = scmp.ne.s32.totalorder %s13586_s8, %s13119_s12  ;;  %p13121_p8 = pneg %p13592_p11 }
  0xd8   : > { %p13125_p13 = scmp.lt.u32.totalorder %s13586_s8, %s14331_s1  ;;  %p13126_p0 = scmp.lt.u32.totalorder %s13124_s15, %s13119_s12 }
  0xd9   : > { %p13122_p1 = pnand %p13121_p8, %p13120_p12  ;;  %p13128_p5 = scmp.lt.u32.totalorder %s13119_s12, %s13586_s8 }
  0xda   : > { %p13127_p2 = por %p13126_p0, %p13125_p13 }
  0xdb   : > { %p13123_p3 = pneg %p13122_p1 }
  0xdc   : > { %p13129_p7 = por %p13128_p5, %p13127_p2 }
  0xde   : > { %p13130_p9 = pnand %p13129_p7, %p13123_p3 }
  0xe0   : > { %13133 = shalt.err (!%p13130_p9)
}
  0xe1   : > { %s13134_s21 = scalar_lea.vmem %s13588_s13, 1024  ;;  %s13249_s11 = smov [#allocation2]  }
  0xe2   : > { %p13135_p12 = scmp.ne.s32.totalorder %s13588_s13, %s13134_s21  ;;  %s13139_s30 = sshll.u32 %s13249_s11, 4  ;;  %s13140_s30 = int_to_ptr.vmem [resolvable:$false] %s13139_s30 }
  0xe3   : > { %s13141_s0 = scalar_lea.vmem %s13140_s30, 2048  ;;  %p13142_p4 = scmp.lt.s32.totalorder %s13588_s13, %s13140_s30 }
  0xe4   : > { %p13137_p1 = pnand %p13135_p12, %p13121_p8  ;;  %p13143_p13 = scmp.lt.s32.totalorder %s13141_s0, %s13134_s21 }
  0xe6   : > { %p13138_p10 = pneg %p13137_p1  ;;  %p13144_p0 = por %p13143_p13, %p13142_p4 }
  0xe8   : > { %p13145_p2 = pnand %p13144_p0, %p13138_p10 }
  0xea   : > { %13148 = shalt.err (!%p13145_p2)
}
  0xeb   : > { %s14362_s12 = smov 32   ;;  %s14363_s15 = smov 512  }
  0xec   : > { %11374 = dma.hbm_to_vmem [thread:$0]  (!%p13592_p11), %s13586_s8, 1024, %s13588_s13, %s13596_s16, %s14363_s15, %s14363_s15, %s14362_s12  }
  0xed   : > { %p14364_p8 = scmp.ne.s32.totalorder %s14353_s24, 0 }
  0xee   : > { %s13630_s25 = sand.u32 (!%p14364_p8), 1, %s13223_s18  }
  0xef   : > { %446 = sbr.rel (%p14364_p8) target bundleno = 2345 (0x929), region = 64  ;;  %s14349_s21 = sshll.u32 (!%p14364_p8), %s13630_s25, 6 }
  0xf0   : > { %s449_s11 = scalar_lea.sflag (!%p14364_p8), [#allocation3], %s13630_s25  ;;  %s13636_s26 = scalar_lea.vmem (!%p14364_p8), [#allocation2], %s14349_s21 }
  0xf6   : > { %13194 = dma.done.wait (%p13567_p6), %s449_s11, 1024  }
  0xf7   : > { %13196 = vsyncadd (%p13567_p6), %s449_s11, 4294966272  ;;  %p14365_p4 = scmp.eq.s32.totalorder %s13339_s23, 0 }
  0xf9   : > { %13198 = dma.done.wait (%p14365_p4), [#allocation6], 69200   ;;  %p14366_p10 = pmov %p14365_p4 }
  0xfa   : > { %p14367_p11 = pmov %p14365_p4 }
  0xfb   : > { %13200 = vsyncadd (%p14366_p10), [#allocation6], 4294898096 }
  0xfc   : > { %13202 = dma.done.wait (%p14367_p11), [#allocation9], 55376   ;;  %p14368_p3 = pmov %p14365_p4 }
  0xfe   : > { %13204 = vsyncadd (%p14368_p3), [#allocation9], 4294911920  ;;  %p14369_p5 = pmov %p14368_p3 }
  0xff   : > { %p14370_p7 = pmov %p14368_p3 }
 0x100   : > { %13206 = dma.done.wait (%p14369_p5), [#allocation12], 128  }
 0x101   : > { %13208 = vsyncadd (%p14370_p7), [#allocation12], 4294967168  ;;  %p14371_p6 = pmov %p14368_p3 }
 0x102   : > { %p14372_p9 = pmov %p14368_p3 }
 0x103   : > { %13210 = dma.done.wait (%p14371_p6), [#allocation15], 8704  }
 0x104   : > { %13212 = vsyncadd (%p14372_p9), [#allocation15], 4294958592  ;;  %v11452_v0 = vld [vmem:[#allocation5 + $0x5a4] ss:$20 sps:$4 sm:$0xff]   ;;  %v11454_v1 = vld [vmem:[#allocation5 + $0x5ac] ss:$20 sps:$4 sm:$0xff]  }
 0x105   : > { %2019 = vmatprep.subr.bf16.mxu0 %v11452_v0  ;;  %v11456_v2 = vld [vmem:[#allocation5 + $0x5a0] ss:$20 sps:$4 sm:$0xff]   ;;  %v11457_v3 = vld [vmem:[#allocation5 + $0x5a8] ss:$20 sps:$4 sm:$0xff]   ;;  %2148 = vmatprep.subr.bf16.mxu1 %v11454_v1  ;;  %v11463_v7 = vld [vmem:[#allocation5 + $0x5d0] ss:$20 sps:$4 sm:$0xff]  }
 0x106   : > { %v11458_v4 = vld [vmem:[#allocation5 + $0x5cc] ss:$20 sps:$4 sm:$0xff]   ;;  %2020 = vmatpush1.bf16.msra.mxu0 %v11456_v2  ;;  %2149 = vmatpush1.bf16.msra.mxu1 %v11457_v3  ;;  %v11460_v5 = vld [vmem:[#allocation5 + $0x5d4] ss:$20 sps:$4 sm:$0xff]   ;;  %v11466_v9 = vld [vmem:[#allocation5 + $0x5fc] ss:$20 sps:$4 sm:$0xff]  }
 0x107   : > { %v11462_v6 = vld [vmem:[#allocation5 + $0x5c8] ss:$20 sps:$4 sm:$0xff]   ;;  %2021 = vmatprep.subr.bf16.mxu0 %v11458_v4  ;;  %2150 = vmatprep.subr.bf16.mxu1 %v11460_v5  ;;  %v11468_v10 = vld [vmem:[#allocation5 + $0x5f0] ss:$20 sps:$4 sm:$0xff]   ;;  %v11469_v11 = vld [vmem:[#allocation5 + $0x5f8] ss:$20 sps:$4 sm:$0xff]  }
 0x108   : > { %v11464_v8 = vld [vmem:[#allocation5 + $0x5f4] ss:$20 sps:$4 sm:$0xff]   ;;  %v11470_v12 = vld [vmem:[#allocation5 + $0x61c] ss:$20 sps:$4 sm:$0xff]   ;;  %v11472_v13 = vld [vmem:[#allocation5 + $0x624] ss:$20 sps:$4 sm:$0xff]  }
 0x109   : > { %v11474_v14 = vld [vmem:[#allocation5 + $0x618] ss:$20 sps:$4 sm:$0xff]   ;;  %v11475_v15 = vld [vmem:[#allocation5 + $0x620] ss:$20 sps:$4 sm:$0xff]   ;;  %v11481_v19 = vld [vmem:[#allocation5 + $0x648] ss:$20 sps:$4 sm:$0xff]  }
 0x10a   : > { %2022 = vmatpush1.bf16.msra.mxu0 %v11462_v6  ;;  %2151 = vmatpush1.bf16.msra.mxu1 %v11463_v7  ;;  %v11476_v16 = vld [vmem:[#allocation5 + $0x644] ss:$20 sps:$4 sm:$0xff]   ;;  %v11478_v17 = vld [vmem:[#allocation5 + $0x64c] ss:$20 sps:$4 sm:$0xff]   ;;  %v11484_v21 = vld [vmem:[#allocation5 + $0x674] ss:$20 sps:$4 sm:$0xff]  }
 0x10b   : > { %2023 = vmatprep.subr.bf16.mxu0 %v11464_v8  ;;  %2152 = vmatprep.subr.bf16.mxu1 %v11466_v9  ;;  %v11480_v18 = vld [vmem:[#allocation5 + $0x640] ss:$20 sps:$4 sm:$0xff]   ;;  %v11486_v22 = vld [vmem:[#allocation5 + $0x668] ss:$20 sps:$4 sm:$0xff]   ;;  %v11487_v23 = vld [vmem:[#allocation5 + $0x670] ss:$20 sps:$4 sm:$0xff]  }
 0x10c   : > { %v11482_v20 = vld [vmem:[#allocation5 + $0x66c] ss:$20 sps:$4 sm:$0xff]   ;;  %v11488_v24 = vld [vmem:[#allocation5 + $0x694] ss:$20 sps:$4 sm:$0xff]   ;;  %v11490_v25 = vld [vmem:[#allocation5 + $0x69c] ss:$20 sps:$4 sm:$0xff]  }
 0x10d   : > { %v11492_v26 = vld [vmem:[#allocation5 + $0x690] ss:$20 sps:$4 sm:$0xff]   ;;  %v11493_v27 = vld [vmem:[#allocation5 + $0x698] ss:$20 sps:$4 sm:$0xff]   ;;  %v11499_v31 = vld [vmem:[#allocation5 + $0x6c0] ss:$20 sps:$4 sm:$0xff]  }
 0x10e   : > { %2024 = vmatpush1.bf16.msra.mxu0 %v11468_v10  ;;  %2153 = vmatpush1.bf16.msra.mxu1 %v11469_v11  ;;  %v11494_v28 = vld [vmem:[#allocation5 + $0x6bc] ss:$20 sps:$4 sm:$0xff]   ;;  %v11496_v29 = vld [vmem:[#allocation5 + $0x6c4] ss:$20 sps:$4 sm:$0xff]   ;;  %p528_p12 = scmp.lt.s32.totalorder %s13339_s23, 1  ;;  %s14373_s13 = sld [smem:[#allocation24_spill]] }
 0x10f   : > { %2025 = vmatprep.subr.bf16.mxu0 %v11470_v12  ;;  %2154 = vmatprep.subr.bf16.mxu1 %v11472_v13  ;;  %v11498_v30 = vld [vmem:[#allocation5 + $0x6b8] ss:$20 sps:$4 sm:$0xff]   ;;  %v11504_v34 = vld [vmem:[#allocation5 + $0x6e0] ss:$20 sps:$4 sm:$0xff]   ;;  %v11505_v35 = vld [vmem:[#allocation5 + $0x6e8] ss:$20 sps:$4 sm:$0xff]  }
 0x110   : > { %v11500_v32 = vld [vmem:[#allocation5 + $0x6e4] ss:$20 sps:$4 sm:$0xff]   ;;  %v11502_v33 = vld [vmem:[#allocation5 + $0x6ec] ss:$20 sps:$4 sm:$0xff]   ;;  %s529_s24 = scalar_select %p528_p12, %s13339_s23, 1  ;;  %vm2015_vm1 = vcmask 523264  }
 0x111   : > { %v11506_v36 = vld [vmem:[#allocation5 + $0x70c] ss:$20 sps:$4 sm:$0xff]   ;;  %v11508_v37 = vld [vmem:[#allocation5 + $0x714] ss:$20 sps:$4 sm:$0xff]   ;;  %v11511_v39 = vld [vmem:[#allocation5 + $0x710] ss:$20 sps:$4 sm:$0xff]  }
 0x112   : > { %2026 = vmatpush1.bf16.msra.mxu0 %v11474_v14  ;;  %2155 = vmatpush1.bf16.msra.mxu1 %v11475_v15  ;;  %v11510_v38 = vld [vmem:[#allocation5 + $0x708] ss:$20 sps:$4 sm:$0xff]   ;;  %s11309_s16 = smul.u32 60, %s529_s24  ;;  %v11516_v42 = vld [vmem:[#allocation5 + $0x730] ss:$20 sps:$4 sm:$0xff]   ;;  %vm13252_vm2 = vmmov 0  }
 0x113   : > { %2027 = vmatprep.subr.bf16.mxu0 %v11476_v16  ;;  %2156 = vmatprep.subr.bf16.mxu1 %v11478_v17  ;;  %v11512_v40 = vld [vmem:[#allocation5 + $0x734] ss:$20 sps:$4 sm:$0xff]   ;;  %v11514_v41 = vld [vmem:[#allocation5 + $0x73c] ss:$20 sps:$4 sm:$0xff]   ;;  %v11517_v43 = vld [vmem:[#allocation5 + $0x738] ss:$20 sps:$4 sm:$0xff]  }
 0x114   : > { %v11518_v44 = vld [vmem:[#allocation5 + $0x75c] ss:$20 sps:$4 sm:$0xff]   ;;  %s13663_s30 = scalar_lea.vmem %s14373_s13, %s11309_s16  ;;  %v11520_v45 = vld [vmem:[#allocation5 + $0x764] ss:$20 sps:$4 sm:$0xff]   ;;  %v11523_v47 = vld [vmem:[#allocation5 + $0x760] ss:$20 sps:$4 sm:$0xff]  }
 0x115   : > { %v11522_v46 = vld [vmem:[#allocation5 + $0x758] ss:$20 sps:$4 sm:$0xff]   ;;  %v11528_v55 = vld [vmem:[#allocation5 + $0x780] ss:$20 sps:$4 sm:$0xff]   ;;  %vm1014_vm0 = vsmask.f32 7424 }
 0x116   : > { %2028 = vmatpush1.bf16.msra.mxu0 %v11480_v18  ;;  %2157 = vmatpush1.bf16.msra.mxu1 %v11481_v19  ;;  %v544_v48 = vld [vmem:[%s13663_s30 + $0x28] sm:$0x11]  ;;  %v11548_v49 = vld [vmem:[%s13663_s30 + $0x4] ss:$20 sps:$4 sm:$0xff]   ;;  %v11557_v61 = vld [vmem:[%s13663_s30] ss:$20 sps:$4 sm:$0xff]  }
 0x117   : > { %2029 = vmatprep.subr.bf16.mxu0 %v11482_v20  ;;  %2158 = vmatprep.subr.bf16.mxu1 %v11484_v21  ;;  %v11524_v50 = vld [vmem:[#allocation5 + $0x784] ss:$20 sps:$4 sm:$0xff]   ;;  %v13667_v51 = vcombine.high %v544_v48, %v544_v48  ;;  %v11526_v52 = vld [vmem:[#allocation5 + $0x78c] ss:$20 sps:$4 sm:$0xff]   ;;  %v1028_v53 = vshrl.u32 %v11548_v49, 16  ;;  %v1030_v54 = vshll.u32 %v11548_v49, 16  ;;  %v13674_v4 = vcombine.low %v544_v48, %v544_v48 }
 0x118   : > { %v11529_v57 = vld [vmem:[#allocation5 + $0x788] ss:$20 sps:$4 sm:$0xff]   ;;  %v11530_v59 = vld [vmem:[#allocation5 + $0x7ac] ss:$20 sps:$4 sm:$0xff]   ;;  %v11535_v2 = vld [vmem:[#allocation5 + $0x7b0] ss:$20 sps:$4 sm:$0xff]  }
 0x119   : > { %v1035_v56 = vshll.u32 %v13667_v51, 16  ;;  %v1032_v58 = vrot.slane %v1030_v54, 1  ;;  %v11532_v62 = vld [vmem:[#allocation5 + $0x7b4] ss:$20 sps:$4 sm:$0xff]   ;;  %v1018_v5 = vshll.u32 %v11557_v61, 16  ;;  %v1016_v10 = vshrl.u32 %v11557_v61, 16 }
 0x11a   : > { %2030 = vmatpush1.bf16.msra.mxu0 %v11486_v22  ;;  %2159 = vmatpush1.bf16.msra.mxu1 %v11487_v23  ;;  %v11534_v0 = vld [vmem:[#allocation5 + $0x7a8] ss:$20 sps:$4 sm:$0xff]   ;;  %v11540_v7 = vld [vmem:[#allocation5 + $0x7d0] ss:$20 sps:$4 sm:$0xff]   ;;  %v11541_v8 = vld [vmem:[#allocation5 + $0x7d8] ss:$20 sps:$4 sm:$0xff]  }
 0x11b   : > { %2031 = vmatprep.subr.bf16.mxu0 %v11488_v24  ;;  %2160 = vmatprep.subr.bf16.mxu1 %v11490_v25  ;;  %v1037_v60 = vrot.slane %v1035_v56, 1  ;;  %v1033_v63 = vor.u32 %v1032_v58, %v1028_v53  ;;  %v11536_v3 = vld [vmem:[#allocation5 + $0x7d4] ss:$20 sps:$4 sm:$0xff]   ;;  %v11538_v6 = vld [vmem:[#allocation5 + $0x7dc] ss:$20 sps:$4 sm:$0xff]   ;;  %v1020_v11 = vrot.slane %v1018_v5, 1 }
 0x11c   : > { %v11542_v9 = vld [vmem:[#allocation5 + $0x7fc] ss:$20 sps:$4 sm:$0xff]   ;;  %v1023_v12 = vshll.u32 %v13674_v4, 16  ;;  %v11544_v13 = vld [vmem:[#allocation5 + $0x804] ss:$20 sps:$4 sm:$0xff]   ;;  %vm3940_vm3 = vcmask 1046528  }
 0x11d   : > { %v13672_v1 = vsel %vm1014_vm0, %v1033_v63, %v1037_v60  ;;  %v11546_v14 = vld [vmem:[#allocation5 + $0x7f8] ss:$20 sps:$4 sm:$0xff]   ;;  %v11547_v15 = vld [vmem:[#allocation5 + $0x800] ss:$20 sps:$4 sm:$0xff]   ;;  %v1021_v17 = vor.u32 %v1020_v11, %v1016_v10  ;;  %v11554_v21 = vld [vmem:[#allocation5 + $0x828] ss:$20 sps:$4 sm:$0xff]  }
 0x11e   : > { %2032 = vmatpush1.bf16.msra.mxu0 %v11492_v26  ;;  %2161 = vmatpush1.bf16.msra.mxu1 %v11493_v27  ;;  %v11553_v16 = vld [vmem:[#allocation5 + $0x824] ss:$20 sps:$4 sm:$0xff]   ;;  %v1025_v18 = vrot.slane %v1023_v12, 1  ;;  %v11556_v19 = vld [vmem:[#allocation5 + $0x82c] ss:$20 sps:$4 sm:$0xff]   ;;  %vm5382_vm4 = vcmask 1040384  }
 0x11f   : > { %2033 = vmatprep.subr.bf16.mxu0 %v11494_v28  ;;  %2162 = vmatprep.subr.bf16.mxu1 %v11496_v29  ;;  %v11551_v20 = vld [vmem:[#allocation5 + $0x820] ss:$20 sps:$4 sm:$0xff]   ;;  %v11559_v25 = vld [vmem:[#allocation5 + $0x848] ss:$20 sps:$4 sm:$0xff]   ;;  %v11562_v26 = vld [vmem:[#allocation5 + $0x850] ss:$20 sps:$4 sm:$0xff]  }
 0x120   : > { %2051 = vmatprep.mubr.bf16.mxu0 %v13672_v1  ;;  %2180 = vmatprep.mubr.bf16.mxu1 %v13672_v1  ;;  %v13680_v22 = vsel %vm1014_vm0, %v1021_v17, %v1025_v18  ;;  %v11561_v23 = vld [vmem:[#allocation5 + $0x84c] ss:$20 sps:$4 sm:$0xff]   ;;  %v11564_v24 = vld [vmem:[#allocation5 + $0x854] ss:$20 sps:$4 sm:$0xff]   ;;  %v11570_v28 = vld [vmem:[#allocation5 + $0x87c] ss:$20 sps:$4 sm:$0xff]  }
 0x121   : > { %v11567_v27 = vld [vmem:[#allocation5 + $0x874] ss:$20 sps:$4 sm:$0xff]   ;;  %v11565_v29 = vld [vmem:[#allocation5 + $0x870] ss:$20 sps:$4 sm:$0xff]   ;;  %v11649_v49 = vld [vmem:[%s13663_s30 + $0xc] ss:$20 sps:$4 sm:$0xff]  }
 0x122   : > { %2034 = vmatpush1.bf16.msra.mxu0 %v11498_v30  ;;  %2163 = vmatpush1.bf16.msra.mxu1 %v11499_v31  ;;  %v11568_v30 = vld [vmem:[#allocation5 + $0x878] ss:$20 sps:$4 sm:$0xff]   ;;  %v11573_v31 = vld [vmem:[#allocation5 + $0x89c] ss:$20 sps:$4 sm:$0xff]   ;;  %v1052_v53 = vshrl.u32 %v11649_v49, 16  ;;  %v1054_v54 = vshll.u32 %v11649_v49, 16  ;;  %vm10540_vm5 = vmneg %vm5382_vm4 }
 0x123   : > { %2035 = vmatprep.subr.bf16.mxu0 %v11500_v32  ;;  %2164 = vmatprep.subr.bf16.mxu1 %v11502_v33  ;;  %v11576_v32 = vld [vmem:[#allocation5 + $0x8a4] ss:$20 sps:$4 sm:$0xff]   ;;  %v13685_v48 = vld [vmem:[%s13663_s30 + $0x30] sm:$0x11]  ;;  %v11606_v60 = vld [vmem:[#allocation5 + $0x96c] ss:$20 sps:$4 sm:$0xff]  }
 0x124   : > { %v11571_v33 = vld [vmem:[#allocation5 + $0x898] ss:$20 sps:$4 sm:$0xff]   ;;  %v1056_v58 = vrot.slane %v1054_v54, 1  ;;  %v11601_v63 = vld [vmem:[#allocation5 + $0x960] ss:$20 sps:$4 sm:$0xff]   ;;  %vm13253_vm6 = vmmov 1  }
 0x125   : > { %v11612_v5 = vld [vmem:[#allocation5 + $0x994] ss:$20 sps:$4 sm:$0xff]   ;;  %v11613_v10 = vld [vmem:[#allocation5 + $0x9b0] ss:$20 sps:$4 sm:$0xff]   ;;  %v11616_v11 = vld [vmem:[#allocation5 + $0x9b8] ss:$20 sps:$4 sm:$0xff]  }
 0x126   : > { %2036 = vmatpush1.bf16.msra.mxu0 %v11504_v34  ;;  %2165 = vmatpush1.bf16.msra.mxu1 %v11505_v35  ;;  %v11574_v34 = vld [vmem:[#allocation5 + $0x8a0] ss:$20 sps:$4 sm:$0xff]   ;;  %v11579_v35 = vld [vmem:[#allocation5 + $0x8c4] ss:$20 sps:$4 sm:$0xff]   ;;  %v11621_v12 = vld [vmem:[#allocation5 + $0x9dc] ss:$20 sps:$4 sm:$0xff]  }
 0x127   : > { %2037 = vmatprep.subr.bf16.mxu0 %v11506_v36  ;;  %2166 = vmatprep.subr.bf16.mxu1 %v11508_v37  ;;  %v11582_v36 = vld [vmem:[#allocation5 + $0x8cc] ss:$20 sps:$4 sm:$0xff]   ;;  %v11660_v49 = vld [vmem:[#allocation5 + $0xac8] ss:$20 sps:$4 sm:$0xff]   ;;  %vm13924_vm7 = vmpackc.low %vm13253_vm6, %vm10540_vm5  ;;  %s14378_s15 = sld [smem:[#allocation25_spill]]  ;;  %vm9116_vm9 = vcmask 261120  }
 0x128   : > { %v11577_v37 = vld [vmem:[#allocation5 + $0x8c0] ss:$20 sps:$4 sm:$0xff]   ;;  %vm13960_vm8 = vmpackc.low %vm3940_vm3, %vm13253_vm6  ;;  %s10755_s12 = sshll.u32 %s13339_s23, 10  ;;  %s14379_s11 = sshll.u32 %s13630_s25, 6 }
 0x129   : > { %v11630_v17 = vld [vmem:[#allocation5 + $0xa0c] ss:$20 sps:$4 sm:$0xff]   ;;  %v11668_v54 = vld [vmem:[#allocation5 + $0xaf4] ss:$20 sps:$4 sm:$0xff]   ;;  %s527_s24 = scalar_lea.vmem [#allocation17], %s14379_s11  ;;  %s14380_s23 = sld [smem:[#allocation26_spill]] }
 0x12a   : > { %2038 = vmatpush1.bf16.msra.mxu0 %v11510_v38  ;;  %2167 = vmatpush1.bf16.msra.mxu1 %v11511_v39  ;;  %v11580_v38 = vld [vmem:[#allocation5 + $0x8c8] ss:$20 sps:$4 sm:$0xff]   ;;  %v11585_v39 = vld [vmem:[#allocation5 + $0x8ec] ss:$20 sps:$4 sm:$0xff]   ;;  %s9504_s16 = sshll.u32 %s527_s24, 4  ;;  %s9491_s8 = scalar_lea.sflag [#allocation4], %s13630_s25  ;;  %s14286_s16 = int_to_ptr.vmem [resolvable:$true] %s9504_s16 }
 0x12b   : > { %2039 = vmatprep.subr.bf16.mxu0 %v11512_v40  ;;  %2168 = vmatprep.subr.bf16.mxu1 %v11514_v41  ;;  %v11588_v40 = vld [vmem:[#allocation5 + $0x8f4] ss:$20 sps:$4 sm:$0xff]   ;;  %s13149_s13 = scalar_lea.vmem %s14286_s16, 1024  ;;  %p14381_p13 = scmp.ne.s32.totalorder %s14359_s29, 0 }
 0x12c   : > { %v11583_v41 = vld [vmem:[#allocation5 + $0x8e8] ss:$20 sps:$4 sm:$0xff]   ;;  %v11625_v18 = vld [vmem:[#allocation5 + $0xa00] ss:$20 sps:$4 sm:$0xff]   ;;  %p13150_p1 = scmp.ne.s32.totalorder %s14286_s16, %s13149_s13 }
 0x12e   : > { %2040 = vmatpush1.bf16.msra.mxu0 %v11516_v42  ;;  %2169 = vmatpush1.bf16.msra.mxu1 %v11517_v43  ;;  %v11586_v42 = vld [vmem:[#allocation5 + $0x8f0] ss:$20 sps:$4 sm:$0xff]   ;;  %v11591_v43 = vld [vmem:[#allocation5 + $0x914] ss:$20 sps:$4 sm:$0xff]   ;;  %p13151_p0 = pnand %p13150_p1, %p14381_p13 }
 0x12f   : > { %2041 = vmatprep.subr.bf16.mxu0 %v11518_v44  ;;  %2170 = vmatprep.subr.bf16.mxu1 %v11520_v45  ;;  %v11594_v44 = vld [vmem:[#allocation5 + $0x91c] ss:$20 sps:$4 sm:$0xff]   ;;  %s14284_s14 = scalar_lea.hbm %s14380_s23, %s10755_s12 }
 0x130   : > { %v11589_v45 = vld [vmem:[#allocation5 + $0x910] ss:$20 sps:$4 sm:$0xff]   ;;  %p13152_p2 = pneg %p13151_p0 }
 0x132   : > { %2042 = vmatpush1.bf16.msra.mxu0 %v11522_v46  ;;  %2171 = vmatpush1.bf16.msra.mxu1 %v11523_v47  ;;  %v11592_v46 = vld [vmem:[#allocation5 + $0x918] ss:$20 sps:$4 sm:$0xff]   ;;  %v11597_v47 = vld [vmem:[#allocation5 + $0x93c] ss:$20 sps:$4 sm:$0xff]  }
 0x133   : > { %2043 = vmatprep.subr.bf16.mxu0 %v11524_v50  ;;  %2172 = vmatprep.subr.bf16.mxu1 %v11526_v52  ;;  %v11600_v50 = vld [vmem:[#allocation5 + $0x944] ss:$20 sps:$4 sm:$0xff]   ;;  %v13690_v52 = vcombine.high %v13685_v48, %v13685_v48 }
 0x135   : > { %v1059_v56 = vshll.u32 %v13690_v52, 16 }
 0x136   : > { %2044 = vmatpush1.bf16.msra.mxu0 %v11528_v55  ;;  %2173 = vmatpush1.bf16.msra.mxu1 %v11529_v57  ;;  %v11595_v55 = vld [vmem:[#allocation5 + $0x938] ss:$20 sps:$4 sm:$0xff]   ;;  %v11598_v57 = vld [vmem:[#allocation5 + $0x940] ss:$20 sps:$4 sm:$0xff]  }
 0x137   : > { %2045 = vmatprep.subr.bf16.mxu0 %v11530_v59  ;;  %2174 = vmatprep.subr.bf16.mxu1 %v11532_v62  ;;  %v11603_v59 = vld [vmem:[#allocation5 + $0x964] ss:$20 sps:$4 sm:$0xff]   ;;  %v1061_v61 = vrot.slane %v1059_v56, 1  ;;  %v1057_v62 = vor.u32 %v1056_v58, %v1052_v53  ;;  %v11671_v56 = vld [vmem:[#allocation5 + $0xafc] ss:$20 sps:$4 sm:$0xff]   ;;  %v13250_v58 = vmov 0  }
 0x138   : > { %v11681_v53 = vld [vmem:[%s13663_s30 + $0x38] ss:$0 sps:$4 sm:$0x11]  }
 0x13a   : > { %2046 = vmatpush1.bf16.msra.mxu0 %v11534_v0  ;;  %2175 = vmatpush1.bf16.msra.mxu1 %v11535_v2  ;;  %v11604_v0 = vld [vmem:[#allocation5 + $0x968] ss:$20 sps:$4 sm:$0xff]   ;;  %v13694_v2 = vsel %vm1014_vm0, %v1057_v62, %v1061_v61  ;;  %v1071_v62 = vshll.u32 %v11681_v53, 16  ;;  %v11720_v53 = vld [vmem:[#allocation5 + $0x58] ss:$20 sps:$4 sm:$0xff]  }
 0x13b   : > { %2047 = vmatprep.subr.bf16.mxu0 %v11536_v3  ;;  %2176 = vmatprep.subr.bf16.mxu1 %v11538_v6  ;;  %v11609_v3 = vld [vmem:[#allocation5 + $0x98c] ss:$20 sps:$4 sm:$0xff]   ;;  %v11607_v6 = vld [vmem:[#allocation5 + $0x988] ss:$20 sps:$4 sm:$0xff]  }
 0x13e   : > { %2048 = vmatpush1.bf16.msra.mxu0 %v11540_v7  ;;  %2177 = vmatpush1.bf16.msra.mxu1 %v11541_v8  ;;  %v11610_v7 = vld [vmem:[#allocation5 + $0x990] ss:$20 sps:$4 sm:$0xff]   ;;  %v11615_v8 = vld [vmem:[#allocation5 + $0x9b4] ss:$20 sps:$4 sm:$0xff]  }
 0x13f   : > { %2049 = vmatprep.subr.bf16.mxu0 %v11542_v9  ;;  %2178 = vmatprep.subr.bf16.mxu1 %v11544_v13  ;;  %v11618_v9 = vld [vmem:[#allocation5 + $0x9bc] ss:$20 sps:$4 sm:$0xff]   ;;  %v11624_v13 = vld [vmem:[#allocation5 + $0x9e4] ss:$20 sps:$4 sm:$0xff]  }
 0x142   : > { %2050 = vmatpush1.bf16.msra.mxu0 %v11546_v14  ;;  %2179 = vmatpush1.bf16.msra.mxu1 %v11547_v15  ;;  %v11619_v14 = vld [vmem:[#allocation5 + $0x9d8] ss:$20 sps:$4 sm:$0xff]   ;;  %v11622_v15 = vld [vmem:[#allocation5 + $0x9e0] ss:$20 sps:$4 sm:$0xff]  }
 0x143   : > { %2062 = vmatprep.subr.bf16.mxu0 %v11553_v16  ;;  %2191 = vmatprep.subr.bf16.mxu1 %v11556_v19  ;;  %v11627_v16 = vld [vmem:[#allocation5 + $0xa04] ss:$20 sps:$4 sm:$0xff]   ;;  %v11628_v19 = vld [vmem:[#allocation5 + $0xa08] ss:$20 sps:$4 sm:$0xff]  }
 0x145   : > { %2052 = vmatmul.mubr.bf16.vlgmr.msra.gmra.mrb[0].mxu0 %v13680_v22  ;;  %2181 = vmatmul.mubr.bf16.vlgmr.msra.gmra.mrb[0].mxu1 %v13680_v22 }
 0x146   : > { %2063 = vmatpush1.bf16.msra.mxu0 %v11551_v20  ;;  %2192 = vmatpush1.bf16.msra.mxu1 %v11554_v21  ;;  %v11633_v20 = vld [vmem:[#allocation5 + $0xa2c] ss:$20 sps:$4 sm:$0xff]   ;;  %v11658_v21 = vld [vmem:[%s13663_s30 + $0x8] ss:$20 sps:$4 sm:$0xff]  }
 0x147   : > { %2064 = vmatprep.subr.bf16.mxu0 %v11561_v23  ;;  %2193 = vmatprep.subr.bf16.mxu1 %v11564_v24  ;;  %v11636_v23 = vld [vmem:[#allocation5 + $0xa34] ss:$20 sps:$4 sm:$0xff]  }
 0x148   : > { %2094 = vmatprep.mubr.bf16.mxu0 %v13694_v2  ;;  %2223 = vmatprep.mubr.bf16.mxu1 %v13694_v2  ;;  %v11631_v24 = vld [vmem:[#allocation5 + $0xa28] ss:$20 sps:$4 sm:$0xff]  }
 0x14a   : > { %2065 = vmatpush1.bf16.msra.mxu0 %v11559_v25  ;;  %2194 = vmatpush1.bf16.msra.mxu1 %v11562_v26  ;;  %v11634_v25 = vld [vmem:[#allocation5 + $0xa30] ss:$20 sps:$4 sm:$0xff]   ;;  %v11639_v26 = vld [vmem:[#allocation5 + $0xa54] ss:$20 sps:$4 sm:$0xff]  }
 0x14b   : > { %2066 = vmatprep.subr.bf16.mxu0 %v11567_v27  ;;  %2195 = vmatprep.subr.bf16.mxu1 %v11570_v28  ;;  %v13701_v27 = vcombine.low %v13685_v48, %v13685_v48  ;;  %v1042_v28 = vshll.u32 %v11658_v21, 16  ;;  %v11665_v48 = vld [vmem:[#allocation5 + $0xad4] ss:$20 sps:$4 sm:$0xff]  }
 0x14e   : > { %2067 = vmatpush1.bf16.msra.mxu0 %v11565_v29  ;;  %2196 = vmatpush1.bf16.msra.mxu1 %v11568_v30  ;;  %v11642_v29 = vld [vmem:[#allocation5 + $0xa5c] ss:$20 sps:$4 sm:$0xff]  }
 0x14f   : > { %2068 = vmatprep.subr.bf16.mxu0 %v11573_v31  ;;  %2197 = vmatprep.subr.bf16.mxu1 %v11576_v32  ;;  %v11637_v30 = vld [vmem:[#allocation5 + $0xa50] ss:$20 sps:$4 sm:$0xff]   ;;  %v11640_v31 = vld [vmem:[#allocation5 + $0xa58] ss:$20 sps:$4 sm:$0xff]  }
 0x150   : > { %v11645_v32 = vld [vmem:[#allocation5 + $0xa7c] ss:$20 sps:$4 sm:$0xff]  }
 0x152   : > { %2069 = vmatpush1.bf16.msra.mxu0 %v11571_v33  ;;  %2198 = vmatpush1.bf16.msra.mxu1 %v11574_v34  ;;  %v1047_v33 = vshll.u32 %v13701_v27, 16  ;;  %v1040_v34 = vshrl.u32 %v11658_v21, 16  ;;  %v11692_v21 = vld [vmem:[#allocation5 + $0x768] ss:$20 sps:$4 sm:$0xff]  }
 0x153   : > { %2070 = vmatprep.subr.bf16.mxu0 %v11579_v35  ;;  %2199 = vmatprep.subr.bf16.mxu1 %v11582_v36  ;;  %v1044_v35 = vrot.slane %v1042_v28, 1  ;;  %v11648_v36 = vld [vmem:[#allocation5 + $0xa84] ss:$20 sps:$4 sm:$0xff]  }
 0x154   : > { %v11697_v28 = vld [vmem:[#allocation5 + $0xa10] ss:$20 sps:$4 sm:$0xff]  }
 0x156   : > { %2071 = vmatpush1.bf16.msra.mxu0 %v11577_v37  ;;  %2200 = vmatpush1.bf16.msra.mxu1 %v11580_v38  ;;  %v11643_v37 = vld [vmem:[#allocation5 + $0xa78] ss:$20 sps:$4 sm:$0xff]   ;;  %v11646_v38 = vld [vmem:[#allocation5 + $0xa80] ss:$20 sps:$4 sm:$0xff]  }
 0x157   : > { %2072 = vmatprep.subr.bf16.mxu0 %v11585_v39  ;;  %2201 = vmatprep.subr.bf16.mxu1 %v11588_v40  ;;  %v11654_v39 = vld [vmem:[#allocation5 + $0xaa4] ss:$20 sps:$4 sm:$0xff]   ;;  %v1045_v40 = vor.u32 %v1044_v35, %v1040_v34  ;;  %v11705_v34 = vld [vmem:[#allocation5 + $0xa60] ss:$20 sps:$4 sm:$0xff]  }
 0x158   : > { %v11706_v35 = vld [vmem:[#allocation5 + $0x6a0] ss:$20 sps:$4 sm:$0xff]  }
 0x15a   : > { %2073 = vmatpush1.bf16.msra.mxu0 %v11583_v41  ;;  %2202 = vmatpush1.bf16.msra.mxu1 %v11586_v42  ;;  %v1049_v41 = vrot.slane %v1047_v33, 1  ;;  %v11657_v42 = vld [vmem:[#allocation5 + $0xaac] ss:$20 sps:$4 sm:$0xff]  }
 0x15b   : > { %2074 = vmatprep.subr.bf16.mxu0 %v11591_v43  ;;  %2203 = vmatprep.subr.bf16.mxu1 %v11594_v44  ;;  %v11652_v43 = vld [vmem:[#allocation5 + $0xaa0] ss:$20 sps:$4 sm:$0xff]   ;;  %v11655_v44 = vld [vmem:[#allocation5 + $0xaa8] ss:$20 sps:$4 sm:$0xff]  }
 0x15c   : > { %v11704_v33 = vld [vmem:[#allocation5 + $0x7e0] ss:$20 sps:$4 sm:$0xff]  }
 0x15e   : > { %2075 = vmatpush1.bf16.msra.mxu0 %v11589_v45  ;;  %2204 = vmatpush1.bf16.msra.mxu1 %v11592_v46  ;;  %v11662_v45 = vld [vmem:[#allocation5 + $0xacc] ss:$20 sps:$4 sm:$0xff]   ;;  %v13705_v46 = vsel %vm1014_vm0, %v1045_v40, %v1049_v41  ;;  %v11711_v40 = vld [vmem:[#allocation5 + $0x948] ss:$20 sps:$4 sm:$0xff]  }
 0x15f   : > { %2076 = vmatprep.subr.bf16.mxu0 %v11597_v47  ;;  %2205 = vmatprep.subr.bf16.mxu1 %v11600_v50  ;;  %v11680_v47 = vld [vmem:[%s13663_s30 + $0x10] ss:$20 sps:$4 sm:$0xff]   ;;  %v11714_v41 = vld [vmem:[#allocation5 + $0xc] ss:$20 sps:$4 sm:$0xff]  }
 0x160   : > { %v11663_v50 = vld [vmem:[#allocation5 + $0xad0] ss:$20 sps:$4 sm:$0xff]  }
 0x162   : > { %2077 = vmatpush1.bf16.msra.mxu0 %v11595_v55  ;;  %2206 = vmatpush1.bf16.msra.mxu1 %v11598_v57  ;;  %v1066_v55 = vshll.u32 %v11680_v47, 16  ;;  %v11666_v57 = vld [vmem:[#allocation5 + $0xaf0] ss:$20 sps:$4 sm:$0xff]  }
 0x163   : > { %2078 = vmatprep.subr.bf16.mxu0 %v11603_v59  ;;  %2207 = vmatprep.subr.bf16.mxu1 %v11606_v60  ;;  %v11669_v59 = vld [vmem:[#allocation5 + $0xaf8] ss:$20 sps:$4 sm:$0xff]   ;;  %v1064_v60 = vshrl.u32 %v11680_v47, 16  ;;  %v11716_v47 = vld [vmem:[#allocation5 + $0x30] ss:$20 sps:$4 sm:$0xff]  }
 0x164   : > { %v1068_v61 = vrot.slane %v1066_v55, 1  ;;  %v11727_v55 = vld [vmem:[#allocation5 + $0xb28] ss:$20 sps:$4 sm:$0xff]  }
 0x166   : > { %2079 = vmatpush1.bf16.msra.mxu0 %v11601_v63  ;;  %2208 = vmatpush1.bf16.msra.mxu1 %v11604_v0  ;;  %v11674_v63 = vld [vmem:[#allocation5 + $0xb1c] ss:$20 sps:$4 sm:$0xff]   ;;  %v11677_v0 = vld [vmem:[#allocation5 + $0xb24] ss:$20 sps:$4 sm:$0xff]  }
 0x167   : > { %2080 = vmatprep.subr.bf16.mxu0 %v11609_v3  ;;  %2209 = vmatprep.subr.bf16.mxu1 %v11612_v5  ;;  %v11672_v3 = vld [vmem:[#allocation5 + $0xb18] ss:$20 sps:$4 sm:$0xff]   ;;  %v11675_v5 = vld [vmem:[#allocation5 + $0xb20] ss:$20 sps:$4 sm:$0xff]  }
 0x16a   : > { %2081 = vmatpush1.bf16.msra.mxu0 %v11607_v6  ;;  %2210 = vmatpush1.bf16.msra.mxu1 %v11610_v7  ;;  %v11678_v6 = vld [vmem:[#allocation5 + $0x6f0] ss:$20 sps:$4 sm:$0xff]   ;;  %v1069_v7 = vor.u32 %v1068_v61, %v1064_v60  ;;  %v11731_v60 = vld [vmem:[#allocation5 + $0xa8] ss:$20 sps:$4 sm:$0xff]   ;;  %v11736_v61 = vld [vmem:[#allocation5 + $0x2c] ss:$20 sps:$4 sm:$0xff]  }
 0x16b   : > { %2082 = vmatprep.subr.bf16.mxu0 %v11615_v8  ;;  %2211 = vmatprep.subr.bf16.mxu1 %v11618_v9  ;;  %v1073_v8 = vrot.slane %v1071_v62, 1  ;;  %v11679_v9 = vld [vmem:[#allocation5 + $0x970] ss:$20 sps:$4 sm:$0xff]   ;;  %v11739_v62 = vld [vmem:[#allocation5 + $0xd4] ss:$20 sps:$4 sm:$0xff]  }
 0x16e   : > { %2083 = vmatpush1.bf16.msra.mxu0 %v11613_v10  ;;  %2212 = vmatpush1.bf16.msra.mxu1 %v11616_v11  ;;  %v11682_v10 = vld [vmem:[#allocation5 + $0x5b0] ss:$20 sps:$4 sm:$0xff]  }
 0x16f   : > { %2084 = vmatprep.subr.bf16.mxu0 %v11621_v12  ;;  %2213 = vmatprep.subr.bf16.mxu1 %v11624_v13  ;;  %v11683_v11 = vld [vmem:[#allocation5 + $0x830] ss:$20 sps:$4 sm:$0xff]   ;;  %v13714_v12 = vsel %vm1014_vm0, %v1069_v7, %v1073_v8  ;;  %v11684_v13 = vld [vmem:[#allocation5 + $0x718] ss:$20 sps:$4 sm:$0xff]  }
 0x170   : > { %v11743_v7 = vld [vmem:[#allocation5 + $0xf8] ss:$20 sps:$4 sm:$0xff]   ;;  %v11748_v8 = vld [vmem:[#allocation5 + $0x7c] ss:$20 sps:$4 sm:$0xff]  }
 0x172   : > { %2085 = vmatpush1.bf16.msra.mxu0 %v11619_v14  ;;  %2214 = vmatpush1.bf16.msra.mxu1 %v11622_v15  ;;  %v11685_v14 = vld [vmem:[#allocation5 + $0x998] ss:$20 sps:$4 sm:$0xff]  }
 0x173   : > { %2086 = vmatprep.subr.bf16.mxu0 %v11627_v16  ;;  %2215 = vmatprep.subr.bf16.mxu1 %v11630_v17  ;;  %v11686_v15 = vld [vmem:[#allocation5 + $0x5d8] ss:$20 sps:$4 sm:$0xff]   ;;  %v11688_v17 = vld [vmem:[#allocation5 + $0x740] ss:$20 sps:$4 sm:$0xff]  }
 0x174   : > { %v11687_v16 = vld [vmem:[#allocation5 + $0x858] ss:$20 sps:$4 sm:$0xff]  }
 0x176   : > { %2087 = vmatpush1.bf16.msra.mxu0 %v11625_v18  ;;  %2216 = vmatpush1.bf16.msra.mxu1 %v11628_v19  ;;  %v11689_v18 = vld [vmem:[#allocation5 + $0x9c0] ss:$20 sps:$4 sm:$0xff]  }
 0x177   : > { %2088 = vmatprep.subr.bf16.mxu0 %v11633_v20  ;;  %2217 = vmatprep.subr.bf16.mxu1 %v11636_v23  ;;  %v11690_v19 = vld [vmem:[#allocation5 + $0x600] ss:$20 sps:$4 sm:$0xff]   ;;  %v11693_v23 = vld [vmem:[#allocation5 + $0x9e8] ss:$20 sps:$4 sm:$0xff]  }
 0x178   : > { %v11691_v20 = vld [vmem:[#allocation5 + $0x880] ss:$20 sps:$4 sm:$0xff]  }
 0x17a   : > { %2089 = vmatpush1.bf16.msra.mxu0 %v11631_v24  ;;  %2218 = vmatpush1.bf16.msra.mxu1 %v11634_v25  ;;  %v11694_v24 = vld [vmem:[#allocation5 + $0x628] ss:$20 sps:$4 sm:$0xff]  }
 0x17b   : > { %2090 = vmatprep.subr.bf16.mxu0 %v11639_v26  ;;  %2219 = vmatprep.subr.bf16.mxu1 %v11642_v29  ;;  %v11695_v25 = vld [vmem:[#allocation5 + $0x8a8] ss:$20 sps:$4 sm:$0xff]   ;;  %v11696_v26 = vld [vmem:[#allocation5 + $0x790] ss:$20 sps:$4 sm:$0xff]  }
 0x17c   : > { %v11698_v29 = vld [vmem:[#allocation5 + $0x650] ss:$20 sps:$4 sm:$0xff]  }
 0x17e   : > { %2091 = vmatpush1.bf16.msra.mxu0 %v11637_v30  ;;  %2220 = vmatpush1.bf16.msra.mxu1 %v11640_v31  ;;  %v11701_v30 = vld [vmem:[#allocation5 + $0xa38] ss:$20 sps:$4 sm:$0xff]  }
 0x17f   : > { %2092 = vmatprep.subr.bf16.mxu0 %v11645_v32  ;;  %2221 = vmatprep.subr.bf16.mxu1 %v11648_v36  ;;  %v11702_v31 = vld [vmem:[#allocation5 + $0x678] ss:$20 sps:$4 sm:$0xff]   ;;  %v11707_v36 = vld [vmem:[#allocation5 + $0x920] ss:$20 sps:$4 sm:$0xff]  }
 0x180   : > { %v11703_v32 = vld [vmem:[#allocation5 + $0x8f8] ss:$20 sps:$4 sm:$0xff]  }
 0x182   : > { %2093 = vmatpush1.bf16.msra.mxu0 %v11643_v37  ;;  %2222 = vmatpush1.bf16.msra.mxu1 %v11646_v38  ;;  %v11708_v37 = vld [vmem:[#allocation5 + $0x808] ss:$20 sps:$4 sm:$0xff]  }
 0x183   : > { %2105 = vmatprep.subr.bf16.mxu0 %v11654_v39  ;;  %2234 = vmatprep.subr.bf16.mxu1 %v11657_v42  ;;  %v11709_v38 = vld [vmem:[#allocation5 + $0xa88] ss:$20 sps:$4 sm:$0xff]  }
 0x184   : > { %v11710_v39 = vld [vmem:[#allocation5 + $0x6c8] ss:$20 sps:$4 sm:$0xff]  }
 0x185   : > { %2095 = vmatmul.mubr.bf16.vlgmr.msra.gmra.mrb[0].mxu0 %v13705_v46  ;;  %2224 = vmatmul.mubr.bf16.vlgmr.msra.gmra.mrb[0].mxu1 %v13705_v46  ;;  %v11712_v42 = vld [vmem:[#allocation5 + $0x8] ss:$20 sps:$4 sm:$0xff]  }
 0x186   : > { %2106 = vmatpush1.bf16.msra.mxu0 %v11652_v43  ;;  %2235 = vmatpush1.bf16.msra.mxu1 %v11655_v44  ;;  %v11715_v43 = vld [vmem:[#allocation5 + $0xab0] ss:$20 sps:$4 sm:$0xff]   ;;  %v13251_v44 = vmov 0.0  }
 0x187   : > { %2107 = vmatprep.subr.bf16.mxu0 %v11662_v45  ;;  %2236 = vmatprep.subr.bf16.mxu1 %v11665_v48  ;;  %v11718_v45 = vld [vmem:[#allocation5 + $0x34] ss:$20 sps:$4 sm:$0xff]   ;;  %v11719_v48 = vld [vmem:[#allocation5 + $0xad8] ss:$20 sps:$4 sm:$0xff]  }
 0x188   : > { %2137 = vmatprep.mubr.bf16.mxu0 %v13250_v58  ;;  %2266 = vmatprep.mubr.bf16.mxu1 %v13250_v58 }
 0x18a   : > { %2108 = vmatpush1.bf16.msra.mxu0 %v11660_v49  ;;  %2237 = vmatpush1.bf16.msra.mxu1 %v11663_v50  ;;  %v11722_v49 = vld [vmem:[#allocation5 + $0x5c] ss:$20 sps:$4 sm:$0xff]   ;;  %v12884_v50 = vld [vmem:[%s13663_s30 + $0x4] ss:$20 sps:$4 sm:$0xff]  }
 0x18b   : > { %2109 = vmatprep.subr.bf16.mxu0 %v11668_v54  ;;  %2238 = vmatprep.subr.bf16.mxu1 %v11671_v56  ;;  %v11724_v54 = vld [vmem:[#allocation5 + $0x80] ss:$20 sps:$4 sm:$0xff]   ;;  %v11730_v56 = vld [vmem:[#allocation5 + $0x4] ss:$20 sps:$4 sm:$0xff]  }
 0x18e   : > { %2110 = vmatpush1.bf16.msra.mxu0 %v11666_v57  ;;  %2239 = vmatpush1.bf16.msra.mxu1 %v11669_v59  ;;  %v11733_v57 = vld [vmem:[#allocation5 + $0xac] ss:$20 sps:$4 sm:$0xff]  }
 0x18f   : > { %2111 = vmatprep.subr.bf16.mxu0 %v11674_v63  ;;  %2240 = vmatprep.subr.bf16.mxu1 %v11677_v0  ;;  %v11728_v59 = vld [vmem:[#allocation5] ss:$20 sps:$4 sm:$0xff]   ;;  %v11734_v63 = vld [vmem:[#allocation5 + $0x28] ss:$20 sps:$4 sm:$0xff]   ;;  %v11737_v0 = vld [vmem:[#allocation5 + $0xd0] ss:$20 sps:$4 sm:$0xff]  }
 0x192   : > { %2112 = vmatpush1.bf16.msra.mxu0 %v11672_v3  ;;  %2241 = vmatpush1.bf16.msra.mxu1 %v11675_v5  ;;  %v11742_v3 = vld [vmem:[#allocation5 + $0x54] ss:$20 sps:$4 sm:$0xff]   ;;  %v11745_v5 = vld [vmem:[#allocation5 + $0xfc] ss:$20 sps:$4 sm:$0xff]  }
 0x193   : > { %10756 = vmatprep.subr.bf16.mxu0 %v11678_v6  ;;  %10778 = vmatprep.subr.bf16.mxu1 %v11679_v9  ;;  %v11740_v6 = vld [vmem:[#allocation5 + $0x50] ss:$20 sps:$4 sm:$0xff]  }
 0x194   : > { %v11751_v9 = vld [vmem:[#allocation5 + $0x124] ss:$20 sps:$4 sm:$0xff]  }
 0x195   : > { %9881 = vmatmul.mubr.msk.bf16.vlgmr.msra.gmra.mrb[0].mxu0 %vm2015_vm1, %v13714_v12  ;;  %9882 = vmatmul.mubr.msk.bf16.vlgmr.msra.gmra.mrb[0].mxu1 %vm2015_vm1, %v13714_v12 }
 0x196   : > { %10757 = vmatpush3.bf16.msra.mxu0 %v11682_v10  ;;  %10779 = vmatpush3.bf16.msra.mxu1 %v11683_v11  ;;  %v11746_v10 = vld [vmem:[#allocation5 + $0x78] ss:$20 sps:$4 sm:$0xff]   ;;  %v11749_v11 = vld [vmem:[#allocation5 + $0x120] ss:$20 sps:$4 sm:$0xff]  }
 0x197   : > { %10758 = vmatprep.subr.bf16.mxu0 %v11684_v13  ;;  %10780 = vmatprep.subr.bf16.mxu1 %v11685_v14  ;;  %v11757_v13 = vld [vmem:[#allocation5 + $0x14c] ss:$20 sps:$4 sm:$0xff]  }
 0x198   : > { %2309 = vmatprep.mubr.bf16.mxu0 %v13672_v1  ;;  %2350 = vmatprep.mubr.bf16.mxu1 %v13694_v2  ;;  %v11699_v1 = vld [vmem:[#allocation5 + $0x8d0] ss:$20 sps:$4 sm:$0xff]   ;;  %v11700_v2 = vld [vmem:[#allocation5 + $0x7b8] ss:$20 sps:$4 sm:$0xff]   ;;  %v11752_v14 = vld [vmem:[#allocation5 + $0xa0] ss:$20 sps:$4 sm:$0xff]  }
 0x19a   : > { %10759 = vmatpush3.bf16.msra.mxu0 %v11686_v15  ;;  %10781 = vmatpush3.bf16.msra.mxu1 %v11687_v16  ;;  %v11755_v15 = vld [vmem:[#allocation5 + $0x148] ss:$20 sps:$4 sm:$0xff]   ;;  %v11760_v16 = vld [vmem:[#allocation5 + $0xcc] ss:$20 sps:$4 sm:$0xff]  }
 0x19b   : > { %10760 = vmatprep.subr.bf16.mxu0 %v11688_v17  ;;  %10782 = vmatprep.subr.bf16.mxu1 %v11689_v18  ;;  %v11763_v17 = vld [vmem:[#allocation5 + $0x174] ss:$20 sps:$4 sm:$0xff]  }
 0x19c   : > { %v11758_v18 = vld [vmem:[#allocation5 + $0xc8] ss:$20 sps:$4 sm:$0xff]  }
 0x19e   : > { %10761 = vmatpush3.bf16.msra.mxu0 %v11690_v19  ;;  %10783 = vmatpush3.bf16.msra.mxu1 %v11691_v20  ;;  %v11761_v19 = vld [vmem:[#allocation5 + $0x170] ss:$20 sps:$4 sm:$0xff]   ;;  %v11766_v20 = vld [vmem:[#allocation5 + $0xf4] ss:$20 sps:$4 sm:$0xff]  }
 0x19f   : > { %10762 = vmatprep.subr.bf16.mxu0 %v11692_v21  ;;  %10784 = vmatprep.subr.bf16.mxu1 %v11693_v23  ;;  %v11769_v21 = vld [vmem:[#allocation5 + $0x19c] ss:$20 sps:$4 sm:$0xff]  }
 0x1a0   : > { %v11764_v23 = vld [vmem:[#allocation5 + $0xf0] ss:$20 sps:$4 sm:$0xff]  }
 0x1a2   : > { %10763 = vmatpush3.bf16.msra.mxu0 %v11694_v24  ;;  %10785 = vmatpush3.bf16.msra.mxu1 %v11695_v25  ;;  %v11767_v24 = vld [vmem:[#allocation5 + $0x198] ss:$20 sps:$4 sm:$0xff]   ;;  %v11772_v25 = vld [vmem:[#allocation5 + $0x11c] ss:$20 sps:$4 sm:$0xff]  }
 0x1a3   : > { %10764 = vmatprep.subr.bf16.mxu0 %v11696_v26  ;;  %10786 = vmatprep.subr.bf16.mxu1 %v11697_v28  ;;  %v11775_v26 = vld [vmem:[#allocation5 + $0x1c4] ss:$20 sps:$4 sm:$0xff]  }
 0x1a4   : > { %v11770_v28 = vld [vmem:[#allocation5 + $0x118] ss:$20 sps:$4 sm:$0xff]  }
 0x1a6   : > { %10765 = vmatpush3.bf16.msra.mxu0 %v11698_v29  ;;  %10787 = vmatpush3.bf16.msra.mxu1 %v11699_v1  ;;  %v11773_v29 = vld [vmem:[#allocation5 + $0x1c0] ss:$20 sps:$4 sm:$0xff]   ;;  %v11778_v1 = vld [vmem:[#allocation5 + $0x144] ss:$20 sps:$4 sm:$0xff]  }
 0x1a7   : > { %10766 = vmatprep.subr.bf16.mxu0 %v11700_v2  ;;  %10788 = vmatprep.subr.bf16.mxu1 %v11701_v30  ;;  %v11781_v2 = vld [vmem:[#allocation5 + $0x1ec] ss:$20 sps:$4 sm:$0xff]  }
 0x1a8   : > { %v11776_v30 = vld [vmem:[#allocation5 + $0x140] ss:$20 sps:$4 sm:$0xff]  }
 0x1aa   : > { %10767 = vmatpush3.bf16.msra.mxu0 %v11702_v31  ;;  %10789 = vmatpush3.bf16.msra.mxu1 %v11703_v32  ;;  %v11779_v31 = vld [vmem:[#allocation5 + $0x1e8] ss:$20 sps:$4 sm:$0xff]   ;;  %v11784_v32 = vld [vmem:[#allocation5 + $0x16c] ss:$20 sps:$4 sm:$0xff]  }
 0x1ab   : > { %10768 = vmatprep.subr.bf16.mxu0 %v11704_v33  ;;  %10790 = vmatprep.subr.bf16.mxu1 %v11705_v34  ;;  %v11787_v33 = vld [vmem:[#allocation5 + $0x214] ss:$20 sps:$4 sm:$0xff]  }
 0x1ac   : > { %v11782_v34 = vld [vmem:[#allocation5 + $0x168] ss:$20 sps:$4 sm:$0xff]  }
 0x1ae   : > { %10769 = vmatpush3.bf16.msra.mxu0 %v11706_v35  ;;  %10791 = vmatpush3.bf16.msra.mxu1 %v11707_v36  ;;  %v11785_v35 = vld [vmem:[#allocation5 + $0x210] ss:$20 sps:$4 sm:$0xff]   ;;  %v11790_v36 = vld [vmem:[#allocation5 + $0x194] ss:$20 sps:$4 sm:$0xff]  }
 0x1af   : > { %10770 = vmatprep.subr.bf16.mxu0 %v11708_v37  ;;  %10792 = vmatprep.subr.bf16.mxu1 %v11709_v38  ;;  %v11793_v37 = vld [vmem:[#allocation5 + $0x23c] ss:$20 sps:$4 sm:$0xff]  }
 0x1b0   : > { %v11788_v38 = vld [vmem:[#allocation5 + $0x190] ss:$20 sps:$4 sm:$0xff]  }
 0x1b2   : > { %10771 = vmatpush3.bf16.msra.mxu0 %v11710_v39  ;;  %10793 = vmatpush3.bf16.msra.mxu1 %v11711_v40  ;;  %v11791_v39 = vld [vmem:[#allocation5 + $0x238] ss:$20 sps:$4 sm:$0xff]   ;;  %v11796_v40 = vld [vmem:[#allocation5 + $0x1bc] ss:$20 sps:$4 sm:$0xff]  }
 0x1b3   : > { %10984 = vmatprep.subr.bf16.mxu0 %v13251_v44  ;;  %3471 = vmatprep.subr.bf16.mxu1 %v11714_v41  ;;  %v11799_v41 = vld [vmem:[#allocation5 + $0x264] ss:$20 sps:$4 sm:$0xff]  }
 0x1b5   : > { %2310 = vmatmul.mubr.bf16.vlgmr.msra.gmra.mrb[4].mxu0 %v13680_v22  ;;  %2351 = vmatmul.mubr.bf16.vlgmr.msra.gmra.mrb[4].mxu1 %v13705_v46  ;;  %v11723_v22 = vld [vmem:[#allocation5 + $0xb00] ss:$20 sps:$4 sm:$0xff]   ;;  %v11726_v46 = vld [vmem:[#allocation5 + $0x84] ss:$20 sps:$4 sm:$0xff]  }
 0x1b6   : > { %10985 = vmatpush3.bf16.msra.mxu0 %v11715_v43  ;;  %3472 = vmatpush1.bf16.msra.mxu1 %v11712_v42  ;;  %v11794_v42 = vld [vmem:[#allocation5 + $0x1b8] ss:$20 sps:$4 sm:$0xff]   ;;  %v11797_v43 = vld [vmem:[#allocation5 + $0x260] ss:$20 sps:$4 sm:$0xff]  }
 0x1b7   : > { %10986 = vmatprep.subr.bf16.mxu0 %v13251_v44  ;;  %3473 = vmatprep.subr.bf16.mxu1 %v11718_v45  ;;  %v11802_v45 = vld [vmem:[#allocation5 + $0x1e4] ss:$20 sps:$4 sm:$0xff]  }
 0x1b8   : > { %10992 = vmatprep.mubr.msk.bf16.mxu0 %vm13252_vm2, %v13251_v44  ;;  %3503 = vmatprep.mubr.bf16.mxu1 %v12884_v50 }
 0x1ba   : > { %10987 = vmatpush3.bf16.msra.mxu0 %v11719_v48  ;;  %3474 = vmatpush1.bf16.msra.mxu1 %v11716_v47  ;;  %v11805_v47 = vld [vmem:[#allocation5 + $0x28c] ss:$20 sps:$4 sm:$0xff]  }
 0x1bb   : > { %10988 = vmatprep.subr.bf16.mxu0 %v13251_v44  ;;  %3475 = vmatprep.subr.bf16.mxu1 %v11722_v49  ;;  %v11800_v48 = vld [vmem:[#allocation5 + $0x1e0] ss:$20 sps:$4 sm:$0xff]   ;;  %v11803_v49 = vld [vmem:[#allocation5 + $0x288] ss:$20 sps:$4 sm:$0xff]  }
 0x1be   : > { %10989 = vmatpush3.bf16.msra.mxu0 %v11723_v22  ;;  %3476 = vmatpush1.bf16.msra.mxu1 %v11720_v53  ;;  %v11811_v53 = vld [vmem:[#allocation5 + $0x2b4] ss:$20 sps:$4 sm:$0xff]  }
 0x1bf   : > { %10990 = vmatprep.subr.bf16.mxu0 %v13251_v44  ;;  %3477 = vmatprep.subr.bf16.mxu1 %v11726_v46  ;;  %v11806_v22 = vld [vmem:[#allocation5 + $0x208] ss:$20 sps:$4 sm:$0xff]   ;;  %v13734_v46 = vld [vmem:[%s13663_s30] ss:$20 sps:$4 sm:$0xff]  }
 0x1c2   : > { %10991 = vmatpush3.bf16.msra.mxu0 %v11727_v55  ;;  %3478 = vmatpush1.bf16.msra.mxu1 %v11724_v54  ;;  %v11809_v54 = vld [vmem:[#allocation5 + $0x2b0] ss:$20 sps:$4 sm:$0xff]   ;;  %v11814_v55 = vld [vmem:[#allocation5 + $0x234] ss:$20 sps:$4 sm:$0xff]  }
 0x1c3   : > { %3342 = vmatprep.subr.bf16.mxu0 %v11730_v56  ;;  %3479 = vmatprep.subr.bf16.mxu1 %v11733_v57  ;;  %v11817_v56 = vld [vmem:[#allocation5 + $0x2dc] ss:$20 sps:$4 sm:$0xff]  }
 0x1c4   : > { %v11812_v57 = vld [vmem:[#allocation5 + $0x230] ss:$20 sps:$4 sm:$0xff]  }
 0x1c5   : > { %10993 = vmatmul.mubr.msk.bf16.vlgmr.msra.gmra.mrb[8].mxu0 %vm2015_vm1, %v13714_v12  ;;  %v11754_v12 = vld [vmem:[#allocation5 + $0xa4] ss:$20 sps:$4 sm:$0xff]  }
 0x1c6   : > { %3343 = vmatpush1.bf16.msra.mxu0 %v11728_v59  ;;  %3480 = vmatpush1.bf16.msra.mxu1 %v11731_v60  ;;  %v13738_v59 = vld [vmem:[%s13663_s30 + $0xc] ss:$20 sps:$4 sm:$0xff]  }
 0x1c7   : > { %3344 = vmatprep.subr.bf16.mxu0 %v11736_v61  ;;  %3481 = vmatprep.subr.bf16.mxu1 %v11739_v62  ;;  %v11815_v60 = vld [vmem:[#allocation5 + $0x2d8] ss:$20 sps:$4 sm:$0xff]   ;;  %v11820_v61 = vld [vmem:[#allocation5 + $0x25c] ss:$20 sps:$4 sm:$0xff]  }
 0x1c8   : > { %3374 = vmatprep.mubr.bf16.mxu0 %v12884_v50  ;;  %v11808_v50 = vld [vmem:[#allocation5 + $0x20c] ss:$20 sps:$4 sm:$0xff]   ;;  %v11823_v62 = vld [vmem:[#allocation5 + $0x304] ss:$20 sps:$4 sm:$0xff]  }
 0x1ca   : > { %3345 = vmatpush1.bf16.msra.mxu0 %v11734_v63  ;;  %3482 = vmatpush1.bf16.msra.mxu1 %v11737_v0  ;;  %v11818_v63 = vld [vmem:[#allocation5 + $0x258] ss:$20 sps:$4 sm:$0xff]   ;;  %v11821_v0 = vld [vmem:[#allocation5 + $0x300] ss:$20 sps:$4 sm:$0xff]  }
 0x1cb   : > { %3346 = vmatprep.subr.bf16.mxu0 %v11742_v3  ;;  %3483 = vmatprep.subr.bf16.mxu1 %v11745_v5  ;;  %v11826_v3 = vld [vmem:[#allocation5 + $0x284] ss:$20 sps:$4 sm:$0xff]   ;;  %v11829_v5 = vld [vmem:[#allocation5 + $0x32c] ss:$20 sps:$4 sm:$0xff]  }
 0x1ce   : > { %3347 = vmatpush1.bf16.msra.mxu0 %v11740_v6  ;;  %3484 = vmatpush1.bf16.msra.mxu1 %v11743_v7  ;;  %v11824_v6 = vld [vmem:[#allocation5 + $0x280] ss:$20 sps:$4 sm:$0xff]   ;;  %v11827_v7 = vld [vmem:[#allocation5 + $0x328] ss:$20 sps:$4 sm:$0xff]  }
 0x1cf   : > { %3348 = vmatprep.subr.bf16.mxu0 %v11748_v8  ;;  %3485 = vmatprep.subr.bf16.mxu1 %v11751_v9  ;;  %v11832_v8 = vld [vmem:[#allocation5 + $0x2ac] ss:$20 sps:$4 sm:$0xff]   ;;  %v11835_v9 = vld [vmem:[#allocation5 + $0x354] ss:$20 sps:$4 sm:$0xff]  }
 0x1d2   : > { %3349 = vmatpush1.bf16.msra.mxu0 %v11746_v10  ;;  %3486 = vmatpush1.bf16.msra.mxu1 %v11749_v11  ;;  %v11830_v10 = vld [vmem:[#allocation5 + $0x2a8] ss:$20 sps:$4 sm:$0xff]   ;;  %v11833_v11 = vld [vmem:[#allocation5 + $0x350] ss:$20 sps:$4 sm:$0xff]  }
 0x1d3   : > { %3350 = vmatprep.subr.bf16.mxu0 %v11754_v12  ;;  %3487 = vmatprep.subr.bf16.mxu1 %v11757_v13  ;;  %v11838_v12 = vld [vmem:[#allocation5 + $0x2d4] ss:$20 sps:$4 sm:$0xff]   ;;  %v11841_v13 = vld [vmem:[#allocation5 + $0x37c] ss:$20 sps:$4 sm:$0xff]  }
 0x1d6   : > { %3351 = vmatpush1.bf16.msra.mxu0 %v11752_v14  ;;  %3488 = vmatpush1.bf16.msra.mxu1 %v11755_v15  ;;  %v11836_v14 = vld [vmem:[#allocation5 + $0x2d0] ss:$20 sps:$4 sm:$0xff]   ;;  %v11839_v15 = vld [vmem:[#allocation5 + $0x378] ss:$20 sps:$4 sm:$0xff]  }
 0x1d7   : > { %3352 = vmatprep.subr.bf16.mxu0 %v11760_v16  ;;  %3489 = vmatprep.subr.bf16.mxu1 %v11763_v17  ;;  %v11844_v16 = vld [vmem:[#allocation5 + $0x2fc] ss:$20 sps:$4 sm:$0xff]   ;;  %v11847_v17 = vld [vmem:[#allocation5 + $0x3a4] ss:$20 sps:$4 sm:$0xff]  }
 0x1da   : > { %3353 = vmatpush1.bf16.msra.mxu0 %v11758_v18  ;;  %3490 = vmatpush1.bf16.msra.mxu1 %v11761_v19  ;;  %v11842_v18 = vld [vmem:[#allocation5 + $0x2f8] ss:$20 sps:$4 sm:$0xff]   ;;  %v11845_v19 = vld [vmem:[#allocation5 + $0x3a0] ss:$20 sps:$4 sm:$0xff]  }
 0x1db   : > { %3354 = vmatprep.subr.bf16.mxu0 %v11766_v20  ;;  %3491 = vmatprep.subr.bf16.mxu1 %v11769_v21  ;;  %v11850_v20 = vld [vmem:[#allocation5 + $0x324] ss:$20 sps:$4 sm:$0xff]   ;;  %v11853_v21 = vld [vmem:[#allocation5 + $0x3cc] ss:$20 sps:$4 sm:$0xff]  }
 0x1de   : > { %3355 = vmatpush1.bf16.msra.mxu0 %v11764_v23  ;;  %3492 = vmatpush1.bf16.msra.mxu1 %v11767_v24  ;;  %v11848_v23 = vld [vmem:[#allocation5 + $0x320] ss:$20 sps:$4 sm:$0xff]   ;;  %v11851_v24 = vld [vmem:[#allocation5 + $0x3c8] ss:$20 sps:$4 sm:$0xff]  }
 0x1df   : > { %3356 = vmatprep.subr.bf16.mxu0 %v11772_v25  ;;  %3493 = vmatprep.subr.bf16.mxu1 %v11775_v26  ;;  %v11856_v25 = vld [vmem:[#allocation5 + $0x34c] ss:$20 sps:$4 sm:$0xff]   ;;  %v11859_v26 = vld [vmem:[#allocation5 + $0x3f4] ss:$20 sps:$4 sm:$0xff]  }
 0x1e2   : > { %3357 = vmatpush1.bf16.msra.mxu0 %v11770_v28  ;;  %3494 = vmatpush1.bf16.msra.mxu1 %v11773_v29  ;;  %v11854_v28 = vld [vmem:[#allocation5 + $0x348] ss:$20 sps:$4 sm:$0xff]   ;;  %v11857_v29 = vld [vmem:[#allocation5 + $0x3f0] ss:$20 sps:$4 sm:$0xff]  }
 0x1e3   : > { %3358 = vmatprep.subr.bf16.mxu0 %v11778_v1  ;;  %3495 = vmatprep.subr.bf16.mxu1 %v11781_v2  ;;  %v11862_v1 = vld [vmem:[#allocation5 + $0x374] ss:$20 sps:$4 sm:$0xff]   ;;  %v11865_v2 = vld [vmem:[#allocation5 + $0x41c] ss:$20 sps:$4 sm:$0xff]  }
 0x1e6   : > { %3359 = vmatpush1.bf16.msra.mxu0 %v11776_v30  ;;  %3496 = vmatpush1.bf16.msra.mxu1 %v11779_v31  ;;  %v11860_v30 = vld [vmem:[#allocation5 + $0x370] ss:$20 sps:$4 sm:$0xff]   ;;  %v11863_v31 = vld [vmem:[#allocation5 + $0x418] ss:$20 sps:$4 sm:$0xff]  }
 0x1e7   : > { %3360 = vmatprep.subr.bf16.mxu0 %v11784_v32  ;;  %3497 = vmatprep.subr.bf16.mxu1 %v11787_v33  ;;  %v11868_v32 = vld [vmem:[#allocation5 + $0x39c] ss:$20 sps:$4 sm:$0xff]   ;;  %v11871_v33 = vld [vmem:[#allocation5 + $0x444] ss:$20 sps:$4 sm:$0xff]  }
 0x1ea   : > { %3361 = vmatpush1.bf16.msra.mxu0 %v11782_v34  ;;  %3498 = vmatpush1.bf16.msra.mxu1 %v11785_v35  ;;  %v11866_v34 = vld [vmem:[#allocation5 + $0x398] ss:$20 sps:$4 sm:$0xff]   ;;  %v11869_v35 = vld [vmem:[#allocation5 + $0x440] ss:$20 sps:$4 sm:$0xff]  }
 0x1eb   : > { %3362 = vmatprep.subr.bf16.mxu0 %v11790_v36  ;;  %3499 = vmatprep.subr.bf16.mxu1 %v11793_v37  ;;  %v11874_v36 = vld [vmem:[#allocation5 + $0x3c4] ss:$20 sps:$4 sm:$0xff]   ;;  %v11877_v37 = vld [vmem:[#allocation5 + $0x46c] ss:$20 sps:$4 sm:$0xff]  }
 0x1ee   : > { %3363 = vmatpush1.bf16.msra.mxu0 %v11788_v38  ;;  %3500 = vmatpush1.bf16.msra.mxu1 %v11791_v39  ;;  %v11872_v38 = vld [vmem:[#allocation5 + $0x3c0] ss:$20 sps:$4 sm:$0xff]   ;;  %v11875_v39 = vld [vmem:[#allocation5 + $0x468] ss:$20 sps:$4 sm:$0xff]  }
 0x1ef   : > { %3364 = vmatprep.subr.bf16.mxu0 %v11796_v40  ;;  %3501 = vmatprep.subr.bf16.mxu1 %v11799_v41  ;;  %v11880_v40 = vld [vmem:[#allocation5 + $0x3ec] ss:$20 sps:$4 sm:$0xff]   ;;  %v11883_v41 = vld [vmem:[#allocation5 + $0x494] ss:$20 sps:$4 sm:$0xff]  }
 0x1f2   : > { %3365 = vmatpush1.bf16.msra.mxu0 %v11794_v42  ;;  %3502 = vmatpush1.bf16.msra.mxu1 %v11797_v43  ;;  %v11878_v42 = vld [vmem:[#allocation5 + $0x3e8] ss:$20 sps:$4 sm:$0xff]   ;;  %v11881_v43 = vld [vmem:[#allocation5 + $0x490] ss:$20 sps:$4 sm:$0xff]  }
 0x1f3   : > { %3366 = vmatprep.subr.bf16.mxu0 %v11802_v45  ;;  %3514 = vmatprep.subr.bf16.mxu1 %v11805_v47  ;;  %v11886_v45 = vld [vmem:[#allocation5 + $0x414] ss:$20 sps:$4 sm:$0xff]   ;;  %v11889_v47 = vld [vmem:[#allocation5 + $0x4bc] ss:$20 sps:$4 sm:$0xff]  }
 0x1f5   : > { %3504 = vmatmul.mubr.bf16.vlgmr.msra.gmra.mrb[0].mxu1 %v13734_v46 }
 0x1f6   : > { %3367 = vmatpush1.bf16.msra.mxu0 %v11800_v48  ;;  %3515 = vmatpush1.bf16.msra.mxu1 %v11803_v49  ;;  %v11884_v48 = vld [vmem:[#allocation5 + $0x410] ss:$20 sps:$4 sm:$0xff]   ;;  %v11887_v49 = vld [vmem:[#allocation5 + $0x4b8] ss:$20 sps:$4 sm:$0xff]  }
 0x1f7   : > { %3368 = vmatprep.subr.bf16.mxu0 %v11808_v50  ;;  %3516 = vmatprep.subr.bf16.mxu1 %v11811_v53  ;;  %v11892_v50 = vld [vmem:[#allocation5 + $0x43c] ss:$20 sps:$4 sm:$0xff]   ;;  %v11895_v53 = vld [vmem:[#allocation5 + $0x4e4] ss:$20 sps:$4 sm:$0xff]  }
 0x1f8   : > { %3546 = vmatprep.mubr.bf16.mxu1 %v13738_v59 }
 0x1fa   : > { %3369 = vmatpush1.bf16.msra.mxu0 %v11806_v22  ;;  %3517 = vmatpush1.bf16.msra.mxu1 %v11809_v54  ;;  %v11890_v22 = vld [vmem:[#allocation5 + $0x438] ss:$20 sps:$4 sm:$0xff]   ;;  %v11893_v54 = vld [vmem:[#allocation5 + $0x4e0] ss:$20 sps:$4 sm:$0xff]  }
 0x1fb   : > { %3370 = vmatprep.subr.bf16.mxu0 %v11814_v55  ;;  %3518 = vmatprep.subr.bf16.mxu1 %v11817_v56  ;;  %v11898_v55 = vld [vmem:[#allocation5 + $0x464] ss:$20 sps:$4 sm:$0xff]   ;;  %v11901_v56 = vld [vmem:[#allocation5 + $0x50c] ss:$20 sps:$4 sm:$0xff]  }
 0x1fe   : > { %3371 = vmatpush1.bf16.msra.mxu0 %v11812_v57  ;;  %3519 = vmatpush1.bf16.msra.mxu1 %v11815_v60  ;;  %v11896_v57 = vld [vmem:[#allocation5 + $0x460] ss:$20 sps:$4 sm:$0xff]   ;;  %v11899_v60 = vld [vmem:[#allocation5 + $0x508] ss:$20 sps:$4 sm:$0xff]  }
 0x1ff   : > { %3372 = vmatprep.subr.bf16.mxu0 %v11820_v61  ;;  %3520 = vmatprep.subr.bf16.mxu1 %v11823_v62  ;;  %v11904_v61 = vld [vmem:[#allocation5 + $0x48c] ss:$20 sps:$4 sm:$0xff]   ;;  %v11907_v62 = vld [vmem:[#allocation5 + $0x534] ss:$20 sps:$4 sm:$0xff]  }
 0x202   : > { %3373 = vmatpush1.bf16.msra.mxu0 %v11818_v63  ;;  %3521 = vmatpush1.bf16.msra.mxu1 %v11821_v0  ;;  %v13744_v63 = vld [vmem:[%s13663_s30 + $0x8] ss:$20 sps:$4 sm:$0xff]  }
 0x203   : > { %3385 = vmatprep.subr.bf16.mxu0 %v11826_v3  ;;  %3522 = vmatprep.subr.bf16.mxu1 %v11829_v5  ;;  %v11902_v0 = vld [vmem:[#allocation5 + $0x488] ss:$20 sps:$4 sm:$0xff]   ;;  %v11905_v3 = vld [vmem:[#allocation5 + $0x530] ss:$20 sps:$4 sm:$0xff]  }
 0x204   : > { %v11910_v5 = vld [vmem:[#allocation5 + $0x4b4] ss:$20 sps:$4 sm:$0xff]  }
 0x205   : > { %3375 = vmatmul.mubr.bf16.vlgmr.msra.gmra.mrb[0].mxu0 %v13734_v46 }
 0x206   : > { %3386 = vmatpush1.bf16.msra.mxu0 %v11824_v6  ;;  %3523 = vmatpush1.bf16.msra.mxu1 %v11827_v7  ;;  %v11913_v6 = vld [vmem:[#allocation5 + $0x55c] ss:$20 sps:$4 sm:$0xff]  }
 0x207   : > { %3387 = vmatprep.subr.bf16.mxu0 %v11832_v8  ;;  %3524 = vmatprep.subr.bf16.mxu1 %v11835_v9  ;;  %v11908_v7 = vld [vmem:[#allocation5 + $0x4b0] ss:$20 sps:$4 sm:$0xff]   ;;  %v11911_v8 = vld [vmem:[#allocation5 + $0x558] ss:$20 sps:$4 sm:$0xff]  }
 0x208   : > { %3417 = vmatprep.mubr.bf16.mxu0 %v13738_v59  ;;  %v11916_v9 = vld [vmem:[#allocation5 + $0x4dc] ss:$20 sps:$4 sm:$0xff]  }
 0x20a   : > { %3388 = vmatpush1.bf16.msra.mxu0 %v11830_v10  ;;  %3525 = vmatpush1.bf16.msra.mxu1 %v11833_v11  ;;  %v11919_v10 = vld [vmem:[#allocation5 + $0x584] ss:$20 sps:$4 sm:$0xff]  }
 0x20b   : > { %3389 = vmatprep.subr.bf16.mxu0 %v11838_v12  ;;  %3526 = vmatprep.subr.bf16.mxu1 %v11841_v13  ;;  %v11914_v11 = vld [vmem:[#allocation5 + $0x4d8] ss:$20 sps:$4 sm:$0xff]   ;;  %v11917_v12 = vld [vmem:[#allocation5 + $0x580] ss:$20 sps:$4 sm:$0xff]  }
 0x20c   : > { %v11922_v13 = vld [vmem:[#allocation5 + $0x504] ss:$20 sps:$4 sm:$0xff]  }
 0x20e   : > { %3390 = vmatpush1.bf16.msra.mxu0 %v11836_v14  ;;  %3527 = vmatpush1.bf16.msra.mxu1 %v11839_v15  ;;  %v11923_v14 = vld [vmem:[#allocation5 + $0x150] ss:$20 sps:$4 sm:$0xff]   ;;  %v11920_v15 = vld [vmem:[#allocation5 + $0x500] ss:$20 sps:$4 sm:$0xff]  }
 0x20f   : > { %3391 = vmatprep.subr.bf16.mxu0 %v11844_v16  ;;  %3528 = vmatprep.subr.bf16.mxu1 %v11847_v17  ;;  %v11924_v16 = vld [vmem:[#allocation5 + $0x10] ss:$20 sps:$4 sm:$0xff]   ;;  %v11927_v17 = vld [vmem:[#allocation5 + $0x52c] ss:$20 sps:$4 sm:$0xff]  }
 0x212   : > { %3392 = vmatpush1.bf16.msra.mxu0 %v11842_v18  ;;  %3529 = vmatpush1.bf16.msra.mxu1 %v11845_v19  ;;  %v11928_v18 = vld [vmem:[#allocation5 + $0x178] ss:$20 sps:$4 sm:$0xff]   ;;  %v13750_v19 = vld [vmem:[%s13663_s30 + $0x10] ss:$20 sps:$4 sm:$0xff]  }
 0x213   : > { %3393 = vmatprep.subr.bf16.mxu0 %v11850_v20  ;;  %3530 = vmatprep.subr.bf16.mxu1 %v11853_v21  ;;  %v11925_v20 = vld [vmem:[#allocation5 + $0x528] ss:$20 sps:$4 sm:$0xff]   ;;  %v11929_v21 = vld [vmem:[#allocation5 + $0x38] ss:$20 sps:$4 sm:$0xff]  }
 0x216   : > { %3394 = vmatpush1.bf16.msra.mxu0 %v11848_v23  ;;  %3531 = vmatpush1.bf16.msra.mxu1 %v11851_v24  ;;  %v11932_v23 = vld [vmem:[#allocation5 + $0x554] ss:$20 sps:$4 sm:$0xff]  }
 0x217   : > { %3395 = vmatprep.subr.bf16.mxu0 %v11856_v25  ;;  %3532 = vmatprep.subr.bf16.mxu1 %v11859_v26  ;;  %v11933_v24 = vld [vmem:[#allocation5 + $0x1a0] ss:$20 sps:$4 sm:$0xff]   ;;  %v13756_v25 = vld [vmem:[%s13663_s30 + $0x4] ss:$20 sps:$4 sm:$0xff]  }
 0x218   : > { %v11930_v26 = vld [vmem:[#allocation5 + $0x550] ss:$20 sps:$4 sm:$0xff]  }
 0x21a   : > { %3396 = vmatpush1.bf16.msra.mxu0 %v11854_v28  ;;  %3533 = vmatpush1.bf16.msra.mxu1 %v11857_v29  ;;  %v11934_v28 = vld [vmem:[#allocation5 + $0x60] ss:$20 sps:$4 sm:$0xff]   ;;  %v11937_v29 = vld [vmem:[#allocation5 + $0x57c] ss:$20 sps:$4 sm:$0xff]  }
 0x21b   : > { %3397 = vmatprep.subr.bf16.mxu0 %v11862_v1  ;;  %3534 = vmatprep.subr.bf16.mxu1 %v11865_v2  ;;  %v11938_v1 = vld [vmem:[#allocation5 + $0x1c8] ss:$20 sps:$4 sm:$0xff]   ;;  %v11935_v2 = vld [vmem:[#allocation5 + $0x578] ss:$20 sps:$4 sm:$0xff]  }
 0x21e   : > { %3398 = vmatpush1.bf16.msra.mxu0 %v11860_v30  ;;  %3535 = vmatpush1.bf16.msra.mxu1 %v11863_v31  ;;  %v11939_v30 = vld [vmem:[#allocation5 + $0x88] ss:$20 sps:$4 sm:$0xff]   ;;  %v11940_v31 = vld [vmem:[#allocation5 + $0x1f0] ss:$20 sps:$4 sm:$0xff]  }
 0x21f   : > { %3399 = vmatprep.subr.bf16.mxu0 %v11868_v32  ;;  %3536 = vmatprep.subr.bf16.mxu1 %v11871_v33  ;;  %v11941_v32 = vld [vmem:[#allocation5 + $0x3d0] ss:$20 sps:$4 sm:$0xff]  }
 0x220   : > { %v11942_v33 = vld [vmem:[#allocation5 + $0xb0] ss:$20 sps:$4 sm:$0xff]  }
 0x222   : > { %3400 = vmatpush1.bf16.msra.mxu0 %v11866_v34  ;;  %3537 = vmatpush1.bf16.msra.mxu1 %v11869_v35  ;;  %v11943_v34 = vld [vmem:[#allocation5 + $0x290] ss:$20 sps:$4 sm:$0xff]   ;;  %v11944_v35 = vld [vmem:[#allocation5 + $0x218] ss:$20 sps:$4 sm:$0xff]  }
 0x223   : > { %3401 = vmatprep.subr.bf16.mxu0 %v11874_v36  ;;  %3538 = vmatprep.subr.bf16.mxu1 %v11877_v37  ;;  %v11945_v36 = vld [vmem:[#allocation5 + $0x3f8] ss:$20 sps:$4 sm:$0xff]  }
 0x224   : > { %v11946_v37 = vld [vmem:[#allocation5 + $0xd8] ss:$20 sps:$4 sm:$0xff]  }
 0x226   : > { %3402 = vmatpush1.bf16.msra.mxu0 %v11872_v38  ;;  %3539 = vmatpush1.bf16.msra.mxu1 %v11875_v39  ;;  %v11947_v38 = vld [vmem:[#allocation5 + $0x2b8] ss:$20 sps:$4 sm:$0xff]   ;;  %v11948_v39 = vld [vmem:[#allocation5 + $0x240] ss:$20 sps:$4 sm:$0xff]  }
 0x227   : > { %3403 = vmatprep.subr.bf16.mxu0 %v11880_v40  ;;  %3540 = vmatprep.subr.bf16.mxu1 %v11883_v41  ;;  %v11949_v40 = vld [vmem:[#allocation5 + $0x420] ss:$20 sps:$4 sm:$0xff]  }
 0x228   : > { %v11950_v41 = vld [vmem:[#allocation5 + $0x100] ss:$20 sps:$4 sm:$0xff]  }
 0x22a   : > { %3404 = vmatpush1.bf16.msra.mxu0 %v11878_v42  ;;  %3541 = vmatpush1.bf16.msra.mxu1 %v11881_v43  ;;  %v11951_v42 = vld [vmem:[#allocation5 + $0x2e0] ss:$20 sps:$4 sm:$0xff]   ;;  %v11952_v43 = vld [vmem:[#allocation5 + $0x268] ss:$20 sps:$4 sm:$0xff]  }
 0x22b   : > { %3405 = vmatprep.subr.bf16.mxu0 %v11886_v45  ;;  %3542 = vmatprep.subr.bf16.mxu1 %v11889_v47  ;;  %v11953_v45 = vld [vmem:[#allocation5 + $0x448] ss:$20 sps:$4 sm:$0xff]  }
 0x22c   : > { %v11954_v47 = vld [vmem:[#allocation5 + $0x128] ss:$20 sps:$4 sm:$0xff]  }
 0x22e   : > { %3406 = vmatpush1.bf16.msra.mxu0 %v11884_v48  ;;  %3543 = vmatpush1.bf16.msra.mxu1 %v11887_v49  ;;  %v11955_v48 = vld [vmem:[#allocation5 + $0x308] ss:$20 sps:$4 sm:$0xff]   ;;  %v11956_v49 = vld [vmem:[#allocation5 + $0x470] ss:$20 sps:$4 sm:$0xff]  }
 0x22f   : > { %3407 = vmatprep.subr.bf16.mxu0 %v11892_v50  ;;  %3544 = vmatprep.subr.bf16.mxu1 %v11895_v53  ;;  %v11959_v50 = vld [vmem:[#allocation5 + $0xb4c] ss:$20 sps:$4 sm:$0xff]   ;;  %v3944_v53 = vrot.slane %v13756_v25, 1 }
 0x232   : > { %3408 = vmatpush1.bf16.msra.mxu0 %v11890_v22  ;;  %3545 = vmatpush1.bf16.msra.mxu1 %v11893_v54  ;;  %v11957_v22 = vld [vmem:[#allocation5 + $0xb48] ss:$20 sps:$4 sm:$0xff]   ;;  %v11960_v54 = vld [vmem:[#allocation5 + $0x330] ss:$20 sps:$4 sm:$0xff]  }
 0x233   : > { %3409 = vmatprep.subr.bf16.mxu0 %v11898_v55  ;;  %3557 = vmatprep.subr.bf16.mxu1 %v11901_v56  ;;  %v11961_v55 = vld [vmem:[#allocation5 + $0x498] ss:$20 sps:$4 sm:$0xff]   ;;  %v11964_v56 = vld [vmem:[#allocation5 + $0xb74] ss:$20 sps:$4 sm:$0xff]  }
 0x235   : > { %3547 = vmatmul.mubr.bf16.vlgmr.msra.gmra.mrb[0].mxu1 %v13744_v63 }
 0x236   : > { %3410 = vmatpush1.bf16.msra.mxu0 %v11896_v57  ;;  %3558 = vmatpush1.bf16.msra.mxu1 %v11899_v60  ;;  %v11962_v60 = vld [vmem:[#allocation5 + $0xb70] ss:$20 sps:$4 sm:$0xff]  }
 0x237   : > { %3411 = vmatprep.subr.bf16.mxu0 %v11904_v61  ;;  %3559 = vmatprep.subr.bf16.mxu1 %v11907_v62  ;;  %v11965_v61 = vld [vmem:[#allocation5 + $0x358] ss:$20 sps:$4 sm:$0xff]   ;;  %v11969_v62 = vld [vmem:[#allocation5 + $0xb9c] ss:$20 sps:$4 sm:$0xff]  }
 0x238   : > { %3589 = vmatprep.mubr.bf16.mxu1 %v13250_v58 }
 0x23a   : > { %3412 = vmatpush1.bf16.msra.mxu0 %v11902_v0  ;;  %3560 = vmatpush1.bf16.msra.mxu1 %v11905_v3  ;;  %v11967_v0 = vld [vmem:[#allocation5 + $0xb98] ss:$20 sps:$4 sm:$0xff]   ;;  %v11970_v3 = vld [vmem:[#allocation5 + $0x380] ss:$20 sps:$4 sm:$0xff]  }
 0x23b   : > { %3413 = vmatprep.subr.bf16.mxu0 %v11910_v5  ;;  %3561 = vmatprep.subr.bf16.mxu1 %v11913_v6  ;;  %v11974_v5 = vld [vmem:[#allocation5 + $0xbc4] ss:$20 sps:$4 sm:$0xff]   ;;  %v11972_v6 = vld [vmem:[#allocation5 + $0xbc0] ss:$20 sps:$4 sm:$0xff]  }
 0x23e   : > { %3414 = vmatpush1.bf16.msra.mxu0 %v11908_v7  ;;  %3562 = vmatpush1.bf16.msra.mxu1 %v11911_v8  ;;  %v11975_v7 = vld [vmem:[#allocation5 + $0x3a8] ss:$20 sps:$4 sm:$0xff]   ;;  %v11978_v8 = vld [vmem:[#allocation5 + $0xbec] ss:$20 sps:$4 sm:$0xff]  }
 0x23f   : > { %3415 = vmatprep.subr.bf16.mxu0 %v11916_v9  ;;  %3563 = vmatprep.subr.bf16.mxu1 %v11919_v10  ;;  %v11976_v9 = vld [vmem:[#allocation5 + $0xbe8] ss:$20 sps:$4 sm:$0xff]   ;;  %v11979_v10 = vld [vmem:[#allocation5 + $0x510] ss:$20 sps:$4 sm:$0xff]  }
 0x242   : > { %3416 = vmatpush1.bf16.msra.mxu0 %v11914_v11  ;;  %3564 = vmatpush1.bf16.msra.mxu1 %v11917_v12  ;;  %v11982_v11 = vld [vmem:[#allocation5 + $0xc14] ss:$20 sps:$4 sm:$0xff]   ;;  %v11980_v12 = vld [vmem:[#allocation5 + $0xc10] ss:$20 sps:$4 sm:$0xff]  }
 0x243   : > { %3428 = vmatprep.subr.bf16.mxu0 %v11922_v13  ;;  %10805 = vmatprep.subr.bf16.mxu1 %v11923_v14  ;;  %v11983_v13 = vld [vmem:[#allocation5 + $0x538] ss:$20 sps:$4 sm:$0xff]   ;;  %v11986_v14 = vld [vmem:[#allocation5 + $0xc3c] ss:$20 sps:$4 sm:$0xff]  }
 0x245   : > { %3418 = vmatmul.mubr.bf16.vlgmr.msra.gmra.mrb[0].mxu0 %v13744_v63  ;;  %10065 = vmatmul.mubr.msk.bf16.vlgmr.msra.gmra.mrb[0].mxu1 %vm2015_vm1, %v13750_v19 }
 0x246   : > { %3429 = vmatpush1.bf16.msra.mxu0 %v11920_v15  ;;  %10806 = vmatpush3.bf16.msra.mxu1 %v11924_v16  ;;  %v11984_v15 = vld [vmem:[#allocation5 + $0xc38] ss:$20 sps:$4 sm:$0xff]   ;;  %v11987_v16 = vld [vmem:[#allocation5 + $0x560] ss:$20 sps:$4 sm:$0xff]  }
 0x247   : > { %3430 = vmatprep.subr.bf16.mxu0 %v11927_v17  ;;  %10807 = vmatprep.subr.bf16.mxu1 %v11928_v18  ;;  %v11990_v17 = vld [vmem:[#allocation5 + $0xc64] ss:$20 sps:$4 sm:$0xff]   ;;  %v11988_v18 = vld [vmem:[#allocation5 + $0xc60] ss:$20 sps:$4 sm:$0xff]  }
 0x248   : > { %3460 = vmatprep.mubr.bf16.mxu0 %v13250_v58  ;;  %3632 = vmatprep.mubr.bf16.mxu1 %v13756_v25  ;;  %v12000_v25 = vld [vmem:[#allocation5 + $0xb6c] ss:$20 sps:$4 sm:$0xff]  }
 0x24a   : > { %3431 = vmatpush1.bf16.msra.mxu0 %v11925_v20  ;;  %10808 = vmatpush3.bf16.msra.mxu1 %v11929_v21  ;;  %v11994_v20 = vld [vmem:[#allocation5 + $0xb44] ss:$20 sps:$4 sm:$0xff]   ;;  %v11997_v21 = vld [vmem:[#allocation5 + $0xc8c] ss:$20 sps:$4 sm:$0xff]  }
 0x24b   : > { %3432 = vmatprep.subr.bf16.mxu0 %v11932_v23  ;;  %10809 = vmatprep.subr.bf16.mxu1 %v11933_v24  ;;  %v11992_v23 = vld [vmem:[#allocation5 + $0xb40] ss:$20 sps:$4 sm:$0xff]   ;;  %v11995_v24 = vld [vmem:[#allocation5 + $0xc88] ss:$20 sps:$4 sm:$0xff]  }
 0x24e   : > { %3433 = vmatpush1.bf16.msra.mxu0 %v11930_v26  ;;  %10810 = vmatpush3.bf16.msra.mxu1 %v11934_v28  ;;  %v12003_v26 = vld [vmem:[#allocation5 + $0xcb4] ss:$20 sps:$4 sm:$0xff]  }
 0x24f   : > { %3434 = vmatprep.subr.bf16.mxu0 %v11937_v29  ;;  %10811 = vmatprep.subr.bf16.mxu1 %v11938_v1  ;;  %v11998_v28 = vld [vmem:[#allocation5 + $0xb68] ss:$20 sps:$4 sm:$0xff]   ;;  %v12001_v29 = vld [vmem:[#allocation5 + $0xcb0] ss:$20 sps:$4 sm:$0xff]  }
 0x250   : > { %v12006_v1 = vld [vmem:[#allocation5 + $0xb94] ss:$20 sps:$4 sm:$0xff]  }
 0x252   : > { %3435 = vmatpush1.bf16.msra.mxu0 %v11935_v2  ;;  %10812 = vmatpush3.bf16.msra.mxu1 %v11939_v30  ;;  %v12009_v2 = vld [vmem:[#allocation5 + $0xcdc] ss:$20 sps:$4 sm:$0xff]  }
 0x253   : > { %10813 = vmatprep.subr.bf16.mxu1 %v11940_v31  ;;  %10827 = vmatprep.subr.bf16.mxu0 %v11941_v32  ;;  %v12004_v32 = vld [vmem:[#allocation5 + $0xb90] ss:$20 sps:$4 sm:$0xff]  }
 0x255   : > { %10064 = vmatmul.mubr.msk.bf16.vlgmr.msra.gmra.mrb[0].mxu0 %vm2015_vm1, %v13750_v19 }
 0x256   : > { %10814 = vmatpush3.bf16.msra.mxu1 %v11942_v33  ;;  %10828 = vmatpush3.bf16.msra.mxu0 %v11943_v34  ;;  %v12007_v33 = vld [vmem:[#allocation5 + $0xcd8] ss:$20 sps:$4 sm:$0xff]  }
 0x257   : > { %10815 = vmatprep.subr.bf16.mxu1 %v11944_v35  ;;  %10829 = vmatprep.subr.bf16.mxu0 %v11945_v36 }
 0x258   : > { %3673 = vmatprep.mubr.bf16.mxu0 %v13738_v59  ;;  %v3945_v59 = vrot.slane %v13667_v51, 1  ;;  %v11966_v51 = vld [vmem:[#allocation5 + $0x4c0] ss:$20 sps:$4 sm:$0xff]  }
 0x25a   : > { %10816 = vmatpush3.bf16.msra.mxu1 %v11946_v37  ;;  %10830 = vmatpush3.bf16.msra.mxu0 %v11947_v38  ;;  %v13766_v57 = vsel %vm3940_vm3, %v3944_v53, %v3945_v59  ;;  %v12018_v53 = vld [vmem:[#allocation5 + $0xbe4] ss:$20 sps:$4 sm:$0xff]   ;;  %v12021_v59 = vld [vmem:[#allocation5 + $0xd2c] ss:$20 sps:$4 sm:$0xff]  }
 0x25b   : > { %10817 = vmatprep.subr.bf16.mxu1 %v11948_v39  ;;  %10831 = vmatprep.subr.bf16.mxu0 %v11949_v40  ;;  %v12015_v40 = vld [vmem:[#allocation5 + $0xd04] ss:$20 sps:$4 sm:$0xff]  }
 0x25e   : > { %10818 = vmatpush3.bf16.msra.mxu1 %v11950_v41  ;;  %10832 = vmatpush3.bf16.msra.mxu0 %v11951_v42 }
 0x25f   : > { %10819 = vmatprep.subr.bf16.mxu1 %v11952_v43  ;;  %10833 = vmatprep.subr.bf16.mxu0 %v11953_v45 }
 0x262   : > { %10820 = vmatpush3.bf16.msra.mxu1 %v11954_v47  ;;  %10834 = vmatpush3.bf16.msra.mxu0 %v11955_v48  ;;  %v12010_v48 = vld [vmem:[#allocation5 + $0xbb8] ss:$20 sps:$4 sm:$0xff]  }
 0x263   : > { %10835 = vmatprep.subr.bf16.mxu0 %v11956_v49  ;;  %5028 = vmatprep.subr.bf16.mxu1 %v11959_v50  ;;  %v12013_v49 = vld [vmem:[#allocation5 + $0xd00] ss:$20 sps:$4 sm:$0xff]  }
 0x265   : > { %3633 = vmatmul.mubr.bf16.vlgmr.msra.gmra.mrb[8].mxu1 %v13734_v46  ;;  %v11971_v46 = vld [vmem:[#allocation5 + $0x4e8] ss:$20 sps:$4 sm:$0xff]  }
 0x266   : > { %10836 = vmatpush3.bf16.msra.mxu0 %v11960_v54  ;;  %5029 = vmatpush1.bf16.msra.mxu1 %v11957_v22  ;;  %v12016_v22 = vld [vmem:[#allocation5 + $0xbe0] ss:$20 sps:$4 sm:$0xff]   ;;  %v12019_v54 = vld [vmem:[#allocation5 + $0xd28] ss:$20 sps:$4 sm:$0xff]  }
 0x267   : > { %10837 = vmatprep.subr.bf16.mxu0 %v11961_v55  ;;  %5030 = vmatprep.subr.bf16.mxu1 %v11964_v56  ;;  %v12024_v55 = vld [vmem:[#allocation5 + $0xc0c] ss:$20 sps:$4 sm:$0xff]   ;;  %v12027_v56 = vld [vmem:[#allocation5 + $0xd54] ss:$20 sps:$4 sm:$0xff]  }
 0x268   : > { %5060 = vmatprep.mubr.bf16.mxu1 %v13766_v57 }
 0x26a   : > { %10838 = vmatpush3.bf16.msra.mxu0 %v11965_v61  ;;  %5031 = vmatpush1.bf16.msra.mxu1 %v11962_v60  ;;  %v12022_v60 = vld [vmem:[#allocation5 + $0xc08] ss:$20 sps:$4 sm:$0xff]   ;;  %v12025_v61 = vld [vmem:[#allocation5 + $0xd50] ss:$20 sps:$4 sm:$0xff]  }
 0x26b   : > { %10839 = vmatprep.subr.bf16.mxu0 %v11966_v51  ;;  %5032 = vmatprep.subr.bf16.mxu1 %v11969_v62  ;;  %v12030_v51 = vld [vmem:[#allocation5 + $0xc34] ss:$20 sps:$4 sm:$0xff]   ;;  %v12033_v62 = vld [vmem:[#allocation5 + $0xd7c] ss:$20 sps:$4 sm:$0xff]  }
 0x26e   : > { %10840 = vmatpush3.bf16.msra.mxu0 %v11970_v3  ;;  %5033 = vmatpush1.bf16.msra.mxu1 %v11967_v0  ;;  %v12028_v0 = vld [vmem:[#allocation5 + $0xc30] ss:$20 sps:$4 sm:$0xff]   ;;  %v12031_v3 = vld [vmem:[#allocation5 + $0xd78] ss:$20 sps:$4 sm:$0xff]  }
 0x26f   : > { %10841 = vmatprep.subr.bf16.mxu0 %v11971_v46  ;;  %5034 = vmatprep.subr.bf16.mxu1 %v11974_v5  ;;  %v12036_v46 = vld [vmem:[#allocation5 + $0xc5c] ss:$20 sps:$4 sm:$0xff]   ;;  %v12039_v5 = vld [vmem:[#allocation5 + $0xda4] ss:$20 sps:$4 sm:$0xff]  }
 0x272   : > { %10842 = vmatpush3.bf16.msra.mxu0 %v11975_v7  ;;  %5035 = vmatpush1.bf16.msra.mxu1 %v11972_v6  ;;  %v12890_v6 = vld [vmem:[%s13663_s30] ss:$20 sps:$4 sm:$0xff]  }
 0x273   : > { %10996 = vmatprep.subr.bf16.mxu0 %v13251_v44  ;;  %5036 = vmatprep.subr.bf16.mxu1 %v11978_v8  ;;  %v3941_v7 = vrot.slane %v12890_v6, 1  ;;  %v12034_v8 = vld [vmem:[#allocation5 + $0xc58] ss:$20 sps:$4 sm:$0xff]  }
 0x274   : > { %v12114_v6 = vld [vmem:[#allocation5 + $0xe64] ss:$20 sps:$4 sm:$0xff]  }
 0x275   : > { %3674 = vmatmul.mubr.bf16.vlgmr.msra.gmra.mrb[12].mxu0 %v13744_v63  ;;  %v11991_v63 = vld [vmem:[#allocation5 + $0x588] ss:$20 sps:$4 sm:$0xff]  }
 0x276   : > { %10997 = vmatpush3.bf16.msra.mxu0 %v11979_v10  ;;  %5037 = vmatpush1.bf16.msra.mxu1 %v11976_v9  ;;  %v12037_v9 = vld [vmem:[#allocation5 + $0xda0] ss:$20 sps:$4 sm:$0xff]   ;;  %v3942_v10 = vrot.slane %v13674_v4, 1 }
 0x277   : > { %10998 = vmatprep.subr.bf16.mxu0 %v13251_v44  ;;  %5038 = vmatprep.subr.bf16.mxu1 %v11982_v11  ;;  %v12042_v11 = vld [vmem:[#allocation5 + $0xc84] ss:$20 sps:$4 sm:$0xff]  }
 0x278   : > { %11004 = vmatprep.mubr.msk.bf16.mxu0 %vm13252_vm2, %v13251_v44 }
 0x27a   : > { %10999 = vmatpush3.bf16.msra.mxu0 %v11983_v13  ;;  %5039 = vmatpush1.bf16.msra.mxu1 %v11980_v12  ;;  %v12045_v12 = vld [vmem:[#allocation5 + $0xdcc] ss:$20 sps:$4 sm:$0xff]  }
 0x27b   : > { %11000 = vmatprep.subr.bf16.mxu0 %v13251_v44  ;;  %5040 = vmatprep.subr.bf16.mxu1 %v11986_v14  ;;  %v12891_v13 = vld [vmem:[%s13663_s30 + $0xc] ss:$20 sps:$4 sm:$0xff]  }
 0x27c   : > { %v3950_v14 = vrot.slane %v12891_v13, 1  ;;  %v12121_v13 = vld [vmem:[#allocation5 + $0xfd0] ss:$20 sps:$4 sm:$0xff]  }
 0x27e   : > { %11001 = vmatpush3.bf16.msra.mxu0 %v11987_v16  ;;  %5041 = vmatpush1.bf16.msra.mxu1 %v11984_v15  ;;  %v3951_v15 = vrot.slane %v13690_v52, 1  ;;  %v12040_v16 = vld [vmem:[#allocation5 + $0xc80] ss:$20 sps:$4 sm:$0xff]   ;;  %v12049_v52 = vld [vmem:[#allocation5 + $0xdf0] ss:$20 sps:$4 sm:$0xff]  }
 0x27f   : > { %11002 = vmatprep.subr.bf16.mxu0 %v13251_v44  ;;  %5042 = vmatprep.subr.bf16.mxu1 %v11990_v17  ;;  %v12043_v17 = vld [vmem:[#allocation5 + $0xdc8] ss:$20 sps:$4 sm:$0xff]  }
 0x280   : > { %v13792_v4 = vsel %vm3940_vm3, %v3950_v14, %v3951_v15  ;;  %v12126_v14 = vld [vmem:[#allocation5 + $0xeb4] ss:$20 sps:$4 sm:$0xff]   ;;  %v12129_v15 = vld [vmem:[#allocation5 + $0xffc] ss:$20 sps:$4 sm:$0xff]  }
 0x282   : > { %11003 = vmatpush3.bf16.msra.mxu0 %v11991_v63  ;;  %5043 = vmatpush1.bf16.msra.mxu1 %v11988_v18  ;;  %v13788_v18 = vsel %vm3940_vm3, %v3941_v7, %v3942_v10  ;;  %v12048_v63 = vld [vmem:[#allocation5 + $0xcac] ss:$20 sps:$4 sm:$0xff]  }
 0x283   : > { %4899 = vmatprep.subr.bf16.mxu0 %v11994_v20  ;;  %5044 = vmatprep.subr.bf16.mxu1 %v11997_v21  ;;  %v12051_v20 = vld [vmem:[#allocation5 + $0xdf4] ss:$20 sps:$4 sm:$0xff]   ;;  %v12117_v7 = vld [vmem:[#allocation5 + $0xfac] ss:$20 sps:$4 sm:$0xff]  }
 0x284   : > { %v12046_v21 = vld [vmem:[#allocation5 + $0xca8] ss:$20 sps:$4 sm:$0xff]   ;;  %v12120_v10 = vld [vmem:[#allocation5 + $0xe8c] ss:$20 sps:$4 sm:$0xff]  }
 0x285   : > { %11005 = vmatmul.mubr.msk.bf16.vlgmr.msra.gmra.mrb[8].mxu0 %vm2015_vm1, %v13750_v19  ;;  %v12012_v19 = vld [vmem:[#allocation5 + $0xbbc] ss:$20 sps:$4 sm:$0xff]  }
 0x286   : > { %4900 = vmatpush1.bf16.msra.mxu0 %v11992_v23  ;;  %5045 = vmatpush1.bf16.msra.mxu1 %v11995_v24  ;;  %v12054_v23 = vld [vmem:[#allocation5 + $0xcd4] ss:$20 sps:$4 sm:$0xff]   ;;  %v12057_v24 = vld [vmem:[#allocation5 + $0xe1c] ss:$20 sps:$4 sm:$0xff]  }
 0x287   : > { %4901 = vmatprep.subr.bf16.mxu0 %v12000_v25  ;;  %5046 = vmatprep.subr.bf16.mxu1 %v12003_v26  ;;  %v12052_v25 = vld [vmem:[#allocation5 + $0xcd0] ss:$20 sps:$4 sm:$0xff]   ;;  %v12055_v26 = vld [vmem:[#allocation5 + $0xe18] ss:$20 sps:$4 sm:$0xff]  }
 0x288   : > { %v10772_v30 = vpop.f32.mrb[4].mxu0  ;;  %v10794_v31 = vpop.f32.mrb[4].mxu1  ;;  %4931 = vmatprep.mubr.bf16.mxu0 %v13766_v57 }
 0x289   : > { %v10773_v34 = vpop.f32.mrb[5].mxu0  ;;  %v10795_v35 = vpop.f32.mrb[5].mxu1 }
 0x28a   : > { %v10774_v36 = vadd.f32 %v10773_v34, %v10772_v30  ;;  %v10796_v37 = vadd.f32 %v10795_v35, %v10794_v31  ;;  %v10775_v38 = vpop.f32.mrb[6].mxu0  ;;  %v10797_v39 = vpop.f32.mrb[6].mxu1  ;;  %4902 = vmatpush1.bf16.msra.mxu0 %v11998_v28  ;;  %5047 = vmatpush1.bf16.msra.mxu1 %v12001_v29  ;;  %v12060_v28 = vld [vmem:[#allocation5 + $0xcfc] ss:$20 sps:$4 sm:$0xff]   ;;  %v12063_v29 = vld [vmem:[#allocation5 + $0xe44] ss:$20 sps:$4 sm:$0xff]  }
 0x28b   : > { %v10776_v41 = vpop.f32.mrb[7].mxu0  ;;  %v10798_v42 = vpop.f32.mrb[7].mxu1  ;;  %4903 = vmatprep.subr.bf16.mxu0 %v12006_v1  ;;  %5048 = vmatprep.subr.bf16.mxu1 %v12009_v2  ;;  %v12058_v1 = vld [vmem:[#allocation5 + $0xcf8] ss:$20 sps:$4 sm:$0xff]   ;;  %v12061_v2 = vld [vmem:[#allocation5 + $0xe40] ss:$20 sps:$4 sm:$0xff]  }
 0x28c   : > { %v13779_v43 = vadd.f32 %v10796_v37, %v10774_v36  ;;  %v10777_v45 = vadd.f32 %v10776_v41, %v10775_v38  ;;  %v10799_v47 = vadd.f32 %v10798_v42, %v10797_v39  ;;  %v12066_v30 = vld [vmem:[#allocation5 + $0xd24] ss:$20 sps:$4 sm:$0xff]   ;;  %v12069_v31 = vld [vmem:[#allocation5 + $0xe6c] ss:$20 sps:$4 sm:$0xff]   ;;  %v12075_v35 = vld [vmem:[#allocation5 + $0xe94] ss:$20 sps:$4 sm:$0xff]  }
 0x28d   : > { %v12072_v34 = vld [vmem:[#allocation5 + $0xd4c] ss:$20 sps:$4 sm:$0xff]   ;;  %v12070_v36 = vld [vmem:[#allocation5 + $0xd48] ss:$20 sps:$4 sm:$0xff]   ;;  %v12073_v37 = vld [vmem:[#allocation5 + $0xe90] ss:$20 sps:$4 sm:$0xff]  }
 0x28e   : > { %v13781_v50 = vadd.f32 %v10799_v47, %v10777_v45  ;;  %4904 = vmatpush1.bf16.msra.mxu0 %v12004_v32  ;;  %5049 = vmatpush1.bf16.msra.mxu1 %v12007_v33  ;;  %v12064_v32 = vld [vmem:[#allocation5 + $0xd20] ss:$20 sps:$4 sm:$0xff]   ;;  %v12067_v33 = vld [vmem:[#allocation5 + $0xe68] ss:$20 sps:$4 sm:$0xff]   ;;  %v12087_v42 = vld [vmem:[#allocation5 + $0xee4] ss:$20 sps:$4 sm:$0xff]  }
 0x28f   : > { %4905 = vmatprep.subr.bf16.mxu0 %v12012_v19  ;;  %5050 = vmatprep.subr.bf16.mxu1 %v12015_v40  ;;  %v12078_v38 = vld [vmem:[#allocation5 + $0xd74] ss:$20 sps:$4 sm:$0xff]   ;;  %v12081_v39 = vld [vmem:[#allocation5 + $0xebc] ss:$20 sps:$4 sm:$0xff]   ;;  %v12079_v40 = vld [vmem:[#allocation5 + $0xeb8] ss:$20 sps:$4 sm:$0xff]  }
 0x290   : > { %v12076_v19 = vld [vmem:[#allocation5 + $0xd70] ss:$20 sps:$4 sm:$0xff]   ;;  %v12082_v45 = vld [vmem:[#allocation5 + $0xd98] ss:$20 sps:$4 sm:$0xff]   ;;  %v12085_v47 = vld [vmem:[#allocation5 + $0xee0] ss:$20 sps:$4 sm:$0xff]  }
 0x291   : > { %v12084_v41 = vld [vmem:[#allocation5 + $0xd9c] ss:$20 sps:$4 sm:$0xff]  }
 0x292   : > { %4906 = vmatpush1.bf16.msra.mxu0 %v12010_v48  ;;  %5051 = vmatpush1.bf16.msra.mxu1 %v12013_v49  ;;  %v12090_v48 = vld [vmem:[#allocation5 + $0xdc4] ss:$20 sps:$4 sm:$0xff]   ;;  %v12093_v49 = vld [vmem:[#allocation5 + $0xf0c] ss:$20 sps:$4 sm:$0xff]  }
 0x293   : > { %4907 = vmatprep.subr.bf16.mxu0 %v12018_v53  ;;  %5052 = vmatprep.subr.bf16.mxu1 %v12021_v59  ;;  %v12088_v53 = vld [vmem:[#allocation5 + $0xdc0] ss:$20 sps:$4 sm:$0xff]   ;;  %v12091_v59 = vld [vmem:[#allocation5 + $0xf08] ss:$20 sps:$4 sm:$0xff]  }
 0x296   : > { %4908 = vmatpush1.bf16.msra.mxu0 %v12016_v22  ;;  %5053 = vmatpush1.bf16.msra.mxu1 %v12019_v54  ;;  %v12096_v22 = vld [vmem:[#allocation5 + $0xdec] ss:$20 sps:$4 sm:$0xff]   ;;  %v12099_v54 = vld [vmem:[#allocation5 + $0xf34] ss:$20 sps:$4 sm:$0xff]  }
 0x297   : > { %4909 = vmatprep.subr.bf16.mxu0 %v12024_v55  ;;  %5054 = vmatprep.subr.bf16.mxu1 %v12027_v56  ;;  %v12094_v55 = vld [vmem:[#allocation5 + $0xde8] ss:$20 sps:$4 sm:$0xff]   ;;  %v12097_v56 = vld [vmem:[#allocation5 + $0xf30] ss:$20 sps:$4 sm:$0xff]  }
 0x29a   : > { %4910 = vmatpush1.bf16.msra.mxu0 %v12022_v60  ;;  %5055 = vmatpush1.bf16.msra.mxu1 %v12025_v61  ;;  %v12102_v60 = vld [vmem:[#allocation5 + $0xe14] ss:$20 sps:$4 sm:$0xff]   ;;  %v12105_v61 = vld [vmem:[#allocation5 + $0xf5c] ss:$20 sps:$4 sm:$0xff]  }
 0x29b   : > { %4911 = vmatprep.subr.bf16.mxu0 %v12030_v51  ;;  %5056 = vmatprep.subr.bf16.mxu1 %v12033_v62  ;;  %v12100_v51 = vld [vmem:[#allocation5 + $0xe10] ss:$20 sps:$4 sm:$0xff]   ;;  %v12103_v62 = vld [vmem:[#allocation5 + $0xf58] ss:$20 sps:$4 sm:$0xff]  }
 0x29e   : > { %4912 = vmatpush1.bf16.msra.mxu0 %v12028_v0  ;;  %5057 = vmatpush1.bf16.msra.mxu1 %v12031_v3  ;;  %v12108_v0 = vld [vmem:[#allocation5 + $0xe3c] ss:$20 sps:$4 sm:$0xff]   ;;  %v12111_v3 = vld [vmem:[#allocation5 + $0xf84] ss:$20 sps:$4 sm:$0xff]  }
 0x29f   : > { %4913 = vmatprep.subr.bf16.mxu0 %v12036_v46  ;;  %5058 = vmatprep.subr.bf16.mxu1 %v12039_v5  ;;  %v12106_v46 = vld [vmem:[#allocation5 + $0xe38] ss:$20 sps:$4 sm:$0xff]   ;;  %v12109_v5 = vld [vmem:[#allocation5 + $0xf80] ss:$20 sps:$4 sm:$0xff]  }
 0x2a2   : > { %4914 = vmatpush1.bf16.msra.mxu0 %v12034_v8  ;;  %5059 = vmatpush1.bf16.msra.mxu1 %v12037_v9  ;;  %v12112_v8 = vld [vmem:[#allocation5 + $0xe60] ss:$20 sps:$4 sm:$0xff]   ;;  %v12115_v9 = vld [vmem:[#allocation5 + $0xfa8] ss:$20 sps:$4 sm:$0xff]  }
 0x2a3   : > { %4915 = vmatprep.subr.bf16.mxu0 %v12042_v11  ;;  %5071 = vmatprep.subr.bf16.mxu1 %v12045_v12  ;;  %v12123_v11 = vld [vmem:[#allocation5 + $0xfd4] ss:$20 sps:$4 sm:$0xff]  }
 0x2a4   : > { %v12118_v12 = vld [vmem:[#allocation5 + $0xe88] ss:$20 sps:$4 sm:$0xff]  }
 0x2a5   : > { %5061 = vmatmul.mubr.bf16.vlgmr.msra.gmra.mrb[0].mxu1 %v13788_v18 }
 0x2a6   : > { %4916 = vmatpush1.bf16.msra.mxu0 %v12040_v16  ;;  %5072 = vmatpush1.bf16.msra.mxu1 %v12043_v17  ;;  %v12124_v16 = vld [vmem:[#allocation5 + $0xeb0] ss:$20 sps:$4 sm:$0xff]   ;;  %v12127_v17 = vld [vmem:[#allocation5 + $0xff8] ss:$20 sps:$4 sm:$0xff]  }
 0x2a7   : > { %4917 = vmatprep.subr.bf16.mxu0 %v12048_v63  ;;  %5073 = vmatprep.subr.bf16.mxu1 %v12051_v20  ;;  %v12132_v63 = vld [vmem:[#allocation5 + $0xedc] ss:$20 sps:$4 sm:$0xff]   ;;  %v12135_v20 = vld [vmem:[#allocation5 + $0x1024] ss:$20 sps:$4 sm:$0xff]  }
 0x2a8   : > { %5103 = vmatprep.mubr.bf16.mxu1 %v13792_v4 }
 0x2aa   : > { %4918 = vmatpush1.bf16.msra.mxu0 %v12046_v21  ;;  %5074 = vmatpush1.bf16.msra.mxu1 %v12049_v52  ;;  %v12130_v21 = vld [vmem:[#allocation5 + $0xed8] ss:$20 sps:$4 sm:$0xff]   ;;  %v12133_v52 = vld [vmem:[#allocation5 + $0x1020] ss:$20 sps:$4 sm:$0xff]  }
 0x2ab   : > { %4919 = vmatprep.subr.bf16.mxu0 %v12054_v23  ;;  %5075 = vmatprep.subr.bf16.mxu1 %v12057_v24  ;;  %v12138_v23 = vld [vmem:[#allocation5 + $0xf04] ss:$20 sps:$4 sm:$0xff]   ;;  %v12141_v24 = vld [vmem:[#allocation5 + $0x104c] ss:$20 sps:$4 sm:$0xff]  }
 0x2ae   : > { %4920 = vmatpush1.bf16.msra.mxu0 %v12052_v25  ;;  %5076 = vmatpush1.bf16.msra.mxu1 %v12055_v26  ;;  %v12892_v25 = vld [vmem:[%s13663_s30 + $0x8] ss:$20 sps:$4 sm:$0xff]  }
 0x2af   : > { %4921 = vmatprep.subr.bf16.mxu0 %v12060_v28  ;;  %5077 = vmatprep.subr.bf16.mxu1 %v12063_v29  ;;  %v3947_v26 = vrot.slane %v12892_v25, 1  ;;  %v3948_v28 = vrot.slane %v13701_v27, 1  ;;  %v12136_v29 = vld [vmem:[#allocation5 + $0xf00] ss:$20 sps:$4 sm:$0xff]   ;;  %v12148_v27 = vld [vmem:[#allocation5 + $0xf50] ss:$20 sps:$4 sm:$0xff]  }
 0x2b0   : > { %v12189_v25 = vld [vmem:[#allocation5 + $0xf38] ss:$20 sps:$4 sm:$0xff]  }
 0x2b2   : > { %4922 = vmatpush1.bf16.msra.mxu0 %v12058_v1  ;;  %5078 = vmatpush1.bf16.msra.mxu1 %v12061_v2  ;;  %v12139_v1 = vld [vmem:[#allocation5 + $0x1048] ss:$20 sps:$4 sm:$0xff]   ;;  %v12144_v2 = vld [vmem:[#allocation5 + $0xf2c] ss:$20 sps:$4 sm:$0xff]  }
 0x2b3   : > { %4923 = vmatprep.subr.bf16.mxu0 %v12066_v30  ;;  %5079 = vmatprep.subr.bf16.mxu1 %v12069_v31  ;;  %v12147_v30 = vld [vmem:[#allocation5 + $0x1074] ss:$20 sps:$4 sm:$0xff]   ;;  %v13800_v31 = vsel %vm3940_vm3, %v3947_v26, %v3948_v28  ;;  %v12220_v26 = vld [vmem:[#allocation10 + $0x480] ss:$16 sps:$4 sm:$0xff]   ;;  %v12228_v28 = vld [vmem:[#allocation10 + $0x4a4] ss:$16 sps:$4 sm:$0xff]  }
 0x2b6   : > { %4924 = vmatpush1.bf16.msra.mxu0 %v12064_v32  ;;  %5080 = vmatpush1.bf16.msra.mxu1 %v12067_v33  ;;  %v12142_v32 = vld [vmem:[#allocation5 + $0xf28] ss:$20 sps:$4 sm:$0xff]   ;;  %v12145_v33 = vld [vmem:[#allocation5 + $0x1070] ss:$20 sps:$4 sm:$0xff]  }
 0x2b7   : > { %4925 = vmatprep.subr.bf16.mxu0 %v12072_v34  ;;  %5081 = vmatprep.subr.bf16.mxu1 %v12075_v35  ;;  %v12150_v34 = vld [vmem:[#allocation5 + $0xf54] ss:$20 sps:$4 sm:$0xff]   ;;  %v12153_v35 = vld [vmem:[#allocation5 + $0x109c] ss:$20 sps:$4 sm:$0xff]  }
 0x2ba   : > { %4926 = vmatpush1.bf16.msra.mxu0 %v12070_v36  ;;  %5082 = vmatpush1.bf16.msra.mxu1 %v12073_v37  ;;  %v12151_v36 = vld [vmem:[#allocation5 + $0x1098] ss:$20 sps:$4 sm:$0xff]   ;;  %v12156_v37 = vld [vmem:[#allocation5 + $0xf7c] ss:$20 sps:$4 sm:$0xff]  }
 0x2bb   : > { %4927 = vmatprep.subr.bf16.mxu0 %v12078_v38  ;;  %5083 = vmatprep.subr.bf16.mxu1 %v12081_v39  ;;  %v12159_v38 = vld [vmem:[#allocation5 + $0x10c4] ss:$20 sps:$4 sm:$0xff]  }
 0x2bc   : > { %v12154_v39 = vld [vmem:[#allocation5 + $0xf78] ss:$20 sps:$4 sm:$0xff]  }
 0x2be   : > { %4928 = vmatpush1.bf16.msra.mxu0 %v12076_v19  ;;  %5084 = vmatpush1.bf16.msra.mxu1 %v12079_v40  ;;  %v12157_v19 = vld [vmem:[#allocation5 + $0x10c0] ss:$20 sps:$4 sm:$0xff]   ;;  %v12162_v40 = vld [vmem:[#allocation5 + $0xfa4] ss:$20 sps:$4 sm:$0xff]  }
 0x2bf   : > { %4929 = vmatprep.subr.bf16.mxu0 %v12084_v41  ;;  %5085 = vmatprep.subr.bf16.mxu1 %v12087_v42  ;;  %v12184_v41 = vld [vmem:[#allocation5 + $0xc90] ss:$20 sps:$4 sm:$0xff]  }
 0x2c0   : > { %v12893_v42 = vld [vmem:[%s13663_s30 + $0x10] ss:$20 sps:$4 sm:$0xff]  }
 0x2c2   : > { %4930 = vmatpush1.bf16.msra.mxu0 %v12082_v45  ;;  %5086 = vmatpush1.bf16.msra.mxu1 %v12085_v47  ;;  %v3953_v45 = vrot.slane %v12893_v42, 1  ;;  %v12894_v47 = vld [vmem:[%s13663_s30 + $0x38] ss:$0 sps:$4 sm:$0x11]   ;;  %v12213_v42 = vld [vmem:[#allocation5 + $0x1028] ss:$20 sps:$4 sm:$0xff]  }
 0x2c3   : > { %4942 = vmatprep.subr.bf16.mxu0 %v12090_v48  ;;  %5087 = vmatprep.subr.bf16.mxu1 %v12093_v49  ;;  %v3954_v48 = vrot.slane %v12894_v47, 1  ;;  %v12160_v49 = vld [vmem:[#allocation5 + $0xfa0] ss:$20 sps:$4 sm:$0xff]   ;;  %v12216_v47 = vld [vmem:[#allocation5 + $0x1050] ss:$20 sps:$4 sm:$0xff]   ;;  %s13255_s30 = smov [#allocation17]  }
 0x2c4   : > { %s13153_s0 = sshll.u32 %s13255_s30, 4  ;;  %s13154_s0 = int_to_ptr.vmem [resolvable:$false] %s13153_s0 }
 0x2c5   : > { %4932 = vmatmul.mubr.bf16.vlgmr.msra.gmra.mrb[0].mxu0 %v13788_v18  ;;  %s13155_s12 = scalar_lea.vmem %s13154_s0, 2048  ;;  %p13156_p8 = scmp.lt.s32.totalorder %s14286_s16, %s13154_s0 }
 0x2c6   : > { %4943 = vmatpush1.bf16.msra.mxu0 %v12088_v53  ;;  %5088 = vmatpush1.bf16.msra.mxu1 %v12091_v59  ;;  %v12186_v53 = vld [vmem:[#allocation5 + $0xb50] ss:$20 sps:$4 sm:$0xff]   ;;  %v12165_v59 = vld [vmem:[#allocation5 + $0xfcc] ss:$20 sps:$4 sm:$0xff]   ;;  %p13157_p4 = scmp.lt.s32.totalorder %s13155_s12, %s13149_s13 }
 0x2c7   : > { %4944 = vmatprep.subr.bf16.mxu0 %v12096_v22  ;;  %5089 = vmatprep.subr.bf16.mxu1 %v12099_v54  ;;  %v12188_v22 = vld [vmem:[#allocation5 + $0xcb8] ss:$20 sps:$4 sm:$0xff]   ;;  %v13807_v54 = vsel %vm3940_vm3, %v3953_v45, %v3954_v48  ;;  %v12215_v45 = vld [vmem:[#allocation5 + $0xee8] ss:$20 sps:$4 sm:$0xff]  }
 0x2c8   : > { %4974 = vmatprep.mubr.bf16.mxu0 %v13792_v4  ;;  %v12217_v48 = vld [vmem:[#allocation5 + $0x1078] ss:$20 sps:$4 sm:$0xff]   ;;  %p13158_p10 = por %p13157_p4, %p13156_p8 }
 0x2ca   : > { %4945 = vmatpush1.bf16.msra.mxu0 %v12094_v55  ;;  %5090 = vmatpush1.bf16.msra.mxu1 %v12097_v56  ;;  %v12163_v55 = vld [vmem:[#allocation5 + $0xfc8] ss:$20 sps:$4 sm:$0xff]   ;;  %v12190_v56 = vld [vmem:[#allocation5 + $0xb78] ss:$20 sps:$4 sm:$0xff]   ;;  %p13159_p11 = pnand %p13158_p10, %p13152_p2 }
 0x2cb   : > { %4946 = vmatprep.subr.bf16.mxu0 %v12102_v60  ;;  %5091 = vmatprep.subr.bf16.mxu1 %v12105_v61  ;;  %v12168_v60 = vld [vmem:[#allocation5 + $0xff4] ss:$20 sps:$4 sm:$0xff]  }
 0x2cc   : > { %v12192_v61 = vld [vmem:[#allocation5 + $0xce0] ss:$20 sps:$4 sm:$0xff]  }
 0x2ce   : > { %4947 = vmatpush1.bf16.msra.mxu0 %v12100_v51  ;;  %5092 = vmatpush1.bf16.msra.mxu1 %v12103_v62  ;;  %v12166_v51 = vld [vmem:[#allocation5 + $0xff0] ss:$20 sps:$4 sm:$0xff]   ;;  %v12194_v62 = vld [vmem:[#allocation5 + $0xba0] ss:$20 sps:$4 sm:$0xff]  }
 0x2cf   : > { %4948 = vmatprep.subr.bf16.mxu0 %v12108_v0  ;;  %5093 = vmatprep.subr.bf16.mxu1 %v12111_v3  ;;  %v12171_v0 = vld [vmem:[#allocation5 + $0x101c] ss:$20 sps:$4 sm:$0xff]  }
 0x2d0   : > { %v12196_v3 = vld [vmem:[#allocation5 + $0xd08] ss:$20 sps:$4 sm:$0xff]  }
 0x2d2   : > { %4949 = vmatpush1.bf16.msra.mxu0 %v12106_v46  ;;  %5094 = vmatpush1.bf16.msra.mxu1 %v12109_v5  ;;  %v12169_v46 = vld [vmem:[#allocation5 + $0x1018] ss:$20 sps:$4 sm:$0xff]   ;;  %v12198_v5 = vld [vmem:[#allocation5 + $0xbc8] ss:$20 sps:$4 sm:$0xff]  }
 0x2d3   : > { %4950 = vmatprep.subr.bf16.mxu0 %v12114_v6  ;;  %5095 = vmatprep.subr.bf16.mxu1 %v12117_v7  ;;  %v12174_v6 = vld [vmem:[#allocation5 + $0x1044] ss:$20 sps:$4 sm:$0xff]  }
 0x2d4   : > { %v12200_v7 = vld [vmem:[#allocation5 + $0xd30] ss:$20 sps:$4 sm:$0xff]  }
 0x2d6   : > { %4951 = vmatpush1.bf16.msra.mxu0 %v12112_v8  ;;  %5096 = vmatpush1.bf16.msra.mxu1 %v12115_v9  ;;  %v12172_v8 = vld [vmem:[#allocation5 + $0x1040] ss:$20 sps:$4 sm:$0xff]  }
 0x2d7   : > { %4952 = vmatprep.subr.bf16.mxu0 %v12120_v10  ;;  %5097 = vmatprep.subr.bf16.mxu1 %v12123_v11  ;;  %v12177_v9 = vld [vmem:[#allocation5 + $0x106c] ss:$20 sps:$4 sm:$0xff]   ;;  %v12202_v10 = vld [vmem:[#allocation5 + $0xbf0] ss:$20 sps:$4 sm:$0xff]   ;;  %v12175_v11 = vld [vmem:[#allocation5 + $0x1068] ss:$20 sps:$4 sm:$0xff]  }
 0x2da   : > { %4953 = vmatpush1.bf16.msra.mxu0 %v12118_v12  ;;  %5098 = vmatpush1.bf16.msra.mxu1 %v12121_v13  ;;  %v12180_v12 = vld [vmem:[#allocation5 + $0x1094] ss:$20 sps:$4 sm:$0xff]   ;;  %v12206_v13 = vld [vmem:[#allocation5 + $0xc18] ss:$20 sps:$4 sm:$0xff]  }
 0x2db   : > { %4954 = vmatprep.subr.bf16.mxu0 %v12126_v14  ;;  %5099 = vmatprep.subr.bf16.mxu1 %v12129_v15  ;;  %v12208_v14 = vld [vmem:[#allocation5 + $0xd80] ss:$20 sps:$4 sm:$0xff]   ;;  %v12178_v15 = vld [vmem:[#allocation5 + $0x1090] ss:$20 sps:$4 sm:$0xff]  }
 0x2de   : > { %4955 = vmatpush1.bf16.msra.mxu0 %v12124_v16  ;;  %5100 = vmatpush1.bf16.msra.mxu1 %v12127_v17  ;;  %v12183_v16 = vld [vmem:[#allocation5 + $0x10bc] ss:$20 sps:$4 sm:$0xff]   ;;  %v12210_v17 = vld [vmem:[#allocation5 + $0xc40] ss:$20 sps:$4 sm:$0xff]  }
 0x2df   : > { %4956 = vmatprep.subr.bf16.mxu0 %v12132_v63  ;;  %5101 = vmatprep.subr.bf16.mxu1 %v12135_v20  ;;  %v12212_v63 = vld [vmem:[#allocation5 + $0xda8] ss:$20 sps:$4 sm:$0xff]   ;;  %v12181_v20 = vld [vmem:[#allocation5 + $0x10b8] ss:$20 sps:$4 sm:$0xff]  }
 0x2e2   : > { %4957 = vmatpush1.bf16.msra.mxu0 %v12130_v21  ;;  %5102 = vmatpush1.bf16.msra.mxu1 %v12133_v52  ;;  %v12185_v21 = vld [vmem:[#allocation5 + $0xf10] ss:$20 sps:$4 sm:$0xff]   ;;  %v12214_v52 = vld [vmem:[#allocation5 + $0xc68] ss:$20 sps:$4 sm:$0xff]  }
 0x2e3   : > { %4958 = vmatprep.subr.bf16.mxu0 %v12138_v23  ;;  %5114 = vmatprep.subr.bf16.mxu1 %v12141_v24  ;;  %v12222_v23 = vld [vmem:[#allocation10 + $0x484] ss:$16 sps:$4 sm:$0xff]  }
 0x2e4   : > { %v12187_v24 = vld [vmem:[#allocation5 + $0xdd0] ss:$20 sps:$4 sm:$0xff]  }
 0x2e5   : > { %5104 = vmatmul.mubr.bf16.vlgmr.msra.gmra.mrb[0].mxu1 %v13800_v31 }
 0x2e6   : > { %4959 = vmatpush1.bf16.msra.mxu0 %v12136_v29  ;;  %5115 = vmatpush1.bf16.msra.mxu1 %v12139_v1  ;;  %v12191_v29 = vld [vmem:[#allocation5 + $0xdf8] ss:$20 sps:$4 sm:$0xff]   ;;  %v12193_v1 = vld [vmem:[#allocation5 + $0xf60] ss:$20 sps:$4 sm:$0xff]  }
 0x2e7   : > { %4960 = vmatprep.subr.bf16.mxu0 %v12144_v2  ;;  %5116 = vmatprep.subr.bf16.mxu1 %v12147_v30  ;;  %v12226_v2 = vld [vmem:[#allocation10 + $0x4a0] ss:$16 sps:$4 sm:$0xff]   ;;  %v12234_v30 = vld [vmem:[#allocation10 + $0x4c4] ss:$16 sps:$4 sm:$0xff]  }
 0x2e8   : > { %5146 = vmatprep.mubr.bf16.mxu1 %v13250_v58 }
 0x2ea   : > { %4961 = vmatpush1.bf16.msra.mxu0 %v12142_v32  ;;  %5117 = vmatpush1.bf16.msra.mxu1 %v12145_v33  ;;  %v12195_v32 = vld [vmem:[#allocation5 + $0xe20] ss:$20 sps:$4 sm:$0xff]   ;;  %v12197_v33 = vld [vmem:[#allocation5 + $0xf88] ss:$20 sps:$4 sm:$0xff]  }
 0x2eb   : > { %4962 = vmatprep.subr.bf16.mxu0 %v12150_v34  ;;  %5118 = vmatprep.subr.bf16.mxu1 %v12153_v35  ;;  %v12232_v34 = vld [vmem:[#allocation10 + $0x4c0] ss:$16 sps:$4 sm:$0xff]   ;;  %v12240_v35 = vld [vmem:[#allocation10 + $0x4e4] ss:$16 sps:$4 sm:$0xff]  }
 0x2ee   : > { %4963 = vmatpush1.bf16.msra.mxu0 %v12148_v27  ;;  %5119 = vmatpush1.bf16.msra.mxu1 %v12151_v36  ;;  %v12199_v27 = vld [vmem:[#allocation5 + $0xe48] ss:$20 sps:$4 sm:$0xff]   ;;  %v12201_v36 = vld [vmem:[#allocation5 + $0xfb0] ss:$20 sps:$4 sm:$0xff]  }
 0x2ef   : > { %4964 = vmatprep.subr.bf16.mxu0 %v12156_v37  ;;  %5120 = vmatprep.subr.bf16.mxu1 %v12159_v38  ;;  %v12238_v37 = vld [vmem:[#allocation10 + $0x4e0] ss:$16 sps:$4 sm:$0xff]   ;;  %v12203_v38 = vld [vmem:[#allocation5 + $0xe70] ss:$20 sps:$4 sm:$0xff]  }
 0x2f2   : > { %4965 = vmatpush1.bf16.msra.mxu0 %v12154_v39  ;;  %5121 = vmatpush1.bf16.msra.mxu1 %v12157_v19  ;;  %v12244_v39 = vld [vmem:[#allocation10 + $0x500] ss:$16 sps:$4 sm:$0xff]  }
 0x2f3   : > { %4966 = vmatprep.subr.bf16.mxu0 %v12162_v40  ;;  %10854 = vmatprep.subr.bf16.mxu1 %v12184_v41  ;;  %v12207_v19 = vld [vmem:[#allocation5 + $0xe98] ss:$20 sps:$4 sm:$0xff]   ;;  %v12209_v40 = vld [vmem:[#allocation5 + $0x1000] ss:$20 sps:$4 sm:$0xff]  }
 0x2f4   : > { %v12211_v41 = vld [vmem:[#allocation5 + $0xec0] ss:$20 sps:$4 sm:$0xff]  }
 0x2f5   : > { %10248 = vmatmul.mubr.msk.bf16.vlgmr.msra.gmra.mrb[0].mxu1 %vm2015_vm1, %v13807_v54 }
 0x2f6   : > { %4967 = vmatpush1.bf16.msra.mxu0 %v12160_v49  ;;  %10855 = vmatpush3.bf16.msra.mxu1 %v12186_v53 }
 0x2f7   : > { %4968 = vmatprep.subr.bf16.mxu0 %v12165_v59  ;;  %10856 = vmatprep.subr.bf16.mxu1 %v12188_v22 }
 0x2f8   : > { %5189 = vmatprep.mubr.bf16.mxu1 %v13766_v57  ;;  %v12204_v57 = vld [vmem:[#allocation5 + $0xd58] ss:$20 sps:$4 sm:$0xff]  }
 0x2fa   : > { %4969 = vmatpush1.bf16.msra.mxu0 %v12163_v55  ;;  %10857 = vmatpush3.bf16.msra.mxu1 %v12190_v56  ;;  %v12218_v55 = vld [vmem:[#allocation5 + $0x10a0] ss:$20 sps:$4 sm:$0xff]  }
 0x2fb   : > { %4970 = vmatprep.subr.bf16.mxu0 %v12168_v60  ;;  %10858 = vmatprep.subr.bf16.mxu1 %v12192_v61 }
 0x2fe   : > { %4971 = vmatpush1.bf16.msra.mxu0 %v12166_v51  ;;  %10859 = vmatpush3.bf16.msra.mxu1 %v12194_v62  ;;  %v12219_v51 = vld [vmem:[#allocation5 + $0x10c8] ss:$20 sps:$4 sm:$0xff]  }
 0x2ff   : > { %4972 = vmatprep.subr.bf16.mxu0 %v12171_v0  ;;  %10860 = vmatprep.subr.bf16.mxu1 %v12196_v3  ;;  %v12225_v62 = vld [vmem:[#allocation10 + $0x48c] ss:$16 sps:$4 sm:$0xff]   ;;  %v12223_v0 = vld [vmem:[#allocation10 + $0x488] ss:$16 sps:$4 sm:$0xff]  }
 0x300   : > { %v12231_v3 = vld [vmem:[#allocation10 + $0x4ac] ss:$16 sps:$4 sm:$0xff]  }
 0x302   : > { %4973 = vmatpush1.bf16.msra.mxu0 %v12169_v46  ;;  %10861 = vmatpush3.bf16.msra.mxu1 %v12198_v5  ;;  %v12229_v46 = vld [vmem:[#allocation10 + $0x4a8] ss:$16 sps:$4 sm:$0xff]   ;;  %v12252_v5 = vld [vmem:[#allocation10 + $0x524] ss:$16 sps:$4 sm:$0xff]  }
 0x303   : > { %4985 = vmatprep.subr.bf16.mxu0 %v12174_v6  ;;  %10862 = vmatprep.subr.bf16.mxu1 %v12200_v7  ;;  %v12250_v6 = vld [vmem:[#allocation10 + $0x520] ss:$16 sps:$4 sm:$0xff]  }
 0x305   : > { %4975 = vmatmul.mubr.bf16.vlgmr.msra.gmra.mrb[0].mxu0 %v13800_v31 }
 0x306   : > { %4986 = vmatpush1.bf16.msra.mxu0 %v12172_v8  ;;  %5017 = vmatprep.mubr.bf16.mxu0 %v13250_v58 }
 0x307   : > { %4987 = vmatprep.subr.bf16.mxu0 %v12177_v9  ;;  %10863 = vmatpush3.bf16.msra.mxu1 %v12202_v10  ;;  %v12235_v10 = vld [vmem:[#allocation10 + $0x4c8] ss:$16 sps:$4 sm:$0xff]  }
 0x308   : > { %10864 = vmatprep.subr.bf16.mxu1 %v12204_v57  ;;  %v12258_v57 = vld [vmem:[#allocation10 + $0x544] ss:$16 sps:$4 sm:$0xff]  }
 0x30a   : > { %4988 = vmatpush1.bf16.msra.mxu0 %v12175_v11 }
 0x30b   : > { %4989 = vmatprep.subr.bf16.mxu0 %v12180_v12  ;;  %10865 = vmatpush3.bf16.msra.mxu1 %v12206_v13  ;;  %v12243_v12 = vld [vmem:[#allocation10 + $0x4ec] ss:$16 sps:$4 sm:$0xff]   ;;  %v12256_v13 = vld [vmem:[#allocation10 + $0x540] ss:$16 sps:$4 sm:$0xff]  }
 0x30c   : > { %10866 = vmatprep.subr.bf16.mxu1 %v12208_v14 }
 0x30e   : > { %4990 = vmatpush1.bf16.msra.mxu0 %v12178_v15 }
 0x30f   : > { %4991 = vmatprep.subr.bf16.mxu0 %v12183_v16  ;;  %10867 = vmatpush3.bf16.msra.mxu1 %v12210_v17  ;;  %v12241_v16 = vld [vmem:[#allocation10 + $0x4e8] ss:$16 sps:$4 sm:$0xff]   ;;  %v12264_v17 = vld [vmem:[#allocation10 + $0x564] ss:$16 sps:$4 sm:$0xff]  }
 0x310   : > { %10868 = vmatprep.subr.bf16.mxu1 %v12212_v63  ;;  %v12249_v63 = vld [vmem:[#allocation10 + $0x50c] ss:$16 sps:$4 sm:$0xff]  }
 0x312   : > { %4992 = vmatpush1.bf16.msra.mxu0 %v12181_v20  ;;  %v12262_v20 = vld [vmem:[#allocation10 + $0x560] ss:$16 sps:$4 sm:$0xff]  }
 0x313   : > { %10876 = vmatprep.subr.bf16.mxu0 %v12185_v21  ;;  %10869 = vmatpush3.bf16.msra.mxu1 %v12214_v52  ;;  %v12247_v21 = vld [vmem:[#allocation10 + $0x508] ss:$16 sps:$4 sm:$0xff]   ;;  %v12270_v52 = vld [vmem:[#allocation10 + $0x584] ss:$16 sps:$4 sm:$0xff]  }
 0x314   : > { %6466 = vmatprep.subr.bf16.mxu1 %v12222_v23  ;;  %v12255_v23 = vld [vmem:[#allocation10 + $0x52c] ss:$16 sps:$4 sm:$0xff]  }
 0x315   : > { %10247 = vmatmul.mubr.msk.bf16.vlgmr.msra.gmra.mrb[0].mxu0 %vm2015_vm1, %v13807_v54 }
 0x316   : > { %10877 = vmatpush3.bf16.msra.mxu0 %v12187_v24  ;;  %5230 = vmatprep.mubr.bf16.mxu0 %v13792_v4  ;;  %v12246_v4 = vld [vmem:[#allocation10 + $0x504] ss:$16 sps:$4 sm:$0xff]   ;;  %v12268_v24 = vld [vmem:[#allocation10 + $0x580] ss:$16 sps:$4 sm:$0xff]  }
 0x317   : > { %10878 = vmatprep.subr.bf16.mxu0 %v12189_v25  ;;  %5190 = vmatmul.mubr.bf16.vlgmr.msra.gmra.mrb[12].mxu1 %v13788_v18  ;;  %v12205_v18 = vld [vmem:[#allocation5 + $0xfd8] ss:$20 sps:$4 sm:$0xff]   ;;  %v12276_v25 = vld [vmem:[#allocation10 + $0x5a4] ss:$16 sps:$4 sm:$0xff]  }
 0x318   : > { %6467 = vmatpush1.bf16.msra.mxu1 %v12220_v26  ;;  %v12274_v26 = vld [vmem:[#allocation10 + $0x5a0] ss:$16 sps:$4 sm:$0xff]  }
 0x319   : > { %6468 = vmatprep.subr.bf16.mxu1 %v12228_v28  ;;  %v12253_v28 = vld [vmem:[#allocation10 + $0x528] ss:$16 sps:$4 sm:$0xff]  }
 0x31a   : > { %10879 = vmatpush3.bf16.msra.mxu0 %v12191_v29  ;;  %v12282_v29 = vld [vmem:[#allocation10 + $0x5c4] ss:$16 sps:$4 sm:$0xff]  }
 0x31b   : > { %10880 = vmatprep.subr.bf16.mxu0 %v12193_v1  ;;  %v12261_v1 = vld [vmem:[#allocation10 + $0x54c] ss:$16 sps:$4 sm:$0xff]  }
 0x31c   : > { %6469 = vmatpush1.bf16.msra.mxu1 %v12226_v2  ;;  %v12280_v2 = vld [vmem:[#allocation10 + $0x5c0] ss:$16 sps:$4 sm:$0xff]  }
 0x31d   : > { %6470 = vmatprep.subr.bf16.mxu1 %v12234_v30  ;;  %v12259_v30 = vld [vmem:[#allocation10 + $0x548] ss:$16 sps:$4 sm:$0xff]  }
 0x31e   : > { %10881 = vmatpush3.bf16.msra.mxu0 %v12195_v32  ;;  %v12288_v32 = vld [vmem:[#allocation10 + $0x5e4] ss:$16 sps:$4 sm:$0xff]  }
 0x31f   : > { %10882 = vmatprep.subr.bf16.mxu0 %v12197_v33  ;;  %v12267_v33 = vld [vmem:[#allocation10 + $0x56c] ss:$16 sps:$4 sm:$0xff]  }
 0x320   : > { %6471 = vmatpush1.bf16.msra.mxu1 %v12232_v34  ;;  %v12286_v34 = vld [vmem:[#allocation10 + $0x5e0] ss:$16 sps:$4 sm:$0xff]  }
 0x321   : > { %6472 = vmatprep.subr.bf16.mxu1 %v12240_v35  ;;  %v12265_v35 = vld [vmem:[#allocation10 + $0x568] ss:$16 sps:$4 sm:$0xff]  }
 0x322   : > { %10883 = vmatpush3.bf16.msra.mxu0 %v12199_v27  ;;  %v12294_v27 = vld [vmem:[#allocation10 + $0x604] ss:$16 sps:$4 sm:$0xff]  }
 0x323   : > { %10884 = vmatprep.subr.bf16.mxu0 %v12201_v36  ;;  %v12273_v36 = vld [vmem:[#allocation10 + $0x58c] ss:$16 sps:$4 sm:$0xff]  }
 0x324   : > { %6473 = vmatpush1.bf16.msra.mxu1 %v12238_v37  ;;  %v12292_v37 = vld [vmem:[#allocation10 + $0x600] ss:$16 sps:$4 sm:$0xff]  }
 0x325   : > { %6474 = vmatprep.subr.bf16.mxu1 %v12246_v4  ;;  %v12271_v4 = vld [vmem:[#allocation10 + $0x588] ss:$16 sps:$4 sm:$0xff]  }
 0x326   : > { %10885 = vmatpush3.bf16.msra.mxu0 %v12203_v38  ;;  %v12279_v38 = vld [vmem:[#allocation10 + $0x5ac] ss:$16 sps:$4 sm:$0xff]  }
 0x327   : > { %10886 = vmatprep.subr.bf16.mxu0 %v12205_v18  ;;  %v12277_v18 = vld [vmem:[#allocation10 + $0x5a8] ss:$16 sps:$4 sm:$0xff]  }
 0x328   : > { %6475 = vmatpush1.bf16.msra.mxu1 %v12244_v39  ;;  %v12300_v39 = vld [vmem:[#allocation10 + $0x624] ss:$16 sps:$4 sm:$0xff]  }
 0x329   : > { %6476 = vmatprep.subr.bf16.mxu1 %v12252_v5 }
 0x32a   : > { %10887 = vmatpush3.bf16.msra.mxu0 %v12207_v19  ;;  %v12285_v19 = vld [vmem:[#allocation10 + $0x5cc] ss:$16 sps:$4 sm:$0xff]  }
 0x32b   : > { %10888 = vmatprep.subr.bf16.mxu0 %v12209_v40  ;;  %v12298_v40 = vld [vmem:[#allocation10 + $0x620] ss:$16 sps:$4 sm:$0xff]  }
 0x32c   : > { %6477 = vmatpush1.bf16.msra.mxu1 %v12250_v6 }
 0x32d   : > { %6478 = vmatprep.subr.bf16.mxu1 %v12258_v57 }
 0x32e   : > { %10889 = vmatpush3.bf16.msra.mxu0 %v12211_v41  ;;  %v12283_v41 = vld [vmem:[#allocation10 + $0x5c8] ss:$16 sps:$4 sm:$0xff]  }
 0x32f   : > { %10890 = vmatprep.subr.bf16.mxu0 %v12213_v42  ;;  %v12306_v42 = vld [vmem:[#allocation10 + $0x644] ss:$16 sps:$4 sm:$0xff]  }
 0x330   : > { %6479 = vmatpush1.bf16.msra.mxu1 %v12256_v13 }
 0x331   : > { %6480 = vmatprep.subr.bf16.mxu1 %v12264_v17 }
 0x332   : > { %10891 = vmatpush3.bf16.msra.mxu0 %v12215_v45  ;;  %v12291_v45 = vld [vmem:[#allocation10 + $0x5ec] ss:$16 sps:$4 sm:$0xff]  }
 0x333   : > { %11008 = vmatprep.subr.bf16.mxu0 %v13251_v44 }
 0x334   : > { %6481 = vmatpush1.bf16.msra.mxu1 %v12262_v20 }
 0x335   : > { %5231 = vmatmul.mubr.bf16.vlgmr.msra.gmra.mrb[16].mxu0 %v13800_v31  ;;  %6482 = vmatprep.subr.bf16.mxu1 %v12270_v52 }
 0x336   : > { %11009 = vmatpush3.bf16.msra.mxu0 %v12216_v47  ;;  %11016 = vmatprep.mubr.msk.bf16.mxu0 %vm13252_vm2, %v13251_v44  ;;  %v12304_v47 = vld [vmem:[#allocation10 + $0x640] ss:$16 sps:$4 sm:$0xff]  }
 0x337   : > { %11010 = vmatprep.subr.bf16.mxu0 %v13251_v44 }
 0x338   : > { %v10821_v49 = vpop.f32.mrb[8].mxu1  ;;  %6483 = vmatpush1.bf16.msra.mxu1 %v12268_v24 }
 0x339   : > { %v10822_v53 = vpop.f32.mrb[9].mxu1  ;;  %6484 = vmatprep.subr.bf16.mxu1 %v12276_v25 }
 0x33a   : > { %v10823_v59 = vadd.f32 %v10822_v53, %v10821_v49  ;;  %v10824_v22 = vpop.f32.mrb[10].mxu1  ;;  %11011 = vmatpush3.bf16.msra.mxu0 %v12217_v48  ;;  %v12289_v48 = vld [vmem:[#allocation10 + $0x5e8] ss:$16 sps:$4 sm:$0xff]   ;;  %v12312_v49 = vld [vmem:[#allocation10 + $0x664] ss:$16 sps:$4 sm:$0xff]  }
 0x33b   : > { %v10825_v56 = vpop.f32.mrb[11].mxu1  ;;  %11012 = vmatprep.subr.bf16.mxu0 %v13251_v44  ;;  %v12297_v53 = vld [vmem:[#allocation10 + $0x60c] ss:$16 sps:$4 sm:$0xff]  }
 0x33c   : > { %v11165_v60 = vadd.f32 %v10823_v59, %v13779_v43  ;;  %v10826_v61 = vadd.f32 %v10825_v56, %v10824_v22  ;;  %v12237_v43 = vld [vmem:[#allocation10 + $0x4cc] ss:$16 sps:$4 sm:$0xff]   ;;  %6485 = vmatpush1.bf16.msra.mxu1 %v12274_v26  ;;  %v12310_v59 = vld [vmem:[#allocation10 + $0x660] ss:$16 sps:$4 sm:$0xff]   ;;  %v12295_v22 = vld [vmem:[#allocation10 + $0x608] ss:$16 sps:$4 sm:$0xff]  }
 0x33d   : > { %6486 = vmatprep.subr.bf16.mxu1 %v12282_v29  ;;  %v12303_v56 = vld [vmem:[#allocation10 + $0x62c] ss:$16 sps:$4 sm:$0xff]  }
 0x33e   : > { %v11169_v31 = vadd.f32 %v10826_v61, %v13781_v50  ;;  %11013 = vmatpush3.bf16.msra.mxu0 %v12218_v55  ;;  %v12318_v55 = vld [vmem:[#allocation10 + $0x684] ss:$16 sps:$4 sm:$0xff]   ;;  %v12309_v61 = vld [vmem:[#allocation10 + $0x64c] ss:$16 sps:$4 sm:$0xff]  }
 0x33f   : > { %11014 = vmatprep.subr.bf16.mxu0 %v13251_v44 }
 0x340   : > { %6487 = vmatpush1.bf16.msra.mxu1 %v12280_v2 }
 0x341   : > { %6488 = vmatprep.subr.bf16.mxu1 %v12288_v32 }
 0x342   : > { %11015 = vmatpush3.bf16.msra.mxu0 %v12219_v51  ;;  %v12315_v51 = vld [vmem:[#allocation10 + $0x66c] ss:$16 sps:$4 sm:$0xff]  }
 0x343   : > { %6595 = vmatprep.subr.bf16.mxu0 %v12225_v62  ;;  %v12313_v62 = vld [vmem:[#allocation10 + $0x668] ss:$16 sps:$4 sm:$0xff]  }
 0x344   : > { %6489 = vmatpush1.bf16.msra.mxu1 %v12286_v34 }
 0x345   : > { %11017 = vmatmul.mubr.msk.bf16.vlgmr.msra.gmra.mrb[8].mxu0 %vm2015_vm1, %v13807_v54  ;;  %6490 = vmatprep.subr.bf16.mxu1 %v12294_v27 }
 0x346   : > { %6596 = vmatpush1.bf16.msra.mxu0 %v12223_v0  ;;  %v12321_v0 = vld [vmem:[#allocation10 + $0x68c] ss:$16 sps:$4 sm:$0xff]  }
 0x347   : > { %6597 = vmatprep.subr.bf16.mxu0 %v12231_v3  ;;  %v5291_v3 = vlaneseq }
 0x348   : > { %v10843_v7 = vpop.f32.mrb[12].mxu0  ;;  %6491 = vmatpush1.bf16.msra.mxu1 %v12292_v37 }
 0x349   : > { %v10844_v50 = vpop.f32.mrb[13].mxu0  ;;  %6492 = vmatprep.subr.bf16.mxu1 %v12300_v39 }
 0x34a   : > { %v10845_v8 = vadd.f32 %v10844_v50, %v10843_v7  ;;  %v10846_v9 = vpop.f32.mrb[14].mxu0  ;;  %6598 = vmatpush1.bf16.msra.mxu0 %v12229_v46  ;;  %v13833_v46 = vshrl.u32 %v5291_v3, 7  ;;  %v13843_v7 = vld [vmem:[#allocation8] sm:$0x1f] }
 0x34b   : > { %v10847_v11 = vpop.f32.mrb[15].mxu0  ;;  %6599 = vmatprep.subr.bf16.mxu0 %v12237_v43  ;;  %v13838_v43 = vld [vmem:[#allocation7] sm:$0x1f] }
 0x34c   : > { %v13829_v54 = vadd.f32 %v11165_v60, %v10845_v8  ;;  %v10848_v14 = vadd.f32 %v10847_v11, %v10846_v9  ;;  %6493 = vmatpush1.bf16.msra.mxu1 %v12298_v40  ;;  %v12301_v60 = vld [vmem:[#allocation10 + $0x628] ss:$16 sps:$4 sm:$0xff]   ;;  %v13836_v5 = vsub.s32 2, %v13833_v46  ;;  %v13841_v6 = vsub.s32 3, %v13833_v46 }
 0x34d   : > { %6494 = vmatprep.subr.bf16.mxu1 %v12306_v42  ;;  %v13870_v42 = vsub.s32 0, %v13833_v46 }
 0x34e   : > { %v13831_v15 = vadd.f32 %v11169_v31, %v10848_v14  ;;  %6600 = vmatpush1.bf16.msra.mxu0 %v12235_v10  ;;  %v12307_v31 = vld [vmem:[#allocation10 + $0x648] ss:$16 sps:$4 sm:$0xff]   ;;  %v5302_v50 = vrot.slane %v13838_v43, %v13836_v5  ;;  %v5306_v8 = vrot.slane %v13838_v43, %v13841_v6  ;;  %v5338_v9 = vrot.slane %v13843_v7, %v13836_v5 }
 0x34f   : > { %6601 = vmatprep.subr.bf16.mxu0 %v12243_v12  ;;  %v5342_v57 = vrot.slane %v13843_v7, %v13841_v6 }
 0x350   : > { %6495 = vmatpush1.bf16.msra.mxu1 %v12304_v47  ;;  %v5294_v47 = vrot.slane %v13838_v43, %v13870_v42 }
 0x351   : > { %6496 = vmatprep.subr.bf16.mxu1 %v12312_v49  ;;  %v5330_v49 = vrot.slane %v13843_v7, %v13870_v42 }
 0x352   : > { %6602 = vmatpush1.bf16.msra.mxu0 %v12241_v16 }
 0x353   : > { %6603 = vmatprep.subr.bf16.mxu0 %v12249_v63 }
 0x354   : > { %6497 = vmatpush1.bf16.msra.mxu1 %v12310_v59 }
 0x355   : > { %6509 = vmatprep.subr.bf16.mxu1 %v12318_v55 }
 0x356   : > { %6604 = vmatpush1.bf16.msra.mxu0 %v12247_v21 }
 0x357   : > { %6605 = vmatprep.subr.bf16.mxu0 %v12255_v23 }
 0x35a   : > { %6606 = vmatpush1.bf16.msra.mxu0 %v12253_v28 }
 0x35b   : > { %6607 = vmatprep.subr.bf16.mxu0 %v12261_v1 }
 0x35e   : > { %6608 = vmatpush1.bf16.msra.mxu0 %v12259_v30 }
 0x35f   : > { %6609 = vmatprep.subr.bf16.mxu0 %v12267_v33 }
 0x362   : > { %6610 = vmatpush1.bf16.msra.mxu0 %v12265_v35 }
 0x363   : > { %6611 = vmatprep.subr.bf16.mxu0 %v12273_v36 }
 0x366   : > { %6612 = vmatpush1.bf16.msra.mxu0 %v12271_v4 }
 0x367   : > { %6613 = vmatprep.subr.bf16.mxu0 %v12279_v38 }
 0x36a   : > { %6614 = vmatpush1.bf16.msra.mxu0 %v12277_v18 }
 0x36b   : > { %6615 = vmatprep.subr.bf16.mxu0 %v12285_v19 }
 0x36e   : > { %6616 = vmatpush1.bf16.msra.mxu0 %v12283_v41 }
 0x36f   : > { %6617 = vmatprep.subr.bf16.mxu0 %v12291_v45  ;;  %v13873_v45 = vsub.s32 1, %v13833_v46 }
 0x371   : > { %v5334_v59 = vrot.slane %v13843_v7, %v13873_v45 }
 0x372   : > { %6618 = vmatpush1.bf16.msra.mxu0 %v12289_v48  ;;  %v5298_v48 = vrot.slane %v13838_v43, %v13873_v45 }
 0x373   : > { %6619 = vmatprep.subr.bf16.mxu0 %v12297_v53 }
 0x376   : > { %6620 = vmatpush1.bf16.msra.mxu0 %v12295_v22 }
 0x377   : > { %6621 = vmatprep.subr.bf16.mxu0 %v12303_v56 }
 0x37a   : > { %6622 = vmatpush1.bf16.msra.mxu0 %v12301_v60 }
 0x37b   : > { %6623 = vmatprep.subr.bf16.mxu0 %v12309_v61 }
 0x37e   : > { %6624 = vmatpush1.bf16.msra.mxu0 %v12307_v31 }
 0x37f   : > { %6625 = vmatprep.subr.bf16.mxu0 %v12315_v51 }
 0x382   : > { %6626 = vmatpush1.bf16.msra.mxu0 %v12313_v62 }
 0x383   : > { %6638 = vmatprep.subr.bf16.mxu0 %v12321_v0 }
 0x3c8   : > { %v5148_v10 = vpop.f32.mrb[0].mxu1 }
 0x3c9   : > { %v5318_v11 = vmul.f32 %v5302_v50, %v5148_v10  ;;  %v5150_v12 = vpop.f32.mrb[1].mxu1 }
 0x3ca   : > { %v5319_v13 = vmul.f32 %v5306_v8, %v5150_v12  ;;  %v5152_v14 = vpop.f32.mrb[2].mxu1 }
 0x3cb   : > { %v5354_v16 = vadd.f32 %v5338_v9, %v5318_v11  ;;  %v5323_v17 = vmul.f32 %v5302_v50, %v5152_v14  ;;  %v5154_v63 = vpop.f32.mrb[3].mxu1 }
 0x3cc   : > { %v5355_v20 = vadd.f32 %v5342_v57, %v5319_v13  ;;  %v5324_v21 = vmul.f32 %v5306_v8, %v5154_v63 }
 0x3cd   : > { %v5364_v52 = vmax.f32 %v5354_v16, 0.0  ;;  %v5359_v23 = vadd.f32 %v5338_v9, %v5323_v17 }
 0x3ce   : > { %v5365_v24 = vmax.f32 %v5355_v20, 0.0  ;;  %v5360_v25 = vadd.f32 %v5342_v57, %v5324_v21 }
 0x3cf   : > { %v5369_v26 = vmax.f32 %v5359_v23, 0.0  ;;  %v5385_v28 = vrot.slane %v5364_v52, 7  ;;  %v5420_v29 = vrot.slane %v5364_v52, 1  ;;  %v12316_v23 = vld [vmem:[#allocation10 + $0x680] ss:$16 sps:$4 sm:$0xff]  }
 0x3d0   : > { %v5370_v1 = vmax.f32 %v5360_v25, 0.0  ;;  %v5386_v2 = vrot.slane %v5365_v24, 7  ;;  %v5423_v34 = vrot.slane %v5365_v24, 1 }
 0x3d1   : > { %v5392_v30 = vrot.slane %v5369_v26, 7  ;;  %v5421_v32 = vrot.slane %v5369_v26, 1  ;;  %v13853_v33 = vpack.c.bf16 %v5369_v26, %v5364_v52 }
 0x3d2   : > { %v5394_v35 = vrot.slane %v5370_v1, 7  ;;  %v5424_v27 = vrot.slane %v5370_v1, 1  ;;  %v13855_v36 = vpack.c.bf16 %v5370_v1, %v5365_v24  ;;  %v12319_v1 = vld [vmem:[#allocation10 + $0x688] ss:$16 sps:$4 sm:$0xff]  }
 0x3d3   : > { %v5393_v37 = vsel %vm5382_vm4, %v5385_v28, %v5392_v30  ;;  %v5422_v4 = vsel %vm3940_vm3, %v5420_v29, %v5421_v32 }
 0x3d4   : > { %v13859_v38 = vpack.c.bf16 %v5421_v32, %v5422_v4  ;;  %v5395_v18 = vsel %vm5382_vm4, %v5386_v2, %v5394_v35  ;;  %v13862_v39 = vpack.c.bf16 %v5393_v37, %v5385_v28  ;;  %v5425_v19 = vsel %vm3940_vm3, %v5423_v34, %v5424_v27  ;;  %v12324_v35 = vld [vmem:[#allocation10 + $0x6a4] ss:$16 sps:$4 sm:$0xff]  }
 0x3d5   : > { %v13865_v40 = vpack.c.bf16 %v5395_v18, %v5386_v2  ;;  %v13867_v41 = vpack.c.bf16 %v5424_v27, %v5425_v19  ;;  %v12327_v27 = vld [vmem:[#allocation10 + $0x6ac] ss:$16 sps:$4 sm:$0xff]  }
 0x3e8   : > { %v5019_v53 = vpop.f32.mrb[0].mxu0 }
 0x3e9   : > { %v5316_v22 = vmul.f32 %v5294_v47, %v5019_v53  ;;  %v5021_v55 = vpop.f32.mrb[1].mxu0  ;;  %v12330_v53 = vld [vmem:[#allocation10 + $0x6c4] ss:$16 sps:$4 sm:$0xff]  }
 0x3ea   : > { %v5317_v56 = vmul.f32 %v5298_v48, %v5021_v55  ;;  %v5023_v60 = vpop.f32.mrb[2].mxu0  ;;  %v10870_v61 = vpop.f32.mrb[12].mxu1  ;;  %v12331_v55 = vld [vmem:[#allocation10 + $0x6c8] ss:$16 sps:$4 sm:$0xff]  }
 0x3eb   : > { %v5352_v31 = vadd.f32 %v5330_v49, %v5316_v22  ;;  %v5321_v51 = vmul.f32 %v5294_v47, %v5023_v60  ;;  %v5025_v62 = vpop.f32.mrb[3].mxu0  ;;  %v10871_v0 = vpop.f32.mrb[13].mxu1  ;;  %v12322_v47 = vld [vmem:[#allocation10 + $0x6a0] ss:$16 sps:$4 sm:$0xff]   ;;  %v12339_v60 = vld [vmem:[#allocation10 + $0x6ec] ss:$16 sps:$4 sm:$0xff]  }
 0x3ec   : > { %v5353_v3 = vadd.f32 %v5334_v59, %v5317_v56  ;;  %v5322_v50 = vmul.f32 %v5298_v48, %v5025_v62  ;;  %v13883_v8 = vadd.f32 %v10871_v0, %v10870_v61  ;;  %v10873_v9 = vpop.f32.mrb[14].mxu1  ;;  %v12325_v48 = vld [vmem:[#allocation10 + $0x6a8] ss:$16 sps:$4 sm:$0xff]   ;;  %v12328_v22 = vld [vmem:[#allocation10 + $0x6c0] ss:$16 sps:$4 sm:$0xff]  }
 0x3ed   : > { %v5362_v10 = vmax.f32 %v5352_v31, 0.0  ;;  %v5357_v57 = vadd.f32 %v5330_v49, %v5321_v51  ;;  %v10874_v11 = vpop.f32.mrb[15].mxu1  ;;  %v12336_v56 = vld [vmem:[#allocation10 + $0x6e4] ss:$16 sps:$4 sm:$0xff]   ;;  %v12334_v61 = vld [vmem:[#allocation10 + $0x6e0] ss:$16 sps:$4 sm:$0xff]  }
 0x3ee   : > { %v5363_v12 = vmax.f32 %v5353_v3, 0.0  ;;  %v5358_v13 = vadd.f32 %v5334_v59, %v5322_v50  ;;  %v13885_v14 = vadd.f32 %v10874_v11, %v10873_v9  ;;  %v12333_v59 = vld [vmem:[#allocation10 + $0x6cc] ss:$16 sps:$4 sm:$0xff]   ;;  %v12337_v31 = vld [vmem:[#allocation10 + $0x6e8] ss:$16 sps:$4 sm:$0xff]  }
 0x3ef   : > { %v5367_v16 = vmax.f32 %v5357_v57, 0.0  ;;  %v5383_v17 = vrot.slane %v5362_v10, 7  ;;  %v5414_v20 = vrot.slane %v5362_v10, 1  ;;  %v12342_v51 = vld [vmem:[#allocation10 + $0x704] ss:$16 sps:$4 sm:$0xff]  }
 0x3f0   : > { %v5368_v63 = vmax.f32 %v5358_v13, 0.0  ;;  %v5384_v25 = vrot.slane %v5363_v12, 7  ;;  %v5417_v2 = vrot.slane %v5363_v12, 1  ;;  %v12340_v62 = vld [vmem:[#allocation10 + $0x700] ss:$16 sps:$4 sm:$0xff]  }
 0x3f1   : > { %v5388_v21 = vrot.slane %v5367_v16, 7  ;;  %v5415_v52 = vrot.slane %v5367_v16, 1  ;;  %v5593_v24 = vpack.c.bf16 %v5367_v16, %v5362_v10  ;;  %v12343_v0 = vld [vmem:[#allocation10 + $0x708] ss:$16 sps:$4 sm:$0xff]   ;;  %v12348_v3 = vld [vmem:[#allocation10 + $0x724] ss:$16 sps:$4 sm:$0xff]  }
 0x3f2   : > { %v5390_v26 = vrot.slane %v5368_v63, 7  ;;  %v5418_v28 = vrot.slane %v5368_v63, 1  ;;  %v5594_v29 = vpack.c.bf16 %v5368_v63, %v5363_v12  ;;  %v12351_v50 = vld [vmem:[#allocation10 + $0x72c] ss:$16 sps:$4 sm:$0xff]   ;;  %v12346_v9 = vld [vmem:[#allocation10 + $0x720] ss:$16 sps:$4 sm:$0xff]  }
 0x3f3   : > { %v5389_v30 = vsel %vm5382_vm4, %v5383_v17, %v5388_v21  ;;  %v5416_v32 = vsel %vm3940_vm3, %v5414_v20, %v5415_v52  ;;  %v12349_v10 = vld [vmem:[#allocation10 + $0x728] ss:$16 sps:$4 sm:$0xff]   ;;  %v12354_v57 = vld [vmem:[#allocation10 + $0x744] ss:$16 sps:$4 sm:$0xff]   ;;  %v12357_v11 = vld [vmem:[#allocation10 + $0x74c] ss:$16 sps:$4 sm:$0xff]  }
 0x3f4   : > { %v13889_v34 = vpack.c.bf16 %v5415_v52, %v5416_v32  ;;  %6498 = vmatprep.mubr.bf16.mxu1 %v5594_v29  ;;  %6627 = vmatprep.mubr.bf16.mxu0 %v5594_v29  ;;  %v5391_v37 = vsel %vm5382_vm4, %v5384_v25, %v5390_v26  ;;  %v13892_v4 = vpack.c.bf16 %v5389_v30, %v5383_v17  ;;  %v12352_v63 = vld [vmem:[#allocation10 + $0x740] ss:$16 sps:$4 sm:$0xff]   ;;  %v12355_v20 = vld [vmem:[#allocation10 + $0x748] ss:$16 sps:$4 sm:$0xff]   ;;  %v12360_v52 = vld [vmem:[#allocation10 + $0x764] ss:$16 sps:$4 sm:$0xff]  }
 0x3f5   : > { %6499 = vmatmul.mubr.bf16.vlgmr.msra.gmra.mrb[16].mxu1 %v5593_v24  ;;  %6628 = vmatmul.mubr.bf16.vlgmr.msra.gmra.mrb[20].mxu0 %v5593_v24  ;;  %v13894_v18 = vpack.c.bf16 %v5391_v37, %v5384_v25  ;;  %v5419_v19 = vsel %vm3940_vm3, %v5417_v2, %v5418_v28  ;;  %v12361_v29 = vld [vmem:[#allocation10 + $0x768] ss:$16 sps:$4 sm:$0xff]   ;;  %v12366_v2 = vld [vmem:[#allocation10 + $0x784] ss:$16 sps:$4 sm:$0xff]   ;;  %v12369_v30 = vld [vmem:[#allocation10 + $0x78c] ss:$16 sps:$4 sm:$0xff]  }
 0x3f6   : > { %6510 = vmatpush1.bf16.msra.mxu1 %v12316_v23  ;;  %6639 = vmatpush1.bf16.msra.mxu0 %v12319_v1  ;;  %v13897_v49 = vpack.c.bf16 %v5418_v28, %v5419_v19  ;;  %v12363_v23 = vld [vmem:[#allocation10 + $0x76c] ss:$16 sps:$4 sm:$0xff]   ;;  %v12358_v28 = vld [vmem:[#allocation10 + $0x760] ss:$16 sps:$4 sm:$0xff]  }
 0x3f7   : > { %6541 = vmatprep.mubr.bf16.mxu1 %v13855_v36  ;;  %6670 = vmatprep.mubr.bf16.mxu0 %v13855_v36  ;;  %v12345_v36 = vld [vmem:[#allocation10 + $0x70c] ss:$16 sps:$4 sm:$0xff]   ;;  %v12370_v19 = vld [vmem:[#allocation10 + $0x7a0] ss:$16 sps:$4 sm:$0xff]  }
 0x3f8   : > { %6511 = vmatprep.subr.bf16.mxu1 %v12324_v35  ;;  %6640 = vmatprep.subr.bf16.mxu0 %v12327_v27  ;;  %v12364_v35 = vld [vmem:[#allocation10 + $0x780] ss:$16 sps:$4 sm:$0xff]   ;;  %v12367_v27 = vld [vmem:[#allocation10 + $0x788] ss:$16 sps:$4 sm:$0xff]   ;;  %v12375_v37 = vld [vmem:[#allocation10 + $0x7ac] ss:$16 sps:$4 sm:$0xff]  }
 0x3fa   : > { %6512 = vmatpush1.bf16.msra.mxu1 %v12322_v47  ;;  %6641 = vmatpush1.bf16.msra.mxu0 %v12325_v48  ;;  %v12378_v48 = vld [vmem:[#allocation10 + $0x7c4] ss:$16 sps:$4 sm:$0xff]  }
 0x3fb   : > { %6513 = vmatprep.subr.bf16.mxu1 %v12330_v53  ;;  %6642 = vmatprep.subr.bf16.mxu0 %v12333_v59 }
 0x3fe   : > { %6514 = vmatpush1.bf16.msra.mxu1 %v12328_v22  ;;  %6643 = vmatpush1.bf16.msra.mxu0 %v12331_v55 }
 0x3ff   : > { %6515 = vmatprep.subr.bf16.mxu1 %v12336_v56  ;;  %6644 = vmatprep.subr.bf16.mxu0 %v12339_v60  ;;  %v12376_v56 = vld [vmem:[#allocation10 + $0x7c0] ss:$16 sps:$4 sm:$0xff]   ;;  %v12379_v60 = vld [vmem:[#allocation10 + $0x7c8] ss:$16 sps:$4 sm:$0xff]  }
 0x402   : > { %6516 = vmatpush1.bf16.msra.mxu1 %v12334_v61  ;;  %6645 = vmatpush1.bf16.msra.mxu0 %v12337_v31 }
 0x403   : > { %6517 = vmatprep.subr.bf16.mxu1 %v12342_v51  ;;  %6646 = vmatprep.subr.bf16.mxu0 %v12345_v36  ;;  %v12387_v36 = vld [vmem:[#allocation10 + $0x7ec] ss:$16 sps:$4 sm:$0xff]  }
 0x406   : > { %6518 = vmatpush1.bf16.msra.mxu1 %v12340_v62  ;;  %6647 = vmatpush1.bf16.msra.mxu0 %v12343_v0 }
 0x407   : > { %6519 = vmatprep.subr.bf16.mxu1 %v12348_v3  ;;  %6648 = vmatprep.subr.bf16.mxu0 %v12351_v50  ;;  %v12382_v3 = vld [vmem:[#allocation10 + $0x7e0] ss:$16 sps:$4 sm:$0xff]   ;;  %v12385_v50 = vld [vmem:[#allocation10 + $0x7e8] ss:$16 sps:$4 sm:$0xff]  }
 0x408   : > { %v10892_v12 = vpop.f32.mrb[16].mxu0 }
 0x409   : > { %v10893_v13 = vpop.f32.mrb[17].mxu0 }
 0x40a   : > { %v10894_v16 = vadd.f32 %v10893_v13, %v10892_v12  ;;  %6520 = vmatpush1.bf16.msra.mxu1 %v12346_v9  ;;  %6649 = vmatpush1.bf16.msra.mxu0 %v12349_v10  ;;  %v10895_v17 = vpop.f32.mrb[18].mxu0  ;;  %v12390_v10 = vld [vmem:[#allocation10 + $0x804] ss:$16 sps:$4 sm:$0xff]   ;;  %v12388_v13 = vld [vmem:[#allocation10 + $0x800] ss:$16 sps:$4 sm:$0xff]  }
 0x40b   : > { %v10896_v21 = vpop.f32.mrb[19].mxu0  ;;  %6521 = vmatprep.subr.bf16.mxu1 %v12354_v57  ;;  %6650 = vmatprep.subr.bf16.mxu0 %v12357_v11  ;;  %v12393_v57 = vld [vmem:[#allocation10 + $0x80c] ss:$16 sps:$4 sm:$0xff]  }
 0x40c   : > { %v5233_v24 = vadd.f32 %v10894_v16, %v13883_v8  ;;  %v10897_v25 = vadd.f32 %v10896_v21, %v10895_v17  ;;  %v5309_v8 = vsub.s32 4, %v13833_v46  ;;  %v12391_v16 = vld [vmem:[#allocation10 + $0x808] ss:$16 sps:$4 sm:$0xff]   ;;  %v12396_v17 = vld [vmem:[#allocation10 + $0x824] ss:$16 sps:$4 sm:$0xff]  }
 0x40e   : > { %v5236_v26 = vadd.f32 %v10897_v25, %v13885_v14  ;;  %6522 = vmatpush1.bf16.msra.mxu1 %v12352_v63  ;;  %6651 = vmatpush1.bf16.msra.mxu0 %v12355_v20  ;;  %v11167_v1 = vadd.f32 %v13829_v54, %v5233_v24  ;;  %v12372_v14 = vld [vmem:[#allocation10 + $0x7a4] ss:$16 sps:$4 sm:$0xff]   ;;  %v12373_v54 = vld [vmem:[#allocation10 + $0x7a8] ss:$16 sps:$4 sm:$0xff]   ;;  %v5310_v47 = vrot.slane %v13838_v43, %v5309_v8 }
 0x40f   : > { %6523 = vmatprep.subr.bf16.mxu1 %v12360_v52  ;;  %6652 = vmatprep.subr.bf16.mxu0 %v12363_v23  ;;  %v5346_v22 = vrot.slane %v13843_v7, %v5309_v8  ;;  %v12384_v43 = vld [vmem:[#allocation10 + $0x7e4] ss:$16 sps:$4 sm:$0xff]   ;;  %v12399_v23 = vld [vmem:[#allocation10 + $0x82c] ss:$16 sps:$4 sm:$0xff]   ;;  %v12403_v8 = vld [vmem:[#allocation10 + $0x848] ss:$16 sps:$4 sm:$0xff]  }
 0x410   : > { %v11171_v32 = vadd.f32 %v13831_v15, %v5236_v26  ;;  %v12381_v15 = vld [vmem:[#allocation10 + $0x7cc] ss:$16 sps:$4 sm:$0xff]  }
 0x412   : > { %6524 = vmatpush1.bf16.msra.mxu1 %v12358_v28  ;;  %6653 = vmatpush1.bf16.msra.mxu0 %v12361_v29  ;;  %v12394_v29 = vld [vmem:[#allocation10 + $0x820] ss:$16 sps:$4 sm:$0xff]  }
 0x413   : > { %6525 = vmatprep.subr.bf16.mxu1 %v12366_v2  ;;  %6654 = vmatprep.subr.bf16.mxu0 %v12369_v30 }
 0x416   : > { %6526 = vmatpush1.bf16.msra.mxu1 %v12364_v35  ;;  %6655 = vmatpush1.bf16.msra.mxu0 %v12367_v27  ;;  %v12405_v35 = vld [vmem:[#allocation10 + $0x84c] ss:$16 sps:$4 sm:$0xff]   ;;  %v12400_v27 = vld [vmem:[#allocation10 + $0x840] ss:$16 sps:$4 sm:$0xff]  }
 0x417   : > { %6527 = vmatprep.subr.bf16.mxu1 %v12372_v14  ;;  %6656 = vmatprep.subr.bf16.mxu0 %v12375_v37  ;;  %v12408_v14 = vld [vmem:[#allocation10 + $0x864] ss:$16 sps:$4 sm:$0xff]   ;;  %v12411_v37 = vld [vmem:[#allocation10 + $0x86c] ss:$16 sps:$4 sm:$0xff]  }
 0x418   : > { %v5273_v53 = vpop.f32.mrb[8].mxu0 }
 0x419   : > { %v11168_v59 = vadd.f32 %v11167_v1, %v5273_v53  ;;  %v11018_v55 = vpop.f32.mrb[9].mxu0  ;;  %v12397_v1 = vld [vmem:[#allocation10 + $0x828] ss:$16 sps:$4 sm:$0xff]  }
 0x41a   : > { %6528 = vmatpush1.bf16.msra.mxu1 %v12370_v19  ;;  %6657 = vmatpush1.bf16.msra.mxu0 %v12373_v54  ;;  %v5276_v46 = vpop.f32.mrb[10].mxu0  ;;  %v12406_v19 = vld [vmem:[#allocation10 + $0x860] ss:$16 sps:$4 sm:$0xff]   ;;  %v12409_v54 = vld [vmem:[#allocation10 + $0x868] ss:$16 sps:$4 sm:$0xff]  }
 0x41b   : > { %v5320_v61 = vmul.f32 %v11168_v59, %v5310_v47  ;;  %v11172_v31 = vadd.f32 %v11171_v32, %v5276_v46  ;;  %v11019_v51 = vpop.f32.mrb[11].mxu0  ;;  %6529 = vmatprep.subr.bf16.mxu1 %v12378_v48  ;;  %6658 = vmatprep.subr.bf16.mxu0 %v12381_v15  ;;  %v12402_v32 = vld [vmem:[#allocation10 + $0x844] ss:$16 sps:$4 sm:$0xff]   ;;  %v12417_v48 = vld [vmem:[#allocation10 + $0x88c] ss:$16 sps:$4 sm:$0xff]  }
 0x41c   : > { %v12412_v15 = vld [vmem:[#allocation10 + $0x880] ss:$16 sps:$4 sm:$0xff]   ;;  %v12415_v53 = vld [vmem:[#allocation10 + $0x888] ss:$16 sps:$4 sm:$0xff]   ;;  %v12420_v59 = vld [vmem:[#allocation10 + $0x8a4] ss:$16 sps:$4 sm:$0xff]  }
 0x41d   : > { %v5356_v62 = vadd.f32 %v5346_v22, %v5320_v61  ;;  %v5325_v0 = vmul.f32 %v11172_v31, %v5310_v47  ;;  %v12414_v47 = vld [vmem:[#allocation10 + $0x884] ss:$16 sps:$4 sm:$0xff]   ;;  %v12418_v55 = vld [vmem:[#allocation10 + $0x8a0] ss:$16 sps:$4 sm:$0xff]   ;;  %v12421_v46 = vld [vmem:[#allocation10 + $0x8a8] ss:$16 sps:$4 sm:$0xff]  }
 0x41e   : > { %6530 = vmatpush1.bf16.msra.mxu1 %v12376_v56  ;;  %6659 = vmatpush1.bf16.msra.mxu0 %v12379_v60  ;;  %v12426_v56 = vld [vmem:[#allocation10 + $0x8c4] ss:$16 sps:$4 sm:$0xff]   ;;  %v12429_v60 = vld [vmem:[#allocation10 + $0x8cc] ss:$16 sps:$4 sm:$0xff]   ;;  %v12424_v61 = vld [vmem:[#allocation10 + $0x8c0] ss:$16 sps:$4 sm:$0xff]  }
 0x41f   : > { %v5366_v7 = vmax.f32 %v5356_v62, 0.0  ;;  %v5361_v9 = vadd.f32 %v5346_v22, %v5325_v0  ;;  %6531 = vmatprep.subr.bf16.mxu1 %v12384_v43  ;;  %6660 = vmatprep.subr.bf16.mxu0 %v12387_v36  ;;  %v12423_v22 = vld [vmem:[#allocation10 + $0x8ac] ss:$16 sps:$4 sm:$0xff]   ;;  %v12427_v31 = vld [vmem:[#allocation10 + $0x8c8] ss:$16 sps:$4 sm:$0xff]  }
 0x420   : > { %v12432_v51 = vld [vmem:[#allocation10 + $0x8e4] ss:$16 sps:$4 sm:$0xff]   ;;  %v12430_v43 = vld [vmem:[#allocation10 + $0x8e0] ss:$16 sps:$4 sm:$0xff]   ;;  %v12433_v36 = vld [vmem:[#allocation10 + $0x8e8] ss:$16 sps:$4 sm:$0xff]  }
 0x421   : > { %v5387_v11 = vrot.slane %v5366_v7, 7  ;;  %v5371_v12 = vmax.f32 %v5361_v9, 0.0  ;;  %v5426_v63 = vrot.slane %v5366_v7, 1  ;;  %v12438_v62 = vld [vmem:[#allocation10 + $0x4] ss:$16 sps:$4 sm:$0xff]  }
 0x422   : > { %6532 = vmatpush1.bf16.msra.mxu1 %v12382_v3  ;;  %6661 = vmatpush1.bf16.msra.mxu0 %v12385_v50  ;;  %v12441_v0 = vld [vmem:[#allocation10 + $0xc] ss:$16 sps:$4 sm:$0xff]   ;;  %v12436_v3 = vld [vmem:[#allocation10] ss:$16 sps:$4 sm:$0xff]   ;;  %v12439_v50 = vld [vmem:[#allocation10 + $0x8] ss:$16 sps:$4 sm:$0xff]  }
 0x423   : > { %v5396_v20 = vrot.slane %v5371_v12, 7  ;;  %v5427_v21 = vrot.slane %v5371_v12, 1  ;;  %v13908_v52 = vpack.c.bf16 %v5371_v12, %v5366_v7  ;;  %6533 = vmatprep.subr.bf16.mxu1 %v12390_v10  ;;  %6662 = vmatprep.subr.bf16.mxu0 %v12393_v57  ;;  %v5412_v24 = vsel %vm5382_vm4, 0.0, %v5387_v11  ;;  %v12444_v9 = vld [vmem:[#allocation10 + $0x24] ss:$16 sps:$4 sm:$0xff]  }
 0x424   : > { %v12447_v10 = vld [vmem:[#allocation10 + $0x2c] ss:$16 sps:$4 sm:$0xff]   ;;  %v12442_v57 = vld [vmem:[#allocation10 + $0x20] ss:$16 sps:$4 sm:$0xff]   ;;  %v12450_v12 = vld [vmem:[#allocation10 + $0x44] ss:$16 sps:$4 sm:$0xff]  }
 0x425   : > { %v5443_v25 = vsel %vm3940_vm3, %v5427_v21, 0.0  ;;  %v5397_v26 = vsel %vm5382_vm4, %v5387_v11, %v5396_v20  ;;  %v5428_v28 = vsel %vm3940_vm3, %v5426_v63, %v5427_v21  ;;  %v12445_v11 = vld [vmem:[#allocation10 + $0x28] ss:$16 sps:$4 sm:$0xff]   ;;  %v12456_v63 = vld [vmem:[#allocation10 + $0x64] ss:$16 sps:$4 sm:$0xff]  }
 0x426   : > { %6534 = vmatpush1.bf16.msra.mxu1 %v12388_v13  ;;  %6663 = vmatpush1.bf16.msra.mxu0 %v12391_v16  ;;  %v13914_v2 = vpack.c.bf16 %v5397_v26, %v5412_v24  ;;  %v13916_v30 = vpack.c.bf16 %v5443_v25, %v5428_v28  ;;  %v12453_v13 = vld [vmem:[#allocation10 + $0x4c] ss:$16 sps:$4 sm:$0xff]   ;;  %v12448_v16 = vld [vmem:[#allocation10 + $0x40] ss:$16 sps:$4 sm:$0xff]   ;;  %v12463_v25 = vld [vmem:[#allocation10 + $0x88] ss:$16 sps:$4 sm:$0xff]  }
 0x427   : > { %6535 = vmatprep.subr.bf16.mxu1 %v12396_v17  ;;  %6664 = vmatprep.subr.bf16.mxu0 %v12399_v23  ;;  %v12451_v17 = vld [vmem:[#allocation10 + $0x48] ss:$16 sps:$4 sm:$0xff]   ;;  %v12459_v20 = vld [vmem:[#allocation10 + $0x6c] ss:$16 sps:$4 sm:$0xff]   ;;  %v12454_v21 = vld [vmem:[#allocation10 + $0x60] ss:$16 sps:$4 sm:$0xff]  }
 0x428   : > { %v12462_v23 = vld [vmem:[#allocation10 + $0x84] ss:$16 sps:$4 sm:$0xff]   ;;  %v12460_v24 = vld [vmem:[#allocation10 + $0x80] ss:$16 sps:$4 sm:$0xff]   ;;  %v12471_v28 = vld [vmem:[#allocation10 + $0xac] ss:$16 sps:$4 sm:$0xff]  }
 0x429   : > { %v12468_v26 = vld [vmem:[#allocation10 + $0xa4] ss:$16 sps:$4 sm:$0xff]   ;;  %v12646_v7 = vld [vmem:[#allocation10 + $0x460] ss:$16 sps:$4 sm:$0xff]  }
 0x42a   : > { %6536 = vmatpush1.bf16.msra.mxu1 %v12394_v29  ;;  %6665 = vmatpush1.bf16.msra.mxu0 %v12397_v1  ;;  %v12466_v29 = vld [vmem:[#allocation10 + $0xa0] ss:$16 sps:$4 sm:$0xff]   ;;  %v12469_v1 = vld [vmem:[#allocation10 + $0xa8] ss:$16 sps:$4 sm:$0xff]  }
 0x42b   : > { %6537 = vmatprep.subr.bf16.mxu1 %v12402_v32  ;;  %6666 = vmatprep.subr.bf16.mxu0 %v12405_v35  ;;  %v12474_v32 = vld [vmem:[#allocation10 + $0xc4] ss:$16 sps:$4 sm:$0xff]   ;;  %v12477_v35 = vld [vmem:[#allocation10 + $0xcc] ss:$16 sps:$4 sm:$0xff]  }
 0x42e   : > { %6538 = vmatpush1.bf16.msra.mxu1 %v12400_v27  ;;  %6667 = vmatpush1.bf16.msra.mxu0 %v12403_v8  ;;  %v12472_v27 = vld [vmem:[#allocation10 + $0xc0] ss:$16 sps:$4 sm:$0xff]   ;;  %v12475_v8 = vld [vmem:[#allocation10 + $0xc8] ss:$16 sps:$4 sm:$0xff]  }
 0x42f   : > { %6539 = vmatprep.subr.bf16.mxu1 %v12408_v14  ;;  %6668 = vmatprep.subr.bf16.mxu0 %v12411_v37  ;;  %v12480_v14 = vld [vmem:[#allocation10 + $0xe4] ss:$16 sps:$4 sm:$0xff]   ;;  %v12483_v37 = vld [vmem:[#allocation10 + $0xec] ss:$16 sps:$4 sm:$0xff]  }
 0x432   : > { %6540 = vmatpush1.bf16.msra.mxu1 %v12406_v19  ;;  %6669 = vmatpush1.bf16.msra.mxu0 %v12409_v54  ;;  %v12478_v19 = vld [vmem:[#allocation10 + $0xe0] ss:$16 sps:$4 sm:$0xff]   ;;  %v12481_v54 = vld [vmem:[#allocation10 + $0xe8] ss:$16 sps:$4 sm:$0xff]  }
 0x433   : > { %6552 = vmatprep.subr.bf16.mxu1 %v12414_v47  ;;  %6681 = vmatprep.subr.bf16.mxu0 %v12417_v48  ;;  %v12486_v47 = vld [vmem:[#allocation10 + $0x104] ss:$16 sps:$4 sm:$0xff]   ;;  %v12489_v48 = vld [vmem:[#allocation10 + $0x10c] ss:$16 sps:$4 sm:$0xff]  }
 0x435   : > { %6542 = vmatmul.mubr.bf16.vlgmr.msra.gmra.mrb[16].mxu1 %v13853_v33  ;;  %6671 = vmatmul.mubr.bf16.vlgmr.msra.gmra.mrb[20].mxu0 %v13853_v33  ;;  %v12435_v33 = vld [vmem:[#allocation10 + $0x8ec] ss:$16 sps:$4 sm:$0xff]  }
 0x436   : > { %6553 = vmatpush1.bf16.msra.mxu1 %v12412_v15  ;;  %6682 = vmatpush1.bf16.msra.mxu0 %v12415_v53  ;;  %v12484_v15 = vld [vmem:[#allocation10 + $0x100] ss:$16 sps:$4 sm:$0xff]   ;;  %v12487_v53 = vld [vmem:[#allocation10 + $0x108] ss:$16 sps:$4 sm:$0xff]  }
 0x437   : > { %6554 = vmatprep.subr.bf16.mxu1 %v12420_v59  ;;  %6683 = vmatprep.subr.bf16.mxu0 %v12423_v22  ;;  %v12492_v59 = vld [vmem:[#allocation10 + $0x124] ss:$16 sps:$4 sm:$0xff]   ;;  %v12495_v22 = vld [vmem:[#allocation10 + $0x12c] ss:$16 sps:$4 sm:$0xff]  }
 0x438   : > { %6584 = vmatprep.mubr.bf16.mxu1 %v13250_v58  ;;  %6713 = vmatprep.mubr.bf16.mxu0 %v13250_v58 }
 0x43a   : > { %6555 = vmatpush1.bf16.msra.mxu1 %v12418_v55  ;;  %6684 = vmatpush1.bf16.msra.mxu0 %v12421_v46  ;;  %v12490_v55 = vld [vmem:[#allocation10 + $0x120] ss:$16 sps:$4 sm:$0xff]   ;;  %v12493_v46 = vld [vmem:[#allocation10 + $0x128] ss:$16 sps:$4 sm:$0xff]  }
 0x43b   : > { %6556 = vmatprep.subr.bf16.mxu1 %v12426_v56  ;;  %6685 = vmatprep.subr.bf16.mxu0 %v12429_v60  ;;  %v12498_v56 = vld [vmem:[#allocation10 + $0x144] ss:$16 sps:$4 sm:$0xff]   ;;  %v12501_v60 = vld [vmem:[#allocation10 + $0x14c] ss:$16 sps:$4 sm:$0xff]  }
 0x43e   : > { %6557 = vmatpush1.bf16.msra.mxu1 %v12424_v61  ;;  %6686 = vmatpush1.bf16.msra.mxu0 %v12427_v31  ;;  %v12496_v61 = vld [vmem:[#allocation10 + $0x140] ss:$16 sps:$4 sm:$0xff]   ;;  %v12499_v31 = vld [vmem:[#allocation10 + $0x148] ss:$16 sps:$4 sm:$0xff]  }
 0x43f   : > { %6558 = vmatprep.subr.bf16.mxu1 %v12432_v51  ;;  %6687 = vmatprep.subr.bf16.mxu0 %v12435_v33  ;;  %v12504_v51 = vld [vmem:[#allocation10 + $0x164] ss:$16 sps:$4 sm:$0xff]   ;;  %v12507_v33 = vld [vmem:[#allocation10 + $0x16c] ss:$16 sps:$4 sm:$0xff]  }
 0x442   : > { %6559 = vmatpush1.bf16.msra.mxu1 %v12430_v43  ;;  %6688 = vmatpush1.bf16.msra.mxu0 %v12433_v36  ;;  %v12502_v43 = vld [vmem:[#allocation10 + $0x160] ss:$16 sps:$4 sm:$0xff]   ;;  %v12505_v36 = vld [vmem:[#allocation10 + $0x168] ss:$16 sps:$4 sm:$0xff]  }
 0x443   : > { %7447 = vmatprep.subr.bf16.mxu1 %v12438_v62  ;;  %7576 = vmatprep.subr.bf16.mxu0 %v12441_v0  ;;  %v12510_v62 = vld [vmem:[#allocation10 + $0x184] ss:$16 sps:$4 sm:$0xff]   ;;  %v12513_v0 = vld [vmem:[#allocation10 + $0x18c] ss:$16 sps:$4 sm:$0xff]  }
 0x445   : > { %10394 = vmatmul.mubr.msk.bf16.vlgmr.msra.gmra.mrb[16].mxu1 %vm2015_vm1, %v13908_v52  ;;  %10395 = vmatmul.mubr.msk.bf16.vlgmr.msra.gmra.mrb[20].mxu0 %vm2015_vm1, %v13908_v52  ;;  %v12457_v52 = vld [vmem:[#allocation10 + $0x68] ss:$16 sps:$4 sm:$0xff]  }
 0x446   : > { %7448 = vmatpush1.bf16.msra.mxu1 %v12436_v3  ;;  %10543 = vmatprep.mubr.msk.bf16.mxu1 %vm13924_vm7, %v13894_v18  ;;  %v12508_v3 = vld [vmem:[#allocation10 + $0x180] ss:$16 sps:$4 sm:$0xff]  }
 0x447   : > { %7577 = vmatpush1.bf16.msra.mxu0 %v12439_v50  ;;  %10560 = vmatprep.mubr.msk.bf16.mxu0 %vm13924_vm7, %v13894_v18  ;;  %v12465_v18 = vld [vmem:[#allocation10 + $0x8c] ss:$16 sps:$4 sm:$0xff]   ;;  %v12511_v50 = vld [vmem:[#allocation10 + $0x188] ss:$16 sps:$4 sm:$0xff]  }
 0x448   : > { %7449 = vmatprep.subr.bf16.mxu1 %v12444_v9  ;;  %7578 = vmatprep.subr.bf16.mxu0 %v12447_v10  ;;  %v12516_v9 = vld [vmem:[#allocation10 + $0x1a4] ss:$16 sps:$4 sm:$0xff]   ;;  %v12519_v10 = vld [vmem:[#allocation10 + $0x1ac] ss:$16 sps:$4 sm:$0xff]  }
 0x44a   : > { %7450 = vmatpush1.bf16.msra.mxu1 %v12442_v57  ;;  %v12514_v57 = vld [vmem:[#allocation10 + $0x1a0] ss:$16 sps:$4 sm:$0xff]  }
 0x44b   : > { %7579 = vmatpush1.bf16.msra.mxu0 %v12445_v11  ;;  %7451 = vmatprep.subr.bf16.mxu1 %v12450_v12  ;;  %v12517_v11 = vld [vmem:[#allocation10 + $0x1a8] ss:$16 sps:$4 sm:$0xff]   ;;  %v12522_v12 = vld [vmem:[#allocation10 + $0x1c4] ss:$16 sps:$4 sm:$0xff]  }
 0x44c   : > { %7580 = vmatprep.subr.bf16.mxu0 %v12453_v13  ;;  %v12525_v13 = vld [vmem:[#allocation10 + $0x1cc] ss:$16 sps:$4 sm:$0xff]  }
 0x44e   : > { %7452 = vmatpush1.bf16.msra.mxu1 %v12448_v16  ;;  %v12520_v16 = vld [vmem:[#allocation10 + $0x1c0] ss:$16 sps:$4 sm:$0xff]  }
 0x44f   : > { %7581 = vmatpush1.bf16.msra.mxu0 %v12451_v17  ;;  %7453 = vmatprep.subr.bf16.mxu1 %v12456_v63  ;;  %v12523_v17 = vld [vmem:[#allocation10 + $0x1c8] ss:$16 sps:$4 sm:$0xff]   ;;  %v12528_v63 = vld [vmem:[#allocation10 + $0x1e4] ss:$16 sps:$4 sm:$0xff]  }
 0x450   : > { %7582 = vmatprep.subr.bf16.mxu0 %v12459_v20  ;;  %v12531_v20 = vld [vmem:[#allocation10 + $0x1ec] ss:$16 sps:$4 sm:$0xff]  }
 0x452   : > { %7454 = vmatpush1.bf16.msra.mxu1 %v12454_v21  ;;  %v12526_v21 = vld [vmem:[#allocation10 + $0x1e0] ss:$16 sps:$4 sm:$0xff]  }
 0x453   : > { %7583 = vmatpush1.bf16.msra.mxu0 %v12457_v52  ;;  %7455 = vmatprep.subr.bf16.mxu1 %v12462_v23  ;;  %v12529_v52 = vld [vmem:[#allocation10 + $0x1e8] ss:$16 sps:$4 sm:$0xff]   ;;  %v12534_v23 = vld [vmem:[#allocation10 + $0x204] ss:$16 sps:$4 sm:$0xff]  }
 0x454   : > { %7584 = vmatprep.subr.bf16.mxu0 %v12465_v18  ;;  %v12537_v18 = vld [vmem:[#allocation10 + $0x20c] ss:$16 sps:$4 sm:$0xff]  }
 0x456   : > { %7456 = vmatpush1.bf16.msra.mxu1 %v12460_v24  ;;  %v12532_v24 = vld [vmem:[#allocation10 + $0x200] ss:$16 sps:$4 sm:$0xff]  }
 0x457   : > { %7585 = vmatpush1.bf16.msra.mxu0 %v12463_v25  ;;  %7457 = vmatprep.subr.bf16.mxu1 %v12468_v26  ;;  %v12535_v25 = vld [vmem:[#allocation10 + $0x208] ss:$16 sps:$4 sm:$0xff]   ;;  %v12540_v26 = vld [vmem:[#allocation10 + $0x224] ss:$16 sps:$4 sm:$0xff]  }
 0x458   : > { %7586 = vmatprep.subr.bf16.mxu0 %v12471_v28  ;;  %v12543_v28 = vld [vmem:[#allocation10 + $0x22c] ss:$16 sps:$4 sm:$0xff]  }
 0x45a   : > { %7458 = vmatpush1.bf16.msra.mxu1 %v12466_v29  ;;  %v12538_v29 = vld [vmem:[#allocation10 + $0x220] ss:$16 sps:$4 sm:$0xff]  }
 0x45b   : > { %7587 = vmatpush1.bf16.msra.mxu0 %v12469_v1  ;;  %7459 = vmatprep.subr.bf16.mxu1 %v12474_v32  ;;  %v12541_v1 = vld [vmem:[#allocation10 + $0x228] ss:$16 sps:$4 sm:$0xff]   ;;  %v12546_v32 = vld [vmem:[#allocation10 + $0x244] ss:$16 sps:$4 sm:$0xff]  }
 0x45c   : > { %7588 = vmatprep.subr.bf16.mxu0 %v12477_v35  ;;  %v12549_v35 = vld [vmem:[#allocation10 + $0x24c] ss:$16 sps:$4 sm:$0xff]  }
 0x45e   : > { %7460 = vmatpush1.bf16.msra.mxu1 %v12472_v27  ;;  %v12544_v27 = vld [vmem:[#allocation10 + $0x240] ss:$16 sps:$4 sm:$0xff]  }
 0x45f   : > { %7589 = vmatpush1.bf16.msra.mxu0 %v12475_v8  ;;  %7461 = vmatprep.subr.bf16.mxu1 %v12480_v14  ;;  %v12552_v8 = vld [vmem:[#allocation10 + $0x264] ss:$16 sps:$4 sm:$0xff]   ;;  %v12555_v14 = vld [vmem:[#allocation10 + $0x26c] ss:$16 sps:$4 sm:$0xff]  }
 0x460   : > { %7590 = vmatprep.subr.bf16.mxu0 %v12483_v37  ;;  %v12550_v37 = vld [vmem:[#allocation10 + $0x260] ss:$16 sps:$4 sm:$0xff]  }
 0x462   : > { %7462 = vmatpush1.bf16.msra.mxu1 %v12478_v19  ;;  %v12553_v19 = vld [vmem:[#allocation10 + $0x268] ss:$16 sps:$4 sm:$0xff]  }
 0x463   : > { %7591 = vmatpush1.bf16.msra.mxu0 %v12481_v54  ;;  %7463 = vmatprep.subr.bf16.mxu1 %v12486_v47  ;;  %v12558_v54 = vld [vmem:[#allocation10 + $0x284] ss:$16 sps:$4 sm:$0xff]   ;;  %v12561_v47 = vld [vmem:[#allocation10 + $0x28c] ss:$16 sps:$4 sm:$0xff]  }
 0x464   : > { %7592 = vmatprep.subr.bf16.mxu0 %v12489_v48  ;;  %v12559_v48 = vld [vmem:[#allocation10 + $0x288] ss:$16 sps:$4 sm:$0xff]  }
 0x466   : > { %7464 = vmatpush1.bf16.msra.mxu1 %v12484_v15  ;;  %v12564_v15 = vld [vmem:[#allocation10 + $0x2a4] ss:$16 sps:$4 sm:$0xff]  }
 0x467   : > { %7593 = vmatpush1.bf16.msra.mxu0 %v12487_v53  ;;  %7465 = vmatprep.subr.bf16.mxu1 %v12492_v59  ;;  %v12567_v53 = vld [vmem:[#allocation10 + $0x2ac] ss:$16 sps:$4 sm:$0xff]   ;;  %v12562_v59 = vld [vmem:[#allocation10 + $0x2a0] ss:$16 sps:$4 sm:$0xff]  }
 0x468   : > { %7594 = vmatprep.subr.bf16.mxu0 %v12495_v22  ;;  %v12565_v22 = vld [vmem:[#allocation10 + $0x2a8] ss:$16 sps:$4 sm:$0xff]  }
 0x46a   : > { %7466 = vmatpush1.bf16.msra.mxu1 %v12490_v55  ;;  %v12570_v55 = vld [vmem:[#allocation10 + $0x2c4] ss:$16 sps:$4 sm:$0xff]  }
 0x46b   : > { %7595 = vmatpush1.bf16.msra.mxu0 %v12493_v46  ;;  %7467 = vmatprep.subr.bf16.mxu1 %v12498_v56  ;;  %v12573_v46 = vld [vmem:[#allocation10 + $0x2cc] ss:$16 sps:$4 sm:$0xff]   ;;  %v12568_v56 = vld [vmem:[#allocation10 + $0x2c0] ss:$16 sps:$4 sm:$0xff]  }
 0x46c   : > { %7596 = vmatprep.subr.bf16.mxu0 %v12501_v60  ;;  %v12571_v60 = vld [vmem:[#allocation10 + $0x2c8] ss:$16 sps:$4 sm:$0xff]  }
 0x46e   : > { %7468 = vmatpush1.bf16.msra.mxu1 %v12496_v61  ;;  %v12576_v61 = vld [vmem:[#allocation10 + $0x2e4] ss:$16 sps:$4 sm:$0xff]  }
 0x46f   : > { %7597 = vmatpush1.bf16.msra.mxu0 %v12499_v31  ;;  %7469 = vmatprep.subr.bf16.mxu1 %v12504_v51  ;;  %v12579_v31 = vld [vmem:[#allocation10 + $0x2ec] ss:$16 sps:$4 sm:$0xff]   ;;  %v12574_v51 = vld [vmem:[#allocation10 + $0x2e0] ss:$16 sps:$4 sm:$0xff]  }
 0x470   : > { %7598 = vmatprep.subr.bf16.mxu0 %v12507_v33  ;;  %v12577_v33 = vld [vmem:[#allocation10 + $0x2e8] ss:$16 sps:$4 sm:$0xff]  }
 0x472   : > { %7470 = vmatpush1.bf16.msra.mxu1 %v12502_v43  ;;  %v12582_v43 = vld [vmem:[#allocation10 + $0x304] ss:$16 sps:$4 sm:$0xff]  }
 0x473   : > { %7599 = vmatpush1.bf16.msra.mxu0 %v12505_v36  ;;  %7471 = vmatprep.subr.bf16.mxu1 %v12510_v62  ;;  %v12585_v36 = vld [vmem:[#allocation10 + $0x30c] ss:$16 sps:$4 sm:$0xff]   ;;  %v12580_v62 = vld [vmem:[#allocation10 + $0x300] ss:$16 sps:$4 sm:$0xff]  }
 0x474   : > { %7600 = vmatprep.subr.bf16.mxu0 %v12513_v0  ;;  %v12583_v0 = vld [vmem:[#allocation10 + $0x308] ss:$16 sps:$4 sm:$0xff]  }
 0x476   : > { %7472 = vmatpush1.bf16.msra.mxu1 %v12508_v3  ;;  %v12588_v3 = vld [vmem:[#allocation10 + $0x324] ss:$16 sps:$4 sm:$0xff]  }
 0x477   : > { %7601 = vmatpush1.bf16.msra.mxu0 %v12511_v50  ;;  %7473 = vmatprep.subr.bf16.mxu1 %v12516_v9  ;;  %v12591_v50 = vld [vmem:[#allocation10 + $0x32c] ss:$16 sps:$4 sm:$0xff]   ;;  %v12586_v9 = vld [vmem:[#allocation10 + $0x320] ss:$16 sps:$4 sm:$0xff]  }
 0x478   : > { %7602 = vmatprep.subr.bf16.mxu0 %v12519_v10  ;;  %v12589_v10 = vld [vmem:[#allocation10 + $0x328] ss:$16 sps:$4 sm:$0xff]  }
 0x47a   : > { %7474 = vmatpush1.bf16.msra.mxu1 %v12514_v57  ;;  %v12594_v57 = vld [vmem:[#allocation10 + $0x344] ss:$16 sps:$4 sm:$0xff]  }
 0x47b   : > { %7603 = vmatpush1.bf16.msra.mxu0 %v12517_v11  ;;  %7475 = vmatprep.subr.bf16.mxu1 %v12522_v12  ;;  %v12597_v11 = vld [vmem:[#allocation10 + $0x34c] ss:$16 sps:$4 sm:$0xff]   ;;  %v12592_v12 = vld [vmem:[#allocation10 + $0x340] ss:$16 sps:$4 sm:$0xff]  }
 0x47c   : > { %7604 = vmatprep.subr.bf16.mxu0 %v12525_v13  ;;  %v12595_v13 = vld [vmem:[#allocation10 + $0x348] ss:$16 sps:$4 sm:$0xff]  }
 0x47e   : > { %7476 = vmatpush1.bf16.msra.mxu1 %v12520_v16  ;;  %v12600_v16 = vld [vmem:[#allocation10 + $0x364] ss:$16 sps:$4 sm:$0xff]  }
 0x47f   : > { %7605 = vmatpush1.bf16.msra.mxu0 %v12523_v17  ;;  %7477 = vmatprep.subr.bf16.mxu1 %v12528_v63  ;;  %v12603_v17 = vld [vmem:[#allocation10 + $0x36c] ss:$16 sps:$4 sm:$0xff]   ;;  %v12598_v63 = vld [vmem:[#allocation10 + $0x360] ss:$16 sps:$4 sm:$0xff]  }
 0x480   : > { %7606 = vmatprep.subr.bf16.mxu0 %v12531_v20  ;;  %v12601_v20 = vld [vmem:[#allocation10 + $0x368] ss:$16 sps:$4 sm:$0xff]  }
 0x482   : > { %7478 = vmatpush1.bf16.msra.mxu1 %v12526_v21  ;;  %v12606_v21 = vld [vmem:[#allocation10 + $0x384] ss:$16 sps:$4 sm:$0xff]  }
 0x483   : > { %7607 = vmatpush1.bf16.msra.mxu0 %v12529_v52  ;;  %7490 = vmatprep.subr.bf16.mxu1 %v12534_v23  ;;  %v12609_v52 = vld [vmem:[#allocation10 + $0x38c] ss:$16 sps:$4 sm:$0xff]   ;;  %v12604_v23 = vld [vmem:[#allocation10 + $0x380] ss:$16 sps:$4 sm:$0xff]  }
 0x484   : > { %7619 = vmatprep.subr.bf16.mxu0 %v12537_v18  ;;  %v12607_v18 = vld [vmem:[#allocation10 + $0x388] ss:$16 sps:$4 sm:$0xff]  }
 0x485   : > { %10547 = vmatmul.mubr.msk.bf16.vlgmr.msra.gmra.mrb[16].mxu1 %vm13924_vm7, %v13892_v4 }
 0x486   : > { %10564 = vmatmul.mubr.msk.bf16.vlgmr.msra.gmra.mrb[20].mxu0 %vm13924_vm7, %v13892_v4  ;;  %7491 = vmatpush1.bf16.msra.mxu1 %v12532_v24  ;;  %v12547_v4 = vld [vmem:[#allocation10 + $0x248] ss:$16 sps:$4 sm:$0xff]   ;;  %v12612_v24 = vld [vmem:[#allocation10 + $0x3a4] ss:$16 sps:$4 sm:$0xff]  }
 0x487   : > { %10551 = vmatprep.mubr.msk.bf16.mxu1 %vm13924_vm7, %v13865_v40  ;;  %7620 = vmatpush1.bf16.msra.mxu0 %v12535_v25  ;;  %v12615_v25 = vld [vmem:[#allocation10 + $0x3ac] ss:$16 sps:$4 sm:$0xff]  }
 0x488   : > { %10568 = vmatprep.mubr.msk.bf16.mxu0 %vm13924_vm7, %v13865_v40  ;;  %7492 = vmatprep.subr.bf16.mxu1 %v12540_v26  ;;  %v12556_v40 = vld [vmem:[#allocation10 + $0x280] ss:$16 sps:$4 sm:$0xff]  }
 0x489   : > { %7621 = vmatprep.subr.bf16.mxu0 %v12543_v28  ;;  %v12610_v26 = vld [vmem:[#allocation10 + $0x3a0] ss:$16 sps:$4 sm:$0xff]   ;;  %v12613_v28 = vld [vmem:[#allocation10 + $0x3a8] ss:$16 sps:$4 sm:$0xff]  }
 0x48a   : > { %7493 = vmatpush1.bf16.msra.mxu1 %v12538_v29  ;;  %v12618_v29 = vld [vmem:[#allocation10 + $0x3c4] ss:$16 sps:$4 sm:$0xff]  }
 0x48b   : > { %7622 = vmatpush1.bf16.msra.mxu0 %v12541_v1  ;;  %7494 = vmatprep.subr.bf16.mxu1 %v12546_v32  ;;  %v12621_v1 = vld [vmem:[#allocation10 + $0x3cc] ss:$16 sps:$4 sm:$0xff]   ;;  %v12616_v32 = vld [vmem:[#allocation10 + $0x3c0] ss:$16 sps:$4 sm:$0xff]  }
 0x48c   : > { %7623 = vmatprep.subr.bf16.mxu0 %v12549_v35  ;;  %v12619_v35 = vld [vmem:[#allocation10 + $0x3c8] ss:$16 sps:$4 sm:$0xff]  }
 0x48e   : > { %7495 = vmatpush1.bf16.msra.mxu1 %v12544_v27  ;;  %v12624_v27 = vld [vmem:[#allocation10 + $0x3e4] ss:$16 sps:$4 sm:$0xff]  }
 0x48f   : > { %7624 = vmatpush1.bf16.msra.mxu0 %v12547_v4  ;;  %7496 = vmatprep.subr.bf16.mxu1 %v12552_v8  ;;  %v12627_v4 = vld [vmem:[#allocation10 + $0x3ec] ss:$16 sps:$4 sm:$0xff]   ;;  %v12622_v8 = vld [vmem:[#allocation10 + $0x3e0] ss:$16 sps:$4 sm:$0xff]  }
 0x490   : > { %7625 = vmatprep.subr.bf16.mxu0 %v12555_v14  ;;  %v12625_v14 = vld [vmem:[#allocation10 + $0x3e8] ss:$16 sps:$4 sm:$0xff]  }
 0x492   : > { %7497 = vmatpush1.bf16.msra.mxu1 %v12550_v37  ;;  %v12630_v37 = vld [vmem:[#allocation10 + $0x404] ss:$16 sps:$4 sm:$0xff]  }
 0x493   : > { %7626 = vmatpush1.bf16.msra.mxu0 %v12553_v19  ;;  %7498 = vmatprep.subr.bf16.mxu1 %v12558_v54  ;;  %v12633_v19 = vld [vmem:[#allocation10 + $0x40c] ss:$16 sps:$4 sm:$0xff]   ;;  %v12628_v54 = vld [vmem:[#allocation10 + $0x400] ss:$16 sps:$4 sm:$0xff]  }
 0x494   : > { %7627 = vmatprep.subr.bf16.mxu0 %v12561_v47  ;;  %v12631_v47 = vld [vmem:[#allocation10 + $0x408] ss:$16 sps:$4 sm:$0xff]  }
 0x496   : > { %7499 = vmatpush1.bf16.msra.mxu1 %v12556_v40  ;;  %v12636_v40 = vld [vmem:[#allocation10 + $0x424] ss:$16 sps:$4 sm:$0xff]  }
 0x497   : > { %7628 = vmatpush1.bf16.msra.mxu0 %v12559_v48  ;;  %7500 = vmatprep.subr.bf16.mxu1 %v12564_v15  ;;  %v12639_v48 = vld [vmem:[#allocation10 + $0x42c] ss:$16 sps:$4 sm:$0xff]   ;;  %v12634_v15 = vld [vmem:[#allocation10 + $0x420] ss:$16 sps:$4 sm:$0xff]  }
 0x498   : > { %7629 = vmatprep.subr.bf16.mxu0 %v12567_v53  ;;  %v12637_v53 = vld [vmem:[#allocation10 + $0x428] ss:$16 sps:$4 sm:$0xff]  }
 0x49a   : > { %7501 = vmatpush1.bf16.msra.mxu1 %v12562_v59  ;;  %v12642_v59 = vld [vmem:[#allocation10 + $0x444] ss:$16 sps:$4 sm:$0xff]  }
 0x49b   : > { %7630 = vmatpush1.bf16.msra.mxu0 %v12565_v22  ;;  %7502 = vmatprep.subr.bf16.mxu1 %v12570_v55  ;;  %v12645_v22 = vld [vmem:[#allocation10 + $0x44c] ss:$16 sps:$4 sm:$0xff]   ;;  %v12640_v55 = vld [vmem:[#allocation10 + $0x440] ss:$16 sps:$4 sm:$0xff]  }
 0x49c   : > { %7631 = vmatprep.subr.bf16.mxu0 %v12573_v46  ;;  %v12643_v46 = vld [vmem:[#allocation10 + $0x448] ss:$16 sps:$4 sm:$0xff]  }
 0x49e   : > { %7503 = vmatpush1.bf16.msra.mxu1 %v12568_v56  ;;  %v12648_v56 = vld [vmem:[#allocation10 + $0x464] ss:$16 sps:$4 sm:$0xff]  }
 0x49f   : > { %7632 = vmatpush1.bf16.msra.mxu0 %v12571_v60  ;;  %7504 = vmatprep.subr.bf16.mxu1 %v12576_v61  ;;  %v12649_v60 = vld [vmem:[#allocation10 + $0x468] ss:$16 sps:$4 sm:$0xff]   ;;  %v12654_v61 = vld [vmem:[#allocation10 + $0x904] ss:$16 sps:$4 sm:$0xff]  }
 0x4a0   : > { %7633 = vmatprep.subr.bf16.mxu0 %v12579_v31  ;;  %v12657_v31 = vld [vmem:[#allocation10 + $0x90c] ss:$16 sps:$4 sm:$0xff]  }
 0x4a2   : > { %7505 = vmatpush1.bf16.msra.mxu1 %v12574_v51  ;;  %v12652_v51 = vld [vmem:[#allocation10 + $0x900] ss:$16 sps:$4 sm:$0xff]  }
 0x4a3   : > { %7634 = vmatpush1.bf16.msra.mxu0 %v12577_v33  ;;  %7506 = vmatprep.subr.bf16.mxu1 %v12582_v43  ;;  %v12655_v33 = vld [vmem:[#allocation10 + $0x908] ss:$16 sps:$4 sm:$0xff]  }
 0x4a4   : > { %7635 = vmatprep.subr.bf16.mxu0 %v12585_v36  ;;  %v12660_v36 = vld [vmem:[#allocation10 + $0x924] ss:$16 sps:$4 sm:$0xff]  }
 0x4a5   : > { %v8918_v43 = vld [vmem:[%s14378_s15 + $0x80] sm:$0xff] }
 0x4a6   : > { %7507 = vmatpush1.bf16.msra.mxu1 %v12580_v62  ;;  %v12663_v62 = vld [vmem:[#allocation10 + $0x92c] ss:$16 sps:$4 sm:$0xff]  }
 0x4a7   : > { %7636 = vmatpush1.bf16.msra.mxu0 %v12583_v0  ;;  %7508 = vmatprep.subr.bf16.mxu1 %v12588_v3  ;;  %v12658_v0 = vld [vmem:[#allocation10 + $0x920] ss:$16 sps:$4 sm:$0xff]   ;;  %v12661_v3 = vld [vmem:[#allocation10 + $0x928] ss:$16 sps:$4 sm:$0xff]  }
 0x4a8   : > { %7637 = vmatprep.subr.bf16.mxu0 %v12591_v50  ;;  %v12666_v50 = vld [vmem:[#allocation10 + $0x944] ss:$16 sps:$4 sm:$0xff]  }
 0x4aa   : > { %7509 = vmatpush1.bf16.msra.mxu1 %v12586_v9  ;;  %v12669_v9 = vld [vmem:[#allocation10 + $0x94c] ss:$16 sps:$4 sm:$0xff]  }
 0x4ab   : > { %7638 = vmatpush1.bf16.msra.mxu0 %v12589_v10  ;;  %7510 = vmatprep.subr.bf16.mxu1 %v12594_v57  ;;  %v12664_v10 = vld [vmem:[#allocation10 + $0x940] ss:$16 sps:$4 sm:$0xff]   ;;  %v12672_v57 = vld [vmem:[#allocation10 + $0x964] ss:$16 sps:$4 sm:$0xff]  }
 0x4ac   : > { %7639 = vmatprep.subr.bf16.mxu0 %v12597_v11  ;;  %v12675_v11 = vld [vmem:[#allocation10 + $0x96c] ss:$16 sps:$4 sm:$0xff]  }
 0x4ae   : > { %7511 = vmatpush1.bf16.msra.mxu1 %v12592_v12  ;;  %v12670_v12 = vld [vmem:[#allocation10 + $0x960] ss:$16 sps:$4 sm:$0xff]  }
 0x4af   : > { %7640 = vmatpush1.bf16.msra.mxu0 %v12595_v13  ;;  %7512 = vmatprep.subr.bf16.mxu1 %v12600_v16  ;;  %v12673_v13 = vld [vmem:[#allocation10 + $0x968] ss:$16 sps:$4 sm:$0xff]   ;;  %v12678_v16 = vld [vmem:[#allocation10 + $0x984] ss:$16 sps:$4 sm:$0xff]  }
 0x4b0   : > { %7641 = vmatprep.subr.bf16.mxu0 %v12603_v17  ;;  %v12681_v17 = vld [vmem:[#allocation10 + $0x98c] ss:$16 sps:$4 sm:$0xff]  }
 0x4b2   : > { %7513 = vmatpush1.bf16.msra.mxu1 %v12598_v63  ;;  %v12679_v63 = vld [vmem:[#allocation10 + $0x988] ss:$16 sps:$4 sm:$0xff]  }
 0x4b3   : > { %7642 = vmatpush1.bf16.msra.mxu0 %v12601_v20  ;;  %7514 = vmatprep.subr.bf16.mxu1 %v12606_v21  ;;  %v12684_v20 = vld [vmem:[#allocation10 + $0x9a4] ss:$16 sps:$4 sm:$0xff]   ;;  %v12687_v21 = vld [vmem:[#allocation10 + $0x9ac] ss:$16 sps:$4 sm:$0xff]  }
 0x4b4   : > { %7643 = vmatprep.subr.bf16.mxu0 %v12609_v52  ;;  %v12682_v52 = vld [vmem:[#allocation10 + $0x9a0] ss:$16 sps:$4 sm:$0xff]  }
 0x4b6   : > { %7515 = vmatpush1.bf16.msra.mxu1 %v12604_v23  ;;  %v12685_v23 = vld [vmem:[#allocation10 + $0x9a8] ss:$16 sps:$4 sm:$0xff]  }
 0x4b7   : > { %7644 = vmatpush1.bf16.msra.mxu0 %v12607_v18  ;;  %7516 = vmatprep.subr.bf16.mxu1 %v12612_v24  ;;  %v12690_v18 = vld [vmem:[#allocation10 + $0x9c4] ss:$16 sps:$4 sm:$0xff]   ;;  %v12693_v24 = vld [vmem:[#allocation10 + $0x9cc] ss:$16 sps:$4 sm:$0xff]  }
 0x4b8   : > { %7645 = vmatprep.subr.bf16.mxu0 %v12615_v25  ;;  %v12688_v25 = vld [vmem:[#allocation10 + $0x9c0] ss:$16 sps:$4 sm:$0xff]  }
 0x4ba   : > { %7517 = vmatpush1.bf16.msra.mxu1 %v12610_v26  ;;  %v12691_v26 = vld [vmem:[#allocation10 + $0x9c8] ss:$16 sps:$4 sm:$0xff]  }
 0x4bb   : > { %7646 = vmatpush1.bf16.msra.mxu0 %v12613_v28  ;;  %7518 = vmatprep.subr.bf16.mxu1 %v12618_v29  ;;  %v12696_v28 = vld [vmem:[#allocation10 + $0x9e4] ss:$16 sps:$4 sm:$0xff]   ;;  %v12699_v29 = vld [vmem:[#allocation10 + $0x9ec] ss:$16 sps:$4 sm:$0xff]  }
 0x4bc   : > { %7647 = vmatprep.subr.bf16.mxu0 %v12621_v1  ;;  %v12694_v1 = vld [vmem:[#allocation10 + $0x9e0] ss:$16 sps:$4 sm:$0xff]  }
 0x4be   : > { %7519 = vmatpush1.bf16.msra.mxu1 %v12616_v32  ;;  %v12697_v32 = vld [vmem:[#allocation10 + $0x9e8] ss:$16 sps:$4 sm:$0xff]  }
 0x4bf   : > { %7648 = vmatpush1.bf16.msra.mxu0 %v12619_v35  ;;  %7520 = vmatprep.subr.bf16.mxu1 %v12624_v27  ;;  %v12702_v35 = vld [vmem:[#allocation10 + $0xa04] ss:$16 sps:$4 sm:$0xff]   ;;  %v12705_v27 = vld [vmem:[#allocation10 + $0xa0c] ss:$16 sps:$4 sm:$0xff]  }
 0x4c0   : > { %7649 = vmatprep.subr.bf16.mxu0 %v12627_v4  ;;  %v12700_v4 = vld [vmem:[#allocation10 + $0xa00] ss:$16 sps:$4 sm:$0xff]  }
 0x4c2   : > { %7521 = vmatpush1.bf16.msra.mxu1 %v12622_v8  ;;  %v12703_v8 = vld [vmem:[#allocation10 + $0xa08] ss:$16 sps:$4 sm:$0xff]  }
 0x4c3   : > { %7650 = vmatpush1.bf16.msra.mxu0 %v12625_v14  ;;  %7533 = vmatprep.subr.bf16.mxu1 %v12630_v37  ;;  %v12708_v14 = vld [vmem:[#allocation10 + $0xa24] ss:$16 sps:$4 sm:$0xff]   ;;  %v12711_v37 = vld [vmem:[#allocation10 + $0xa2c] ss:$16 sps:$4 sm:$0xff]  }
 0x4c4   : > { %7662 = vmatprep.subr.bf16.mxu0 %v12633_v19  ;;  %v12706_v19 = vld [vmem:[#allocation10 + $0xa20] ss:$16 sps:$4 sm:$0xff]  }
 0x4c5   : > { %10555 = vmatmul.mubr.msk.bf16.vlgmr.msra.gmra.mrb[16].mxu1 %vm13924_vm7, %v13862_v39 }
 0x4c6   : > { %10572 = vmatmul.mubr.msk.bf16.vlgmr.msra.gmra.mrb[20].mxu0 %vm13924_vm7, %v13862_v39  ;;  %7534 = vmatpush1.bf16.msra.mxu1 %v12628_v54  ;;  %v12651_v39 = vld [vmem:[#allocation10 + $0x46c] ss:$16 sps:$4 sm:$0xff]   ;;  %v12709_v54 = vld [vmem:[#allocation10 + $0xa28] ss:$16 sps:$4 sm:$0xff]  }
 0x4c7   : > { %7663 = vmatpush1.bf16.msra.mxu0 %v12631_v47  ;;  %7535 = vmatprep.subr.bf16.mxu1 %v12636_v40  ;;  %v12714_v47 = vld [vmem:[#allocation10 + $0xa44] ss:$16 sps:$4 sm:$0xff]   ;;  %v12717_v40 = vld [vmem:[#allocation10 + $0xa4c] ss:$16 sps:$4 sm:$0xff]  }
 0x4c8   : > { %7664 = vmatprep.subr.bf16.mxu0 %v12639_v48  ;;  %7565 = vmatprep.mubr.bf16.mxu1 %v13250_v58  ;;  %v12712_v48 = vld [vmem:[#allocation10 + $0xa40] ss:$16 sps:$4 sm:$0xff]  }
 0x4c9   : > { %7694 = vmatprep.mubr.bf16.mxu0 %v13250_v58 }
 0x4ca   : > { %7536 = vmatpush1.bf16.msra.mxu1 %v12634_v15  ;;  %v12715_v15 = vld [vmem:[#allocation10 + $0xa48] ss:$16 sps:$4 sm:$0xff]  }
 0x4cb   : > { %7665 = vmatpush1.bf16.msra.mxu0 %v12637_v53  ;;  %7537 = vmatprep.subr.bf16.mxu1 %v12642_v59  ;;  %v12720_v53 = vld [vmem:[#allocation10 + $0xa64] ss:$16 sps:$4 sm:$0xff]   ;;  %v12723_v59 = vld [vmem:[#allocation10 + $0xa6c] ss:$16 sps:$4 sm:$0xff]  }
 0x4cc   : > { %7666 = vmatprep.subr.bf16.mxu0 %v12645_v22  ;;  %v12718_v22 = vld [vmem:[#allocation10 + $0xa60] ss:$16 sps:$4 sm:$0xff]  }
 0x4ce   : > { %7538 = vmatpush1.bf16.msra.mxu1 %v12640_v55  ;;  %v12721_v55 = vld [vmem:[#allocation10 + $0xa68] ss:$16 sps:$4 sm:$0xff]  }
 0x4cf   : > { %7667 = vmatpush1.bf16.msra.mxu0 %v12643_v46  ;;  %7539 = vmatprep.subr.bf16.mxu1 %v12648_v56  ;;  %v12726_v46 = vld [vmem:[#allocation10 + $0xa84] ss:$16 sps:$4 sm:$0xff]   ;;  %v12729_v56 = vld [vmem:[#allocation10 + $0xa8c] ss:$16 sps:$4 sm:$0xff]  }
 0x4d0   : > { %7668 = vmatprep.subr.bf16.mxu0 %v12651_v39  ;;  %v12724_v39 = vld [vmem:[#allocation10 + $0xa80] ss:$16 sps:$4 sm:$0xff]  }
 0x4d2   : > { %7540 = vmatpush1.bf16.msra.mxu1 %v12646_v7  ;;  %v12727_v7 = vld [vmem:[#allocation10 + $0xa88] ss:$16 sps:$4 sm:$0xff]  }
 0x4d3   : > { %7669 = vmatpush1.bf16.msra.mxu0 %v12649_v60  ;;  %8578 = vmatprep.subr.bf16.mxu1 %v12654_v61  ;;  %v12732_v60 = vld [vmem:[#allocation10 + $0xaa4] ss:$16 sps:$4 sm:$0xff]   ;;  %v12735_v61 = vld [vmem:[#allocation10 + $0xaac] ss:$16 sps:$4 sm:$0xff]  }
 0x4d4   : > { %8707 = vmatprep.subr.bf16.mxu0 %v12657_v31  ;;  %v12730_v31 = vld [vmem:[#allocation10 + $0xaa0] ss:$16 sps:$4 sm:$0xff]  }
 0x4d5   : > { %10556 = vmatmul.mubr.msk.bf16.vlgmr.msra.gmra.mrb[16].mxu1 %vm2015_vm1, %v13914_v2 }
 0x4d6   : > { %10573 = vmatmul.mubr.msk.bf16.vlgmr.msra.gmra.mrb[20].mxu0 %vm2015_vm1, %v13914_v2  ;;  %8579 = vmatpush1.bf16.msra.mxu1 %v12652_v51  ;;  %v12667_v2 = vld [vmem:[#allocation10 + $0x948] ss:$16 sps:$4 sm:$0xff]  }
 0x4d7   : > { %10720 = vmatprep.mubr.msk.bf16.mxu1 %vm13960_vm8, %v13897_v49  ;;  %8708 = vmatpush1.bf16.msra.mxu0 %v12655_v33  ;;  %v12733_v51 = vld [vmem:[#allocation10 + $0xaa8] ss:$16 sps:$4 sm:$0xff]   ;;  %v12738_v33 = vld [vmem:[#allocation10 + $0xac4] ss:$16 sps:$4 sm:$0xff]  }
 0x4d8   : > { %10733 = vmatprep.mubr.msk.bf16.mxu0 %vm13960_vm8, %v13897_v49  ;;  %8580 = vmatprep.subr.bf16.mxu1 %v12660_v36  ;;  %v12676_v49 = vld [vmem:[#allocation10 + $0x980] ss:$16 sps:$4 sm:$0xff]   ;;  %v12741_v36 = vld [vmem:[#allocation10 + $0xacc] ss:$16 sps:$4 sm:$0xff]  }
 0x4d9   : > { %8709 = vmatprep.subr.bf16.mxu0 %v12663_v62  ;;  %v12736_v62 = vld [vmem:[#allocation10 + $0xac0] ss:$16 sps:$4 sm:$0xff]  }
 0x4da   : > { %8581 = vmatpush1.bf16.msra.mxu1 %v12658_v0  ;;  %v12739_v0 = vld [vmem:[#allocation10 + $0xac8] ss:$16 sps:$4 sm:$0xff]  }
 0x4db   : > { %8710 = vmatpush1.bf16.msra.mxu0 %v12661_v3  ;;  %8582 = vmatprep.subr.bf16.mxu1 %v12666_v50  ;;  %v12744_v3 = vld [vmem:[#allocation10 + $0xae4] ss:$16 sps:$4 sm:$0xff]   ;;  %v12747_v50 = vld [vmem:[#allocation10 + $0xaec] ss:$16 sps:$4 sm:$0xff]  }
 0x4dc   : > { %8711 = vmatprep.subr.bf16.mxu0 %v12669_v9  ;;  %v12742_v9 = vld [vmem:[#allocation10 + $0xae0] ss:$16 sps:$4 sm:$0xff]  }
 0x4de   : > { %8583 = vmatpush1.bf16.msra.mxu1 %v12664_v10  ;;  %v12745_v10 = vld [vmem:[#allocation10 + $0xae8] ss:$16 sps:$4 sm:$0xff]  }
 0x4df   : > { %8712 = vmatpush1.bf16.msra.mxu0 %v12667_v2  ;;  %8584 = vmatprep.subr.bf16.mxu1 %v12672_v57  ;;  %v12750_v2 = vld [vmem:[#allocation10 + $0xb04] ss:$16 sps:$4 sm:$0xff]   ;;  %v12753_v57 = vld [vmem:[#allocation10 + $0xb0c] ss:$16 sps:$4 sm:$0xff]  }
 0x4e0   : > { %8713 = vmatprep.subr.bf16.mxu0 %v12675_v11  ;;  %v12748_v11 = vld [vmem:[#allocation10 + $0xb00] ss:$16 sps:$4 sm:$0xff]  }
 0x4e2   : > { %8585 = vmatpush1.bf16.msra.mxu1 %v12670_v12  ;;  %v12751_v12 = vld [vmem:[#allocation10 + $0xb08] ss:$16 sps:$4 sm:$0xff]  }
 0x4e3   : > { %8714 = vmatpush1.bf16.msra.mxu0 %v12673_v13  ;;  %8586 = vmatprep.subr.bf16.mxu1 %v12678_v16  ;;  %v12756_v13 = vld [vmem:[#allocation10 + $0xb24] ss:$16 sps:$4 sm:$0xff]   ;;  %v12759_v16 = vld [vmem:[#allocation10 + $0xb2c] ss:$16 sps:$4 sm:$0xff]  }
 0x4e4   : > { %8715 = vmatprep.subr.bf16.mxu0 %v12681_v17  ;;  %v12754_v17 = vld [vmem:[#allocation10 + $0xb20] ss:$16 sps:$4 sm:$0xff]  }
 0x4e6   : > { %8587 = vmatpush1.bf16.msra.mxu1 %v12676_v49  ;;  %v12757_v49 = vld [vmem:[#allocation10 + $0xb28] ss:$16 sps:$4 sm:$0xff]  }
 0x4e7   : > { %8716 = vmatpush1.bf16.msra.mxu0 %v12679_v63  ;;  %8588 = vmatprep.subr.bf16.mxu1 %v12684_v20  ;;  %v12762_v63 = vld [vmem:[#allocation10 + $0xb44] ss:$16 sps:$4 sm:$0xff]   ;;  %v12765_v20 = vld [vmem:[#allocation10 + $0xb4c] ss:$16 sps:$4 sm:$0xff]  }
 0x4e8   : > { %8717 = vmatprep.subr.bf16.mxu0 %v12687_v21  ;;  %v12760_v21 = vld [vmem:[#allocation10 + $0xb40] ss:$16 sps:$4 sm:$0xff]  }
 0x4ea   : > { %8589 = vmatpush1.bf16.msra.mxu1 %v12682_v52  ;;  %v12768_v52 = vld [vmem:[#allocation10 + $0xb64] ss:$16 sps:$4 sm:$0xff]  }
 0x4eb   : > { %8718 = vmatpush1.bf16.msra.mxu0 %v12685_v23  ;;  %8590 = vmatprep.subr.bf16.mxu1 %v12690_v18  ;;  %v12771_v23 = vld [vmem:[#allocation10 + $0xb6c] ss:$16 sps:$4 sm:$0xff]   ;;  %v12766_v18 = vld [vmem:[#allocation10 + $0xb60] ss:$16 sps:$4 sm:$0xff]  }
 0x4ec   : > { %8719 = vmatprep.subr.bf16.mxu0 %v12693_v24  ;;  %v12769_v24 = vld [vmem:[#allocation10 + $0xb68] ss:$16 sps:$4 sm:$0xff]  }
 0x4ee   : > { %8591 = vmatpush1.bf16.msra.mxu1 %v12688_v25  ;;  %v12774_v25 = vld [vmem:[#allocation10 + $0xb84] ss:$16 sps:$4 sm:$0xff]  }
 0x4ef   : > { %8720 = vmatpush1.bf16.msra.mxu0 %v12691_v26  ;;  %8592 = vmatprep.subr.bf16.mxu1 %v12696_v28  ;;  %v12777_v26 = vld [vmem:[#allocation10 + $0xb8c] ss:$16 sps:$4 sm:$0xff]   ;;  %v12775_v28 = vld [vmem:[#allocation10 + $0xb88] ss:$16 sps:$4 sm:$0xff]  }
 0x4f0   : > { %8721 = vmatprep.subr.bf16.mxu0 %v12699_v29  ;;  %v12780_v29 = vld [vmem:[#allocation10 + $0xba4] ss:$16 sps:$4 sm:$0xff]  }
 0x4f2   : > { %8593 = vmatpush1.bf16.msra.mxu1 %v12694_v1  ;;  %v12783_v1 = vld [vmem:[#allocation10 + $0xbac] ss:$16 sps:$4 sm:$0xff]  }
 0x4f3   : > { %8722 = vmatpush1.bf16.msra.mxu0 %v12697_v32  ;;  %8594 = vmatprep.subr.bf16.mxu1 %v12702_v35  ;;  %v12778_v32 = vld [vmem:[#allocation10 + $0xba0] ss:$16 sps:$4 sm:$0xff]   ;;  %v12781_v35 = vld [vmem:[#allocation10 + $0xba8] ss:$16 sps:$4 sm:$0xff]  }
 0x4f4   : > { %8723 = vmatprep.subr.bf16.mxu0 %v12705_v27  ;;  %v12786_v27 = vld [vmem:[#allocation10 + $0xbc4] ss:$16 sps:$4 sm:$0xff]  }
 0x4f6   : > { %8595 = vmatpush1.bf16.msra.mxu1 %v12700_v4  ;;  %v12789_v4 = vld [vmem:[#allocation10 + $0xbcc] ss:$16 sps:$4 sm:$0xff]  }
 0x4f7   : > { %8724 = vmatpush1.bf16.msra.mxu0 %v12703_v8  ;;  %8596 = vmatprep.subr.bf16.mxu1 %v12708_v14  ;;  %v12784_v8 = vld [vmem:[#allocation10 + $0xbc0] ss:$16 sps:$4 sm:$0xff]   ;;  %v12787_v14 = vld [vmem:[#allocation10 + $0xbc8] ss:$16 sps:$4 sm:$0xff]  }
 0x4f8   : > { %8725 = vmatprep.subr.bf16.mxu0 %v12711_v37  ;;  %v12792_v37 = vld [vmem:[#allocation10 + $0xbe4] ss:$16 sps:$4 sm:$0xff]  }
 0x4fa   : > { %8597 = vmatpush1.bf16.msra.mxu1 %v12706_v19  ;;  %v12795_v19 = vld [vmem:[#allocation10 + $0xbec] ss:$16 sps:$4 sm:$0xff]  }
 0x4fb   : > { %8726 = vmatpush1.bf16.msra.mxu0 %v12709_v54  ;;  %8598 = vmatprep.subr.bf16.mxu1 %v12714_v47  ;;  %v12790_v54 = vld [vmem:[#allocation10 + $0xbe0] ss:$16 sps:$4 sm:$0xff]   ;;  %v12793_v47 = vld [vmem:[#allocation10 + $0xbe8] ss:$16 sps:$4 sm:$0xff]  }
 0x4fc   : > { %8727 = vmatprep.subr.bf16.mxu0 %v12717_v40  ;;  %v12798_v40 = vld [vmem:[#allocation10 + $0xc04] ss:$16 sps:$4 sm:$0xff]  }
 0x4fe   : > { %8599 = vmatpush1.bf16.msra.mxu1 %v12712_v48  ;;  %v12801_v48 = vld [vmem:[#allocation10 + $0xc0c] ss:$16 sps:$4 sm:$0xff]  }
 0x4ff   : > { %8728 = vmatpush1.bf16.msra.mxu0 %v12715_v15  ;;  %8600 = vmatprep.subr.bf16.mxu1 %v12720_v53  ;;  %v12796_v15 = vld [vmem:[#allocation10 + $0xc00] ss:$16 sps:$4 sm:$0xff]   ;;  %v12799_v53 = vld [vmem:[#allocation10 + $0xc08] ss:$16 sps:$4 sm:$0xff]  }
 0x500   : > { %8729 = vmatprep.subr.bf16.mxu0 %v12723_v59  ;;  %v12804_v59 = vld [vmem:[#allocation10 + $0xc24] ss:$16 sps:$4 sm:$0xff]  }
 0x502   : > { %8601 = vmatpush1.bf16.msra.mxu1 %v12718_v22  ;;  %v12807_v22 = vld [vmem:[#allocation10 + $0xc2c] ss:$16 sps:$4 sm:$0xff]  }
 0x503   : > { %8730 = vmatpush1.bf16.msra.mxu0 %v12721_v55  ;;  %8602 = vmatprep.subr.bf16.mxu1 %v12726_v46  ;;  %v12802_v55 = vld [vmem:[#allocation10 + $0xc20] ss:$16 sps:$4 sm:$0xff]   ;;  %v12805_v46 = vld [vmem:[#allocation10 + $0xc28] ss:$16 sps:$4 sm:$0xff]  }
 0x504   : > { %8731 = vmatprep.subr.bf16.mxu0 %v12729_v56  ;;  %v12810_v56 = vld [vmem:[#allocation10 + $0xc44] ss:$16 sps:$4 sm:$0xff]  }
 0x506   : > { %8603 = vmatpush1.bf16.msra.mxu1 %v12724_v39  ;;  %v12813_v39 = vld [vmem:[#allocation10 + $0xc4c] ss:$16 sps:$4 sm:$0xff]  }
 0x507   : > { %8732 = vmatpush1.bf16.msra.mxu0 %v12727_v7  ;;  %8604 = vmatprep.subr.bf16.mxu1 %v12732_v60  ;;  %v12808_v7 = vld [vmem:[#allocation10 + $0xc40] ss:$16 sps:$4 sm:$0xff]   ;;  %v12811_v60 = vld [vmem:[#allocation10 + $0xc48] ss:$16 sps:$4 sm:$0xff]  }
 0x508   : > { %8733 = vmatprep.subr.bf16.mxu0 %v12735_v61  ;;  %v12816_v61 = vld [vmem:[#allocation10 + $0xc64] ss:$16 sps:$4 sm:$0xff]  }
 0x50a   : > { %8605 = vmatpush1.bf16.msra.mxu1 %v12730_v31  ;;  %v12819_v31 = vld [vmem:[#allocation10 + $0xc6c] ss:$16 sps:$4 sm:$0xff]  }
 0x50b   : > { %8734 = vmatpush1.bf16.msra.mxu0 %v12733_v51  ;;  %8606 = vmatprep.subr.bf16.mxu1 %v12738_v33  ;;  %v12814_v51 = vld [vmem:[#allocation10 + $0xc60] ss:$16 sps:$4 sm:$0xff]   ;;  %v12817_v33 = vld [vmem:[#allocation10 + $0xc68] ss:$16 sps:$4 sm:$0xff]  }
 0x50c   : > { %8735 = vmatprep.subr.bf16.mxu0 %v12741_v36  ;;  %v12822_v36 = vld [vmem:[#allocation10 + $0xc84] ss:$16 sps:$4 sm:$0xff]  }
 0x50e   : > { %8607 = vmatpush1.bf16.msra.mxu1 %v12736_v62  ;;  %v12825_v62 = vld [vmem:[#allocation10 + $0xc8c] ss:$16 sps:$4 sm:$0xff]  }
 0x50f   : > { %8736 = vmatpush1.bf16.msra.mxu0 %v12739_v0  ;;  %8608 = vmatprep.subr.bf16.mxu1 %v12744_v3  ;;  %v12820_v0 = vld [vmem:[#allocation10 + $0xc80] ss:$16 sps:$4 sm:$0xff]   ;;  %v12823_v3 = vld [vmem:[#allocation10 + $0xc88] ss:$16 sps:$4 sm:$0xff]  }
 0x510   : > { %8737 = vmatprep.subr.bf16.mxu0 %v12747_v50  ;;  %v12828_v50 = vld [vmem:[#allocation10 + $0xca4] ss:$16 sps:$4 sm:$0xff]  }
 0x512   : > { %8609 = vmatpush1.bf16.msra.mxu1 %v12742_v9  ;;  %v12831_v9 = vld [vmem:[#allocation10 + $0xcac] ss:$16 sps:$4 sm:$0xff]  }
 0x513   : > { %8738 = vmatpush1.bf16.msra.mxu0 %v12745_v10  ;;  %8621 = vmatprep.subr.bf16.mxu1 %v12750_v2  ;;  %v12826_v10 = vld [vmem:[#allocation10 + $0xca0] ss:$16 sps:$4 sm:$0xff]   ;;  %v12829_v2 = vld [vmem:[#allocation10 + $0xca8] ss:$16 sps:$4 sm:$0xff]  }
 0x514   : > { %8750 = vmatprep.subr.bf16.mxu0 %v12753_v57  ;;  %v12834_v57 = vld [vmem:[#allocation10 + $0xcc4] ss:$16 sps:$4 sm:$0xff]  }
 0x515   : > { %10723 = vmatmul.mubr.msk.bf16.vlgmr.msra.gmra.mrb[16].mxu1 %vm13960_vm8, %v13889_v34 }
 0x516   : > { %10736 = vmatmul.mubr.msk.bf16.vlgmr.msra.gmra.mrb[20].mxu0 %vm13960_vm8, %v13889_v34  ;;  %8622 = vmatpush1.bf16.msra.mxu1 %v12748_v11  ;;  %v12763_v34 = vld [vmem:[#allocation10 + $0xb48] ss:$16 sps:$4 sm:$0xff]   ;;  %v12837_v11 = vld [vmem:[#allocation10 + $0xccc] ss:$16 sps:$4 sm:$0xff]  }
 0x517   : > { %10726 = vmatprep.mubr.msk.bf16.mxu1 %vm13960_vm8, %v13867_v41  ;;  %8751 = vmatpush1.bf16.msra.mxu0 %v12751_v12  ;;  %v12832_v12 = vld [vmem:[#allocation10 + $0xcc0] ss:$16 sps:$4 sm:$0xff]  }
 0x518   : > { %10739 = vmatprep.mubr.msk.bf16.mxu0 %vm13960_vm8, %v13867_v41  ;;  %8623 = vmatprep.subr.bf16.mxu1 %v12756_v13  ;;  %v12772_v41 = vld [vmem:[#allocation10 + $0xb80] ss:$16 sps:$4 sm:$0xff]   ;;  %v12835_v13 = vld [vmem:[#allocation10 + $0xcc8] ss:$16 sps:$4 sm:$0xff]  }
 0x519   : > { %8752 = vmatprep.subr.bf16.mxu0 %v12759_v16  ;;  %v12840_v16 = vld [vmem:[#allocation10 + $0xce4] ss:$16 sps:$4 sm:$0xff]  }
 0x51a   : > { %8624 = vmatpush1.bf16.msra.mxu1 %v12754_v17  ;;  %v12843_v17 = vld [vmem:[#allocation10 + $0xcec] ss:$16 sps:$4 sm:$0xff]  }
 0x51b   : > { %8753 = vmatpush1.bf16.msra.mxu0 %v12757_v49  ;;  %8625 = vmatprep.subr.bf16.mxu1 %v12762_v63  ;;  %v12838_v49 = vld [vmem:[#allocation10 + $0xce0] ss:$16 sps:$4 sm:$0xff]   ;;  %v12841_v63 = vld [vmem:[#allocation10 + $0xce8] ss:$16 sps:$4 sm:$0xff]  }
 0x51c   : > { %8754 = vmatprep.subr.bf16.mxu0 %v12765_v20  ;;  %v12846_v20 = vld [vmem:[#allocation10 + $0xd04] ss:$16 sps:$4 sm:$0xff]  }
 0x51e   : > { %8626 = vmatpush1.bf16.msra.mxu1 %v12760_v21  ;;  %v12849_v21 = vld [vmem:[#allocation10 + $0xd0c] ss:$16 sps:$4 sm:$0xff]  }
 0x51f   : > { %8755 = vmatpush1.bf16.msra.mxu0 %v12763_v34  ;;  %8627 = vmatprep.subr.bf16.mxu1 %v12768_v52  ;;  %v12844_v34 = vld [vmem:[#allocation10 + $0xd00] ss:$16 sps:$4 sm:$0xff]   ;;  %v12847_v52 = vld [vmem:[#allocation10 + $0xd08] ss:$16 sps:$4 sm:$0xff]  }
 0x520   : > { %8756 = vmatprep.subr.bf16.mxu0 %v12771_v23  ;;  %v12852_v23 = vld [vmem:[#allocation10 + $0xd24] ss:$16 sps:$4 sm:$0xff]  }
 0x522   : > { %8628 = vmatpush1.bf16.msra.mxu1 %v12766_v18  ;;  %v12855_v18 = vld [vmem:[#allocation10 + $0xd2c] ss:$16 sps:$4 sm:$0xff]  }
 0x523   : > { %8757 = vmatpush1.bf16.msra.mxu0 %v12769_v24  ;;  %8629 = vmatprep.subr.bf16.mxu1 %v12774_v25  ;;  %v12850_v24 = vld [vmem:[#allocation10 + $0xd20] ss:$16 sps:$4 sm:$0xff]   ;;  %v12853_v25 = vld [vmem:[#allocation10 + $0xd28] ss:$16 sps:$4 sm:$0xff]  }
 0x524   : > { %8758 = vmatprep.subr.bf16.mxu0 %v12777_v26  ;;  %v12858_v26 = vld [vmem:[#allocation10 + $0xd44] ss:$16 sps:$4 sm:$0xff]  }
 0x526   : > { %8630 = vmatpush1.bf16.msra.mxu1 %v12772_v41  ;;  %v12861_v41 = vld [vmem:[#allocation10 + $0xd4c] ss:$16 sps:$4 sm:$0xff]  }
 0x527   : > { %8759 = vmatpush1.bf16.msra.mxu0 %v12775_v28  ;;  %8631 = vmatprep.subr.bf16.mxu1 %v12780_v29  ;;  %v12856_v28 = vld [vmem:[#allocation10 + $0xd40] ss:$16 sps:$4 sm:$0xff]   ;;  %v12859_v29 = vld [vmem:[#allocation10 + $0xd48] ss:$16 sps:$4 sm:$0xff]  }
 0x528   : > { %8760 = vmatprep.subr.bf16.mxu0 %v12783_v1  ;;  %v12864_v1 = vld [vmem:[#allocation10 + $0xd64] ss:$16 sps:$4 sm:$0xff]  }
 0x52a   : > { %8632 = vmatpush1.bf16.msra.mxu1 %v12778_v32  ;;  %v8919_v32 = vld [vmem:[%s14378_s15 + $0x88] sm:$0xff] }
 0x52b   : > { %8761 = vmatpush1.bf16.msra.mxu0 %v12781_v35  ;;  %8633 = vmatprep.subr.bf16.mxu1 %v12786_v27  ;;  %v12862_v35 = vld [vmem:[#allocation10 + $0xd60] ss:$16 sps:$4 sm:$0xff]   ;;  %v11031_v27 = vpack.c.bf16 %v8919_v32, %v8918_v43 }
 0x52c   : > { %8762 = vmatprep.subr.bf16.mxu0 %v12789_v4  ;;  %v8902_v4 = vld [vmem:[%s14378_s15] sm:$0xff] }
 0x52e   : > { %8634 = vmatpush1.bf16.msra.mxu1 %v12784_v8  ;;  %v8903_v8 = vld [vmem:[%s14378_s15 + $0x8] sm:$0xff] }
 0x52f   : > { %8763 = vmatpush1.bf16.msra.mxu0 %v12787_v14  ;;  %8635 = vmatprep.subr.bf16.mxu1 %v12792_v37  ;;  %v8920_v14 = vld [vmem:[%s14378_s15 + $0x90] sm:$0xff]  ;;  %v8921_v37 = vld [vmem:[%s14378_s15 + $0x98] sm:$0xff] }
 0x530   : > { %8764 = vmatprep.subr.bf16.mxu0 %v12795_v19  ;;  %v11033_v19 = vpack.c.bf16 %v8903_v8, %v8902_v4  ;;  %v8935_v4 = vld [vmem:[%s14378_s15 + $0x108] sm:$0xff] }
 0x532   : > { %8636 = vmatpush1.bf16.msra.mxu1 %v12790_v54  ;;  %v11035_v54 = vpack.c.bf16 %v8921_v37, %v8920_v14 }
 0x533   : > { %8765 = vmatpush1.bf16.msra.mxu0 %v12793_v47  ;;  %8637 = vmatprep.subr.bf16.mxu1 %v12798_v40  ;;  %v8904_v47 = vld [vmem:[%s14378_s15 + $0x10] sm:$0xff]  ;;  %v8905_v40 = vld [vmem:[%s14378_s15 + $0x18] sm:$0xff] }
 0x534   : > { %8766 = vmatprep.subr.bf16.mxu0 %v12801_v48  ;;  %v8922_v48 = vld [vmem:[%s14378_s15 + $0xa0] sm:$0xff] }
 0x536   : > { %8638 = vmatpush1.bf16.msra.mxu1 %v12796_v15  ;;  %v8923_v15 = vld [vmem:[%s14378_s15 + $0xa8] sm:$0xff] }
 0x537   : > { %8767 = vmatpush1.bf16.msra.mxu0 %v12799_v53  ;;  %8639 = vmatprep.subr.bf16.mxu1 %v12804_v59  ;;  %v11037_v53 = vpack.c.bf16 %v8905_v40, %v8904_v47  ;;  %v11039_v59 = vpack.c.bf16 %v8923_v15, %v8922_v48 }
 0x538   : > { %8768 = vmatprep.subr.bf16.mxu0 %v12807_v22  ;;  %v8906_v22 = vld [vmem:[%s14378_s15 + $0x20] sm:$0xff] }
 0x53a   : > { %8640 = vmatpush1.bf16.msra.mxu1 %v12802_v55  ;;  %v8907_v55 = vld [vmem:[%s14378_s15 + $0x28] sm:$0xff] }
 0x53b   : > { %8769 = vmatpush1.bf16.msra.mxu0 %v12805_v46  ;;  %8641 = vmatprep.subr.bf16.mxu1 %v12810_v56  ;;  %v8924_v46 = vld [vmem:[%s14378_s15 + $0xb0] sm:$0xff]  ;;  %v11041_v56 = vpack.c.bf16 %v8907_v55, %v8906_v22 }
 0x53c   : > { %8770 = vmatprep.subr.bf16.mxu0 %v12813_v39 }
 0x53e   : > { %8642 = vmatpush1.bf16.msra.mxu1 %v12808_v7  ;;  %v8908_v7 = vld [vmem:[%s14378_s15 + $0x30] sm:$0xff] }
 0x53f   : > { %8771 = vmatpush1.bf16.msra.mxu0 %v12811_v60  ;;  %8643 = vmatprep.subr.bf16.mxu1 %v12816_v61  ;;  %v8909_v60 = vld [vmem:[%s14378_s15 + $0x38] sm:$0xff]  ;;  %v8926_v61 = vld [vmem:[%s14378_s15 + $0xc0] sm:$0xff] }
 0x540   : > { %8772 = vmatprep.subr.bf16.mxu0 %v12819_v31  ;;  %v8927_v31 = vld [vmem:[%s14378_s15 + $0xc8] sm:$0xff] }
 0x542   : > { %8644 = vmatpush1.bf16.msra.mxu1 %v12814_v51  ;;  %v11045_v51 = vpack.c.bf16 %v8909_v60, %v8908_v7 }
 0x543   : > { %8773 = vmatpush1.bf16.msra.mxu0 %v12817_v33  ;;  %8645 = vmatprep.subr.bf16.mxu1 %v12822_v36  ;;  %v11047_v33 = vpack.c.bf16 %v8927_v31, %v8926_v61  ;;  %v8910_v36 = vld [vmem:[%s14378_s15 + $0x40] sm:$0xff]  ;;  %v8955_v31 = vld [vmem:[%s14378_s15 + $0x1a8] sm:$0xff] }
 0x544   : > { %8774 = vmatprep.subr.bf16.mxu0 %v12825_v62  ;;  %v8911_v62 = vld [vmem:[%s14378_s15 + $0x48] sm:$0xff]  ;;  %v8954_v61 = vld [vmem:[%s14378_s15 + $0x1a0] sm:$0xff] }
 0x546   : > { %8646 = vmatpush1.bf16.msra.mxu1 %v12820_v0  ;;  %v8928_v0 = vld [vmem:[%s14378_s15 + $0xd0] sm:$0xff] }
 0x547   : > { %8775 = vmatpush1.bf16.msra.mxu0 %v12823_v3  ;;  %8647 = vmatprep.subr.bf16.mxu1 %v12828_v50  ;;  %v8929_v3 = vld [vmem:[%s14378_s15 + $0xd8] sm:$0xff]  ;;  %v11049_v50 = vpack.c.bf16 %v8911_v62, %v8910_v36  ;;  %v8938_v36 = vld [vmem:[%s14378_s15 + $0x120] sm:$0xff]  ;;  %v8939_v62 = vld [vmem:[%s14378_s15 + $0x128] sm:$0xff] }
 0x548   : > { %8776 = vmatprep.subr.bf16.mxu0 %v12831_v9  ;;  %v11051_v9 = vpack.c.bf16 %v8929_v3, %v8928_v0  ;;  %v8956_v3 = vld [vmem:[%s14378_s15 + $0x1b0] sm:$0xff] }
 0x54a   : > { %8648 = vmatpush1.bf16.msra.mxu1 %v12826_v10  ;;  %v8912_v10 = vld [vmem:[%s14378_s15 + $0x50] sm:$0xff] }
 0x54b   : > { %8777 = vmatpush1.bf16.msra.mxu0 %v12829_v2  ;;  %8649 = vmatprep.subr.bf16.mxu1 %v12834_v57  ;;  %v8913_v2 = vld [vmem:[%s14378_s15 + $0x58] sm:$0xff]  ;;  %v8930_v57 = vld [vmem:[%s14378_s15 + $0xe0] sm:$0xff] }
 0x54c   : > { %8778 = vmatprep.subr.bf16.mxu0 %v12837_v11  ;;  %v8931_v11 = vld [vmem:[%s14378_s15 + $0xe8] sm:$0xff] }
 0x54e   : > { %8650 = vmatpush1.bf16.msra.mxu1 %v12832_v12  ;;  %v11053_v12 = vpack.c.bf16 %v8913_v2, %v8912_v10  ;;  %v8940_v2 = vld [vmem:[%s14378_s15 + $0x130] sm:$0xff] }
 0x54f   : > { %8779 = vmatpush1.bf16.msra.mxu0 %v12835_v13  ;;  %8651 = vmatprep.subr.bf16.mxu1 %v12840_v16  ;;  %v11055_v13 = vpack.c.bf16 %v8931_v11, %v8930_v57  ;;  %v8914_v16 = vld [vmem:[%s14378_s15 + $0x60] sm:$0xff]  ;;  %v8941_v57 = vld [vmem:[%s14378_s15 + $0x138] sm:$0xff] }
 0x550   : > { %8780 = vmatprep.subr.bf16.mxu0 %v12843_v17  ;;  %v8915_v17 = vld [vmem:[%s14378_s15 + $0x68] sm:$0xff]  ;;  %v8958_v11 = vld [vmem:[%s14378_s15 + $0x1c0] sm:$0xff] }
 0x552   : > { %8652 = vmatpush1.bf16.msra.mxu1 %v12838_v49  ;;  %v11057_v49 = vpack.c.bf16 %v8915_v17, %v8914_v16  ;;  %v8942_v17 = vld [vmem:[%s14378_s15 + $0x140] sm:$0xff] }
 0x553   : > { %8781 = vmatpush1.bf16.msra.mxu0 %v12841_v63  ;;  %8664 = vmatprep.subr.bf16.mxu1 %v12846_v20  ;;  %v8932_v63 = vld [vmem:[%s14378_s15 + $0xf0] sm:$0xff]  ;;  %v8933_v20 = vld [vmem:[%s14378_s15 + $0xf8] sm:$0xff] }
 0x554   : > { %8793 = vmatprep.subr.bf16.mxu0 %v12849_v21  ;;  %v11059_v21 = vpack.c.bf16 %v8933_v20, %v8932_v63  ;;  %v8960_v63 = vld [vmem:[%s14378_s15 + $0x1d0] sm:$0xff]  ;;  %v8961_v20 = vld [vmem:[%s14378_s15 + $0x1d8] sm:$0xff] }
 0x555   : > { %10729 = vmatmul.mubr.msk.bf16.vlgmr.msra.gmra.mrb[16].mxu1 %vm13960_vm8, %v13859_v38 }
 0x556   : > { %10742 = vmatmul.mubr.msk.bf16.vlgmr.msra.gmra.mrb[20].mxu0 %vm13960_vm8, %v13859_v38  ;;  %8665 = vmatpush1.bf16.msra.mxu1 %v12844_v34  ;;  %v12867_v38 = vld [vmem:[#allocation10 + $0xd6c] ss:$16 sps:$4 sm:$0xff]   ;;  %v8916_v34 = vld [vmem:[%s14378_s15 + $0x70] sm:$0xff] }
 0x557   : > { %8794 = vmatpush1.bf16.msra.mxu0 %v12847_v52  ;;  %8666 = vmatprep.subr.bf16.mxu1 %v12852_v23  ;;  %v8917_v52 = vld [vmem:[%s14378_s15 + $0x78] sm:$0xff] }
 0x558   : > { %8795 = vmatprep.subr.bf16.mxu0 %v12855_v18  ;;  %8696 = vmatprep.mubr.bf16.mxu1 %v13250_v58  ;;  %v11061_v23 = vpack.c.bf16 %v8917_v52, %v8916_v34  ;;  %v8950_v18 = vld [vmem:[%s14378_s15 + $0x180] sm:$0xff]  ;;  %v11083_v34 = vpack.c.bf16 %v8961_v20, %v8960_v63  ;;  %v8944_v52 = vld [vmem:[%s14378_s15 + $0x150] sm:$0xff] }
 0x559   : > { %8825 = vmatprep.mubr.bf16.mxu0 %v13250_v58  ;;  %v12865_v58 = vld [vmem:[#allocation10 + $0xd68] ss:$16 sps:$4 sm:$0xff]  }
 0x55a   : > { %8667 = vmatpush1.bf16.msra.mxu1 %v12850_v24  ;;  %v8951_v24 = vld [vmem:[%s14378_s15 + $0x188] sm:$0xff] }
 0x55b   : > { %8796 = vmatpush1.bf16.msra.mxu0 %v12853_v25  ;;  %8668 = vmatprep.subr.bf16.mxu1 %v12858_v26  ;;  %v11063_v25 = vpack.c.bf16 %v8951_v24, %v8950_v18  ;;  %v14102_v26 = vld [vmem:[#allocation11] sm:$0xf]  ;;  %v8962_v18 = vld [vmem:[%s14378_s15 + $0x1e0] sm:$0xff] }
 0x55c   : > { %8797 = vmatprep.subr.bf16.mxu0 %v12861_v41  ;;  %v14104_v41 = vld [vmem:[#allocation13] sm:$0xf]  ;;  %v8963_v24 = vld [vmem:[%s14378_s15 + $0x1e8] sm:$0xff] }
 0x55d   : > { %v8877_v32 = vrot.slane %v14104_v41, %v13870_v42  ;;  %v14149_v7 = vrot.slane %v14104_v41, %v13841_v6  ;;  %v9230_v20 = vld [vmem:[#allocation16 + $0xd0] sm:$0xff] }
 0x55e   : > { %8669 = vmatpush1.bf16.msra.mxu1 %v12856_v28  ;;  %v8848_v28 = vrot.slane %v14102_v26, %v13870_v42 }
 0x55f   : > { %8798 = vmatpush1.bf16.msra.mxu0 %v12859_v29  ;;  %8670 = vmatprep.subr.bf16.mxu1 %v12864_v1  ;;  %v8852_v29 = vrot.slane %v14102_v26, %v13873_v45 }
 0x560   : > { %8799 = vmatprep.subr.bf16.mxu0 %v12867_v38  ;;  %v8881_v38 = vrot.slane %v14104_v41, %v13873_v45  ;;  %v14124_v45 = vrot.slane %v14102_v26, %v13841_v6 }
 0x562   : > { %8671 = vmatpush1.bf16.msra.mxu1 %v12862_v35 }
 0x563   : > { %8800 = vmatpush1.bf16.msra.mxu0 %v12865_v58  ;;  %11032 = vmatprep.subr.bf16.mxu1 %v11031_v27  ;;  %v8934_v27 = vld [vmem:[%s14378_s15 + $0x100] sm:$0xff] }
 0x565   : > { %10730 = vmatmul.mubr.msk.bf16.vlgmr.msra.gmra.mrb[16].mxu1 %vm2015_vm1, %v13916_v30 }
 0x566   : > { %10743 = vmatmul.mubr.msk.bf16.vlgmr.msra.gmra.mrb[20].mxu0 %vm2015_vm1, %v13916_v30  ;;  %11034 = vmatpush3.bf16.msra.mxu1 %v11033_v19  ;;  %v8925_v30 = vld [vmem:[%s14378_s15 + $0xb8] sm:$0xff]  ;;  %v8952_v19 = vld [vmem:[%s14378_s15 + $0x190] sm:$0xff] }
 0x567   : > { %11036 = vmatprep.subr.bf16.mxu1 %v11035_v54  ;;  %11028 = vmatprep.mubr.msk.f32.mxu0 %vm13252_vm2, %v13251_v44  ;;  %v11043_v39 = vpack.c.bf16 %v8925_v30, %v8924_v46  ;;  %v8953_v54 = vld [vmem:[%s14378_s15 + $0x198] sm:$0xff]  ;;  %v8936_v30 = vld [vmem:[%s14378_s15 + $0x110] sm:$0xff] }
 0x568   : > { %v11067_v46 = vpack.c.bf16 %v8953_v54, %v8952_v19  ;;  %v8885_v19 = vrot.slane %v14104_v41, %v13836_v5  ;;  %v9127_v41 = vld [vmem:[#allocation14 + $0x8] sm:$0xff] }
 0x56a   : > { %11038 = vmatpush3.bf16.msra.mxu1 %v11037_v53 }
 0x56b   : > { %11040 = vmatprep.subr.bf16.mxu1 %v11039_v59  ;;  %v11065_v59 = vpack.c.bf16 %v8935_v4, %v8934_v27  ;;  %v8948_v4 = vld [vmem:[%s14378_s15 + $0x170] sm:$0xff] }
 0x56e   : > { %11042 = vmatpush3.bf16.msra.mxu1 %v11041_v56  ;;  %v8937_v56 = vld [vmem:[%s14378_s15 + $0x118] sm:$0xff] }
 0x56f   : > { %11044 = vmatprep.subr.bf16.mxu1 %v11043_v39 }
 0x572   : > { %11046 = vmatpush3.bf16.msra.mxu1 %v11045_v51  ;;  %v11069_v51 = vpack.c.bf16 %v8937_v56, %v8936_v30  ;;  %v9209_v30 = vld [vmem:[#allocation16 + $0x28] sm:$0xff]  ;;  %v9207_v56 = vld [vmem:[#allocation16 + $0x18] sm:$0xff] }
 0x573   : > { %11048 = vmatprep.subr.bf16.mxu1 %v11047_v33  ;;  %v11071_v33 = vpack.c.bf16 %v8955_v31, %v8954_v61  ;;  %v9206_v31 = vld [vmem:[#allocation16 + $0x10] sm:$0xff] }
 0x576   : > { %11050 = vmatpush3.bf16.msra.mxu1 %v11049_v50  ;;  %v8957_v50 = vld [vmem:[%s14378_s15 + $0x1b8] sm:$0xff] }
 0x577   : > { %11052 = vmatprep.subr.bf16.mxu1 %v11051_v9  ;;  %v11073_v9 = vpack.c.bf16 %v8939_v62, %v8938_v36  ;;  %v11075_v10 = vpack.c.bf16 %v8957_v50, %v8956_v3  ;;  %v9215_v36 = vld [vmem:[#allocation16 + $0x58] sm:$0xff]  ;;  %v9214_v50 = vld [vmem:[#allocation16 + $0x50] sm:$0xff] }
 0x578   : > { %v9219_v62 = vld [vmem:[#allocation16 + $0x78] sm:$0xff] }
 0x579   : > { %v11137_v3 = vpack.c.bf16 %v9219_v62, %v9215_v36 }
 0x57a   : > { %11054 = vmatpush3.bf16.msra.mxu1 %v11053_v12  ;;  %v8959_v12 = vld [vmem:[%s14378_s15 + $0x1c8] sm:$0xff] }
 0x57b   : > { %11056 = vmatprep.subr.bf16.mxu1 %v11055_v13  ;;  %v11077_v13 = vpack.c.bf16 %v8941_v57, %v8940_v2  ;;  %v11079_v16 = vpack.c.bf16 %v8959_v12, %v8958_v11  ;;  %v9223_v2 = vld [vmem:[#allocation16 + $0x98] sm:$0xff]  ;;  %v9222_v12 = vld [vmem:[#allocation16 + $0x90] sm:$0xff] }
 0x57c   : > { %v9227_v57 = vld [vmem:[#allocation16 + $0xb8] sm:$0xff] }
 0x57d   : > { %v11141_v11 = vpack.c.bf16 %v9227_v57, %v9223_v2  ;;  %v9204_v2 = vld [vmem:[#allocation16] sm:$0xff] }
 0x57e   : > { %11058 = vmatpush3.bf16.msra.mxu1 %v11057_v49  ;;  %v8943_v49 = vld [vmem:[%s14378_s15 + $0x148] sm:$0xff]  ;;  %v9208_v57 = vld [vmem:[#allocation16 + $0x20] sm:$0xff] }
 0x57f   : > { %11060 = vmatprep.subr.bf16.mxu1 %v11059_v21  ;;  %v11081_v21 = vpack.c.bf16 %v8943_v49, %v8942_v17  ;;  %v9231_v17 = vld [vmem:[#allocation16 + $0xd8] sm:$0xff] }
 0x580   : > { %v9235_v49 = vld [vmem:[#allocation16 + $0xf8] sm:$0xff] }
 0x581   : > { %v11145_v63 = vpack.c.bf16 %v9235_v49, %v9231_v17 }
 0x582   : > { %11062 = vmatpush3.bf16.msra.mxu1 %v11061_v23  ;;  %v8945_v23 = vld [vmem:[%s14378_s15 + $0x158] sm:$0xff] }
 0x583   : > { %11064 = vmatprep.subr.bf16.mxu1 %v11063_v25  ;;  %v11085_v25 = vpack.c.bf16 %v8945_v23, %v8944_v52  ;;  %v9239_v52 = vld [vmem:[#allocation16 + $0x118] sm:$0xff] }
 0x584   : > { %v9243_v23 = vld [vmem:[#allocation16 + $0x138] sm:$0xff] }
 0x638   : > { %v8698_v1 = vpop.f32.mrb[16].mxu1 }
 0x639   : > { %v8865_v43 = vmul.f32 %v8848_v28, %v8698_v1  ;;  %v14114_v35 = vpop.f32.mrb[20].mxu0  ;;  %v8700_v58 = vpop.f32.mrb[17].mxu1  ;;  %v8947_v1 = vld [vmem:[%s14378_s15 + $0x168] sm:$0xff] }
 0x63a   : > { %v8866_v8 = vmul.f32 %v8852_v29, %v8700_v58  ;;  %v8829_v14 = vpop.f32.mrb[21].mxu0  ;;  %v8702_v37 = vpop.f32.mrb[18].mxu1  ;;  %v8856_v58 = vrot.slane %v14102_v26, %v13836_v5  ;;  %v9126_v5 = vld [vmem:[#allocation14] sm:$0xff] }
 0x63b   : > { %v14132_v47 = vpop.f32.mrb[22].mxu0  ;;  %v8704_v40 = vpop.f32.mrb[19].mxu1  ;;  %v14138_v22 = vadd.f32 %v8877_v32, %v8865_v43  ;;  %v8869_v55 = vmul.f32 %v8848_v28, %v8702_v37  ;;  %v8868_v39 = vmul.f32 %v14124_v45, %v8829_v14  ;;  %v11087_v28 = vpack.c.bf16 %v8963_v24, %v8962_v18  ;;  %v8965_v43 = vld [vmem:[%s14378_s15 + $0x1f8] sm:$0xff]  ;;  %v9238_v24 = vld [vmem:[#allocation16 + $0x110] sm:$0xff] }
 0x63c   : > { %v14134_v48 = vadd.f32 %v8881_v38, %v8866_v8  ;;  %v8870_v15 = vmul.f32 %v8852_v29, %v8704_v40  ;;  %v14136_v53 = vpop.f32.mrb[23].mxu0  ;;  %v8946_v29 = vld [vmem:[%s14378_s15 + $0x160] sm:$0xff]  ;;  %v8949_v8 = vld [vmem:[%s14378_s15 + $0x178] sm:$0xff]  ;;  %v8867_v37 = vmul.f32 %v8856_v58, %v14114_v35  ;;  %v8871_v40 = vmul.f32 %v8856_v58, %v14132_v47 }
 0x63d   : > { %v14162_v6 = vadd.f32 %v8877_v32, %v8869_v55  ;;  %v14171_v0 = vadd.f32 %v14149_v7, %v8868_v39  ;;  %v11089_v32 = vpack.c.bf16 %v8947_v1, %v8946_v29  ;;  %v11093_v14 = vpack.c.bf16 %v8949_v8, %v8948_v4  ;;  %v9128_v47 = vld [vmem:[#allocation14 + $0x10] sm:$0xff]  ;;  %v9247_v29 = vld [vmem:[#allocation16 + $0x158] sm:$0xff] }
 0x63e   : > { %v14151_v60 = vadd.f32 %v8881_v38, %v8870_v15  ;;  %9030 = vmatprep.mubr.f32.mxu1 %v14134_v48  ;;  %v8964_v38 = vld [vmem:[%s14378_s15 + $0x1f0] sm:$0xff]  ;;  %v8872_v26 = vmul.f32 %v14124_v45, %v14136_v53  ;;  %v14242_v54 = vadd.f32 %v8885_v19, %v8867_v37  ;;  %v14250_v35 = vadd.f32 %v8885_v19, %v8871_v40  ;;  %v9258_v37 = vld [vmem:[#allocation16 + $0x1b0] sm:$0xff] }
 0x63f   : > { %9031 = vmatmul.mubr.f32.vlgmr.msra.gmra.mrb[20].mxu1 %v14138_v22  ;;  %v11091_v27 = vpack.c.bf16 %v8965_v43, %v8964_v38  ;;  %v11096_v45 = vpack.c.bf16 %v9127_v41, %v9126_v5  ;;  %v13254_v53 = vmov 0.0|0.0   ;;  %v11149_v18 = vpack.c.bf16 %v9243_v23, %v9239_v52  ;;  %v9251_v1 = vld [vmem:[#allocation16 + $0x178] sm:$0xff]  ;;  %v9246_v43 = vld [vmem:[#allocation16 + $0x150] sm:$0xff] }
 0x640   : > { %11066 = vmatpush3.bf16.msra.mxu1 %v11065_v59  ;;  %9035 = vmatprep.mubr.f32.mxu1 %v14151_v60  ;;  %v14246_v15 = vadd.f32 %v14149_v7, %v8872_v26  ;;  %v9129_v59 = vld [vmem:[#allocation14 + $0x18] sm:$0xff]  ;;  %v11153_v38 = vpack.c.bf16 %v9251_v1, %v9247_v29 }
 0x641   : > { %11068 = vmatprep.subr.bf16.mxu1 %v11067_v46  ;;  %11095 = vmatprep.subr.bf16.mxu0 %v13254_v53  ;;  %v11099_v55 = vpack.c.bf16 %v9129_v59, %v9128_v47  ;;  %v9205_v46 = vld [vmem:[#allocation16 + $0x8] sm:$0xff]  ;;  %v9211_v7 = vld [vmem:[#allocation16 + $0x38] sm:$0xff] }
 0x642   : > { %11097 = vmatpush3.bf16.msra.mxu0 %v11096_v45  ;;  %v11101_v39 = vpack.c.bf16 %v9209_v30, %v9205_v46  ;;  %v11133_v61 = vpack.c.bf16 %v9211_v7, %v9207_v56  ;;  %v9259_v4 = vld [vmem:[#allocation16 + $0x1b8] sm:$0xff] }
 0x643   : > { %9036 = vmatmul.mubr.f32.gmra.mrb[22].mxu1 %v14162_v6  ;;  %11098 = vmatprep.subr.bf16.mxu0 %v13254_v53  ;;  %v9263_v26 = vld [vmem:[#allocation16 + $0x1d8] sm:$0xff] }
 0x644   : > { %11070 = vmatpush3.bf16.msra.mxu1 %v11069_v51  ;;  %9105 = vmatprep.mubr.f32.mxu1 %v14171_v0  ;;  %v9210_v51 = vld [vmem:[#allocation16 + $0x30] sm:$0xff]  ;;  %v9267_v40 = vld [vmem:[#allocation16 + $0x1f8] sm:$0xff] }
 0x645   : > { %11072 = vmatprep.subr.bf16.mxu1 %v11071_v33  ;;  %v11135_v33 = vpack.c.bf16 %v9210_v51, %v9206_v31  ;;  %v11161_v5 = vpack.c.bf16 %v9267_v40, %v9263_v26  ;;  %v9244_v40 = vld [vmem:[#allocation16 + $0x140] sm:$0xff] }
 0x646   : > { %11100 = vmatpush3.bf16.msra.mxu0 %v11099_v55 }
 0x647   : > { %11102 = vmatprep.subr.bf16.mxu0 %v11101_v39 }
 0x648   : > { %11074 = vmatpush3.bf16.msra.mxu1 %v11073_v9  ;;  %v9218_v9 = vld [vmem:[#allocation16 + $0x70] sm:$0xff] }
 0x649   : > { %11076 = vmatprep.subr.bf16.mxu1 %v11075_v10  ;;  %v11139_v10 = vpack.c.bf16 %v9218_v9, %v9214_v50 }
 0x64c   : > { %11078 = vmatpush3.bf16.msra.mxu1 %v11077_v13  ;;  %v9226_v13 = vld [vmem:[#allocation16 + $0xb0] sm:$0xff] }
 0x64d   : > { %11080 = vmatprep.subr.bf16.mxu1 %v11079_v16  ;;  %v11143_v16 = vpack.c.bf16 %v9226_v13, %v9222_v12  ;;  %v9217_v12 = vld [vmem:[#allocation16 + $0x68] sm:$0xff] }
 0x650   : > { %11082 = vmatpush3.bf16.msra.mxu1 %v11081_v21  ;;  %v9234_v21 = vld [vmem:[#allocation16 + $0xf0] sm:$0xff] }
 0x651   : > { %11084 = vmatprep.subr.bf16.mxu1 %v11083_v34  ;;  %v11147_v34 = vpack.c.bf16 %v9234_v21, %v9230_v20  ;;  %v9216_v20 = vld [vmem:[#allocation16 + $0x60] sm:$0xff]  ;;  %v9221_v21 = vld [vmem:[#allocation16 + $0x88] sm:$0xff] }
 0x654   : > { %11086 = vmatpush3.bf16.msra.mxu1 %v11085_v25  ;;  %v9242_v25 = vld [vmem:[#allocation16 + $0x130] sm:$0xff] }
 0x655   : > { %11088 = vmatprep.subr.bf16.mxu1 %v11087_v28  ;;  %v11151_v28 = vpack.c.bf16 %v9242_v25, %v9238_v24  ;;  %v9224_v24 = vld [vmem:[#allocation16 + $0xa0] sm:$0xff]  ;;  %v9229_v25 = vld [vmem:[#allocation16 + $0xc8] sm:$0xff] }
 0x658   : > { %11090 = vmatpush3.bf16.msra.mxu1 %v11089_v32  ;;  %v9250_v32 = vld [vmem:[#allocation16 + $0x170] sm:$0xff] }
 0x659   : > { %11092 = vmatprep.subr.bf16.mxu1 %v11091_v27  ;;  %v11155_v58 = vpack.c.bf16 %v9250_v32, %v9246_v43  ;;  %v9255_v27 = vld [vmem:[#allocation16 + $0x198] sm:$0xff]  ;;  %v9232_v43 = vld [vmem:[#allocation16 + $0xe0] sm:$0xff]  ;;  %v9237_v32 = vld [vmem:[#allocation16 + $0x108] sm:$0xff] }
 0x65a   : > { %v11157_v8 = vpack.c.bf16 %v9259_v4, %v9255_v27 }
 0x65c   : > { %11094 = vmatpush3.bf16.msra.mxu1 %v11093_v14  ;;  %v9254_v14 = vld [vmem:[#allocation16 + $0x190] sm:$0xff] }
 0x65d   : > { %11134 = vmatprep.subr.bf16.mxu1 %v11133_v61  ;;  %v11159_v19 = vpack.c.bf16 %v9258_v37, %v9254_v14  ;;  %v9245_v14 = vld [vmem:[#allocation16 + $0x148] sm:$0xff] }
 0x65e   : > { %v9249_v37 = vld [vmem:[#allocation16 + $0x168] sm:$0xff] }
 0x65f   : > { %9106 = vmatmul.mubr.f32.vlgmr.msra.gmra.mrb[24].mxu1 %v14242_v54  ;;  %v11121_v26 = vpack.c.bf16 %v9249_v37, %v9245_v14  ;;  %v9459_v37 = vld [vmem:[%s13636_s26 + $0x8] sm:$0xff] }
 0x660   : > { %9110 = vmatprep.mubr.f32.mxu1 %v14246_v15  ;;  %11136 = vmatpush1.bf16.msra.mxu1 %v11135_v33 }
 0x661   : > { %11138 = vmatprep.subr.bf16.mxu1 %v11137_v3 }
 0x663   : > { %9111 = vmatmul.mubr.f32.gmra.mrb[26].mxu1 %v14250_v35 }
 0x664   : > { %9403 = vmatprep.mubr.f32.mxu1 %v13251_v44  ;;  %11140 = vmatpush1.bf16.msra.mxu1 %v11139_v10 }
 0x665   : > { %11142 = vmatprep.subr.bf16.mxu1 %v11141_v11  ;;  %v9213_v11 = vld [vmem:[#allocation16 + $0x48] sm:$0xff] }
 0x666   : > { %v11105_v49 = vpack.c.bf16 %v9217_v12, %v9213_v11 }
 0x668   : > { %11144 = vmatpush1.bf16.msra.mxu1 %v11143_v16  ;;  %v11103_v16 = vpack.c.bf16 %v9208_v57, %v9204_v2 }
 0x669   : > { %11146 = vmatprep.subr.bf16.mxu1 %v11145_v63  ;;  %v9212_v63 = vld [vmem:[#allocation16 + $0x40] sm:$0xff] }
 0x66a   : > { %v11107_v52 = vpack.c.bf16 %v9216_v20, %v9212_v63 }
 0x66c   : > { %11148 = vmatpush1.bf16.msra.mxu1 %v11147_v34  ;;  %v9225_v34 = vld [vmem:[#allocation16 + $0xa8] sm:$0xff] }
 0x66d   : > { %11150 = vmatprep.subr.bf16.mxu1 %v11149_v18  ;;  %v11109_v23 = vpack.c.bf16 %v9225_v34, %v9221_v21  ;;  %v9220_v18 = vld [vmem:[#allocation16 + $0x80] sm:$0xff] }
 0x66e   : > { %v11111_v29 = vpack.c.bf16 %v9224_v24, %v9220_v18 }
 0x670   : > { %11152 = vmatpush1.bf16.msra.mxu1 %v11151_v28  ;;  %v9233_v28 = vld [vmem:[#allocation16 + $0xe8] sm:$0xff] }
 0x671   : > { %11154 = vmatprep.subr.bf16.mxu1 %v11153_v38  ;;  %v11113_v1 = vpack.c.bf16 %v9233_v28, %v9229_v25  ;;  %v9228_v38 = vld [vmem:[#allocation16 + $0xc0] sm:$0xff] }
 0x672   : > { %v11115_v27 = vpack.c.bf16 %v9232_v43, %v9228_v38 }
 0x674   : > { %11156 = vmatpush1.bf16.msra.mxu1 %v11155_v58  ;;  %v9241_v58 = vld [vmem:[#allocation16 + $0x128] sm:$0xff] }
 0x675   : > { %11158 = vmatprep.subr.bf16.mxu1 %v11157_v8  ;;  %v11117_v4 = vpack.c.bf16 %v9241_v58, %v9237_v32  ;;  %v9236_v8 = vld [vmem:[#allocation16 + $0x100] sm:$0xff] }
 0x678   : > { %11160 = vmatpush1.bf16.msra.mxu1 %v11159_v19 }
 0x679   : > { %11162 = vmatprep.subr.bf16.mxu1 %v11161_v5  ;;  %v9248_v5 = vld [vmem:[#allocation16 + $0x160] sm:$0xff] }
 0x712   : > { %v10935_v41 = vpop.f32.mrb[20].mxu1 }
 0x713   : > { %v10936_v45 = vpop.f32.mrb[21].mxu1 }
 0x714   : > { %v10937_v53 = vadd.f32 %v10936_v45, %v10935_v41  ;;  %v9253_v41 = vld [vmem:[#allocation16 + $0x188] sm:$0xff] }
 0x715   : > { %v9257_v45 = vld [vmem:[#allocation16 + $0x1a8] sm:$0xff] }
 0x716   : > { %v10938_v47 = vpop.f32.mrb[22].mxu1 }
 0x717   : > { %v10939_v59 = vpop.f32.mrb[23].mxu1 }
 0x718   : > { %v10940_v55 = vadd.f32 %v10939_v59, %v10938_v47  ;;  %v11125_v47 = vpack.c.bf16 %v9257_v45, %v9253_v41  ;;  %v9252_v59 = vld [vmem:[#allocation16 + $0x180] sm:$0xff] }
 0x719   : > { %v9461_v41 = vld [vmem:[%s13636_s26 + $0x18] sm:$0xff] }
 0x71a   : > { %v9465_v45 = vld [vmem:[%s13636_s26 + $0x38] sm:$0xff] }
 0x732   : > { %v10973_v46 = vpop.f32.mrb[24].mxu1 }
 0x733   : > { %v10974_v30 = vpop.f32.mrb[25].mxu1 }
 0x734   : > { %v10975_v56 = vadd.f32 %v10974_v30, %v10973_v46  ;;  %v9261_v46 = vld [vmem:[#allocation16 + $0x1c8] sm:$0xff] }
 0x735   : > { %v9265_v30 = vld [vmem:[#allocation16 + $0x1e8] sm:$0xff] }
 0x736   : > { %v9108_v39 = vadd.f32 %v10975_v56, %v10937_v53  ;;  %v10976_v7 = vpop.f32.mrb[26].mxu1  ;;  %v11123_v53 = vpack.c.bf16 %v9248_v5, %v9244_v40 }
 0x737   : > { %v10977_v61 = vpop.f32.mrb[27].mxu1 }
 0x738   : > { %v10978_v31 = vadd.f32 %v10977_v61, %v10976_v7  ;;  %v9117_v33 = vsel %vm9116_vm9, %v9108_v39, 0.0  ;;  %v11129_v39 = vpack.c.bf16 %v9265_v30, %v9261_v46  ;;  %v9260_v7 = vld [vmem:[#allocation16 + $0x1c0] sm:$0xff] }
 0x739   : > { %v9264_v61 = vld [vmem:[#allocation16 + $0x1e0] sm:$0xff] }
 0x73a   : > { %v9113_v51 = vadd.f32 %v10978_v31, %v10940_v55  ;;  %v9256_v55 = vld [vmem:[#allocation16 + $0x1a0] sm:$0xff]  ;;  %v9262_v31 = vld [vmem:[#allocation16 + $0x1d0] sm:$0xff] }
 0x73b   : > { %v11127_v56 = vpack.c.bf16 %v9256_v55, %v9252_v59 }
 0x73c   : > { %v9118_v36 = vsel %vm9116_vm9, %v9113_v51, 0.0  ;;  %v11131_v51 = vpack.c.bf16 %v9264_v61, %v9260_v7 }
 0x73d   : > { %v9119_v62 = vadd.f32 %v9118_v36, %v9117_v33  ;;  %v9266_v33 = vld [vmem:[#allocation16 + $0x1f0] sm:$0xff] }
 0x73e   : > { %v11163_v36 = vpack.c.bf16 %v9266_v33, %v9262_v31 }
 0x73f   : > { %v9120_v3 = vrot.slane %v9119_v62, 4 }
 0x740   : > { %11164 = vmatpush1.bf16.msra.mxu1 %v11163_v36 }
 0x741   : > { %v9121_v50 = vadd.f32 %v9120_v3, %v9119_v62 }
 0x743   : > { %v9122_v9 = vrot.slane %v9121_v50, 2 }
 0x745   : > { %v9123_v10 = vadd.f32 %v9122_v9, %v9121_v50 }
 0x747   : > { %v9124_v13 = vrot.slane %v9123_v10, 1 }
 0x749   : > { %v9125_v17 = vadd.f32 %v9124_v13, %v9123_v10 }
 0x74b   : > { %11029 = vmatmul.mubr.msk.f32.vlgmr.msra.gmra.mrb[24].mxu0 %vm9116_vm9, %v9125_v17 }
 0x74c   : > { %11104 = vmatpush1.bf16.msra.mxu0 %v11103_v16  ;;  %9332 = vmatprep.mubr.f32.mxu0 %v13251_v44  ;;  %v9240_v44 = vld [vmem:[#allocation16 + $0x120] sm:$0xff] }
 0x74d   : > { %11106 = vmatprep.subr.bf16.mxu0 %v11105_v49  ;;  %v11119_v19 = vpack.c.bf16 %v9240_v44, %v9236_v8 }
 0x750   : > { %11108 = vmatpush1.bf16.msra.mxu0 %v11107_v52 }
 0x751   : > { %11110 = vmatprep.subr.bf16.mxu0 %v11109_v23 }
 0x754   : > { %11112 = vmatpush1.bf16.msra.mxu0 %v11111_v29  ;;  %v9458_v29 = vld [vmem:[%s13636_s26] sm:$0xff] }
 0x755   : > { %11114 = vmatprep.subr.bf16.mxu0 %v11113_v1  ;;  %v9462_v1 = vld [vmem:[%s13636_s26 + $0x20] sm:$0xff] }
 0x758   : > { %11116 = vmatpush1.bf16.msra.mxu0 %v11115_v27  ;;  %v9460_v27 = vld [vmem:[%s13636_s26 + $0x10] sm:$0xff] }
 0x759   : > { %11118 = vmatprep.subr.bf16.mxu0 %v11117_v4  ;;  %v9464_v4 = vld [vmem:[%s13636_s26 + $0x30] sm:$0xff] }
 0x75c   : > { %11120 = vmatpush1.bf16.msra.mxu0 %v11119_v19  ;;  %v9463_v19 = vld [vmem:[%s13636_s26 + $0x28] sm:$0xff] }
 0x75d   : > { %11122 = vmatprep.subr.bf16.mxu0 %v11121_v26 }
 0x760   : > { %11124 = vmatpush1.bf16.msra.mxu0 %v11123_v53 }
 0x761   : > { %11126 = vmatprep.subr.bf16.mxu0 %v11125_v47 }
 0x764   : > { %11128 = vmatpush1.bf16.msra.mxu0 %v11127_v56 }
 0x765   : > { %11130 = vmatprep.subr.bf16.mxu0 %v11129_v39 }
 0x768   : > { %11132 = vmatpush1.bf16.msra.mxu0 %v11131_v51 }
 0x81e   : > { %v9199_v62 = vpop.f32.mrb[24].mxu0 }
 0x81f   : > { %v9203_v3 = vmax.f32 %v9199_v62, 0.0  ;;  %v11030_v50 = vpop.f32.mrb[25].mxu0 }
 0x821   : > { %9333 = vmatmul.mubr.f32.vlgmr.msra.gmra.mrb[26].mxu0 %v9203_v3  ;;  %9404 = vmatmul.mubr.f32.vlgmr.msra.gmra.mrb[28].mxu1 %v9203_v3 }
 0x8f4   : > { %v9334_v9 = vpop.f32.mrb[26].mxu0  ;;  %v9405_v10 = vpop.f32.mrb[28].mxu1 }
 0x8f5   : > { %v10745_v2 = vmul.f32 -1.442695, %v9334_v9  ;;  %v10747_v57 = vmul.f32 -1.442695, %v9405_v10  ;;  %v9336_v11 = vpop.f32.mrb[27].mxu0  ;;  %v9407_v12 = vpop.f32.mrb[29].mxu1 }
 0x8f6   : > { %v10746_v13 = vmul.f32 -1.442695, %v9336_v11  ;;  %v10748_v16 = vmul.f32 -1.442695, %v9407_v12 }
 0x8f7   : > { %12868 = vpow2.f32 %v10745_v2 }
 0x8f8   : > { %12870 = vpow2.f32 %v10747_v57 }
 0x8f9   : > { %12872 = vpow2.f32 %v10746_v13 }
 0x8fa   : > { %12874 = vpow2.f32 %v10748_v16 }
 0x901   : > { %v12869_v17 = vpop.eup %12868 }
 0x902   : > { %v12871_v49 = vpop.eup %12870  ;;  %v9422_v63 = vadd.f32 1.0, %v12869_v17 }
 0x903   : > { %v12873_v20 = vpop.eup %12872  ;;  %v9424_v21 = vadd.f32 1.0, %v12871_v49 }
 0x904   : > { %v12875_v34 = vpop.eup %12874  ;;  %12876 = vrcp.f32 %v9422_v63  ;;  %v9423_v52 = vadd.f32 1.0, %v12873_v20 }
 0x905   : > { %12878 = vrcp.f32 %v9424_v21  ;;  %v9425_v23 = vadd.f32 1.0, %v12875_v34 }
 0x906   : > { %12880 = vrcp.f32 %v9423_v52 }
 0x907   : > { %12882 = vrcp.f32 %v9425_v23 }
 0x90e   : > { %v12877_v18 = vpop.eup %12876 }
 0x90f   : > { %v12879_v24 = vpop.eup %12878  ;;  %v9437_v25 = vrot.slane %v12877_v18, %v13870_v42 }
 0x910   : > { %v12881_v28 = vpop.eup %12880  ;;  %v9445_v38 = vrot.slane %v12879_v24, %v13870_v42 }
 0x911   : > { %v12883_v43 = vpop.eup %12882  ;;  %v9450_v32 = vmul.f32 %v9437_v25, %v14138_v22  ;;  %v9454_v58 = vmul.f32 %v9437_v25, %v14162_v6  ;;  %v9441_v8 = vrot.slane %v12881_v28, %v13870_v42 }
 0x912   : > { %v9452_v44 = vmul.f32 %v9445_v38, %v14242_v54  ;;  %v9456_v14 = vmul.f32 %v9445_v38, %v14250_v35  ;;  %v9449_v26 = vrot.slane %v12883_v43, %v13870_v42 }
 0x913   : > { %v9466_v40 = vadd.f32 %v9458_v29, %v9450_v32  ;;  %v9470_v5 = vadd.f32 %v9462_v1, %v9454_v58  ;;  %v9451_v22 = vmul.f32 %v9441_v8, %v14134_v48  ;;  %v9455_v6 = vmul.f32 %v9441_v8, %v14151_v60 }
 0x914   : > { %v9468_v53 = vadd.f32 %v9460_v27, %v9452_v44  ;;  %v9472_v47 = vadd.f32 %v9464_v4, %v9456_v14  ;;  %v9453_v59 = vmul.f32 %v9449_v26, %v14171_v0  ;;  %v9457_v54 = vmul.f32 %v9449_v26, %v14246_v15 }
 0x915   : > { %v9474_v35 = vmax.f32 %v9466_v40, 0.0  ;;  %v9478_v42 = vmax.f32 %v9470_v5, 0.0  ;;  %v9467_v55 = vadd.f32 %v9459_v37, %v9451_v22  ;;  %v9471_v46 = vadd.f32 %v9463_v19, %v9455_v6 }
 0x916   : > { %v9476_v30 = vmax.f32 %v9468_v53, 0.0  ;;  %v9480_v48 = vmax.f32 %v9472_v47, 0.0  ;;  %v9469_v56 = vadd.f32 %v9461_v41, %v9453_v59  ;;  %v9473_v60 = vadd.f32 %v9465_v45, %v9457_v54 }
 0x917   : > { %9482 = vst [vmem:[%s527_s24] sm:$0xff] %v9474_v35  ;;  %9486 = vst [vmem:[%s527_s24 + $0x20] sm:$0xff] %v9478_v42  ;;  %v9475_v39 = vmax.f32 %v9467_v55, 0.0  ;;  %v9479_v0 = vmax.f32 %v9471_v46, 0.0 }
 0x918   : > { %9484 = vst [vmem:[%s527_s24 + $0x10] sm:$0xff] %v9476_v30  ;;  %9488 = vst [vmem:[%s527_s24 + $0x30] sm:$0xff] %v9480_v48  ;;  %v9477_v15 = vmax.f32 %v9469_v56, 0.0  ;;  %v9481_v7 = vmax.f32 %v9473_v60, 0.0 }
 0x919   : > { %9483 = vst [vmem:[%s527_s24 + $0x8] sm:$0xff] %v9475_v39  ;;  %9487 = vst [vmem:[%s527_s24 + $0x28] sm:$0xff] %v9479_v0 }
 0x91a   : > { %9485 = vst [vmem:[%s527_s24 + $0x18] sm:$0xff] %v9477_v15  ;;  %9489 = vst [vmem:[%s527_s24 + $0x38] sm:$0xff] %v9481_v7 }
 0x91b   : > { %13162 = shalt.err (!%p13159_p11)
}
 0x91c   : > { %s13163_s11 = scalar_lea.hbm %s14284_s14, 1024  ;;  %s13167_s21 = scalar_lea.hbm %s14380_s23, 2048 }
 0x91d   : > { %p13164_p3 = scmp.ne.s32.totalorder %s14284_s14, %s13163_s11  ;;  %p13168_p6 = scmp.lt.u32.totalorder %s14284_s14, %s14380_s23 }
 0x91e   : > { %p13169_p9 = scmp.lt.u32.totalorder %s13167_s21, %s13163_s11  ;;  %p13171_p1 = scmp.lt.u32.totalorder %s13163_s11, %s14284_s14 }
 0x91f   : > { %p13165_p5 = pnand %p13164_p3, %p14381_p13 }
 0x920   : > { %p13170_p12 = por %p13169_p9, %p13168_p6 }
 0x921   : > { %p13166_p7 = pneg %p13165_p5 }
 0x922   : > { %p13172_p0 = por %p13171_p1, %p13170_p12 }
 0x924   : > { %p13173_p2 = pnand %p13172_p0, %p13166_p7 }
 0x926   : > { %13176 = shalt.err (!%p13173_p2)
}
 0x927   : > { %s13256_s13 = smov 512   ;;  %s13257_s12 = smov 32  }
 0x928   : > { %11344 = dma.vmem_to_hbm [thread:$0]  (%p14381_p13), %s14286_s16, 1024, %s14284_s14, %s9491_s8, %s13256_s13, %s13256_s13, %s13257_s12  }
 0x929 PF: > { %s9519_s24 = sand.u32 1, %s13219_s17   ;;  %p14382_p8 = scmp.ne.s32.totalorder %s14360_s28, 0 }
 0x92a   : > { %p14383_p4 = scmp.ge.s32.totalorder %s13231_s20, 2  ;;  %s9520_s11 = scalar_lea.sflag [#allocation4], %s9519_s24 }
 0x92c   : > { %p11376_p10 = pnand %p14383_p4, %p14382_p8 }
 0x92e   : > { %13214 = dma.done.wait (!%p11376_p10), %s9520_s11, 1024  }
 0x92f   : > { %13216 = vsyncadd (!%p11376_p10), %s9520_s11, 4294966272  ;;  %p28_p11 = scmp.ge.s32.totalorder %s13548_s22, 4   ;;  %s14384_s17 = smov %s13223_s18 }
 0x930   : > { %s14385_s18 = smov %s13227_s19  ;;  %s14386_s19 = smov %s13559_s27 }
 0x931   : > { %s14387_s20 = smov %s13548_s22  ;;  %30 = sbr.rel (!%p28_p11) target bundleno = 13 (0xd), region = 148 }
 0x938   :  { %9525 = vsyncpa [#allocation3], 1 }
 0x939   :  { %9527 = vsyncpa [#allocation3 + $0x1], 1 }
 0x93a   :  { %9528 = vsyncpa [#allocation6], 1 }
 0x93b   :  { %9529 = vsyncpa [#allocation9], 1 }
 0x93c   :  { %9530 = vsyncpa [#allocation12], 1 }
 0x93d   :  { %9531 = vsyncpa [#allocation15], 1 }
 0x93e   :  { %9532 = vsyncpa [#allocation4], 1 }
 0x93f   :  { %9534 = vsyncpa [#allocation4 + $0x1], 1 }

</bundles_post_ra>
